<compile_context>
chip_gen: v7x
topology: tpu7x:2x2x1
jax: 0.10.0
libtpu: 0.0.40
codegen_flags: <defaults>
</compile_context>

<pallas_src>
import functools

import jax
import jax.numpy as jnp
from jax import lax
from jax.experimental import pallas as pl
from jax.experimental.pallas import tpu as pltpu

LANES = 128          # TPU lane width; tiny feature dims are padded up to this
CHUNK = 128          # batch rows per inner-loop step (one packed output row)
IN_FEATURES = 10
HIDDEN = 5


def mlp_kernel(x_ref, w1_ref, b1_ref, w2_ref, b2_ref, o_ref):
    """fc2(relu(fc1(x))) for one batch tile, output packed batch-in-lanes.

    x_ref:  (TB, 10) f32          w1_ref: (10, 128) bf16 (cols >= 5 are zero)
    b1_ref: (1, 128) f32          w2_ref: (128, 1) f32   (rows >= 5 are zero)
    b2_ref: (1,) f32 in SMEM      o_ref:  (TB//128, 128) f32, o[r,l] = y[r*128+l]
    """
    n_chunks = o_ref.shape[0]

    def chunk(c, carry):
        r0 = pl.multiple_of(c * CHUNK, CHUNK)
        # fc1 on the MXU: in-kernel f32->bf16 cast, f32 accumulation.  Hidden
        # lanes 5..127 of w1/b1 are exact zeros, so those columns stay 0 after
        # the ReLU and cannot leak into the fc2 reduction.
        xc = x_ref[pl.ds(r0, CHUNK), :].astype(jnp.bfloat16)         # (128, 10)
        h = jnp.dot(xc, w1_ref[...], preferred_element_type=jnp.float32)
        h = jnp.maximum(h + b1_ref[...], 0.0)                        # (128, 128)

        # Pack batch into lanes: the transpose is XLU work (idle here); fc2 is
        # then an exact-f32 VPU multiply + sublane reduction yielding one
        # lane-dense (1, 128) output row per 128 batch rows (unmasked store).
        ht = h.T                                                     # (128h,128b)
        y = jnp.sum(ht * w2_ref[...], axis=0, keepdims=True) + b2_ref[0]
        o_ref[pl.ds(c, 1), :] = y.astype(o_ref.dtype)
        return carry

    lax.fori_loop(0, n_chunks, chunk, 0, unroll=True)


def _round_up(n, m):
    return (n + m - 1) // m * m


def prepare_params(w1, b1, w2, b2):
    """Pad/cast the tiny weights once (hoisted off the per-call path).

    w1: [10, 5] (fc1.weight.T)   b1: [5]
    w2: [5, 1]  (fc2.weight.T)   b2: [1]
    """
    w1p = jnp.zeros((IN_FEATURES, LANES), jnp.bfloat16).at[:, :HIDDEN].set(
        jnp.asarray(w1, jnp.float32).astype(jnp.bfloat16))
    b1p = jnp.zeros((1, LANES), jnp.float32).at[0, :HIDDEN].set(
        jnp.asarray(b1, jnp.float32).reshape(HIDDEN))
    w2p = jnp.zeros((LANES, 1), jnp.float32).at[:HIDDEN, 0].set(
        jnp.asarray(w2, jnp.float32).reshape(HIDDEN))
    b2s = jnp.asarray(b2, jnp.float32).reshape((1,))
    return w1p, b1p, w2p, b2s


@functools.partial(jax.jit, static_argnames=("tb",))
def net_forward(x, w1p, b1p, w2p, b2s, tb=2048):
    """Pallas forward pass of Net on a [B, 10] f32 batch. Returns [B, 1] f32."""
    B, fin = x.shape
    assert fin == IN_FEATURES
    assert w1p.shape == (IN_FEATURES, LANES) and w2p.shape == (LANES, 1)

    # Batch tile: multiple of 128 (lane-dense packed output rows).  Multi-step
    # grids additionally need tb//128 to be a multiple of 8 so the packed
    # output block keeps an (8,128)-aligned sublane dim.
    tb = _round_up(max(int(tb), CHUNK), CHUNK)
    b128 = _round_up(B, CHUNK)
    if tb >= b128:
        tb = b128                          # single grid step; block == full array
    else:
        tb = _round_up(tb, 8 * CHUNK)
    bp = _round_up(B, tb)
    grid = (bp // tb,)

    # Zero-pad x only when the batch is not tile-aligned (no dtype cast here —
    # the bf16 cast happens in-kernel).  Padded rows compute relu(b1)·w2 + b2
    # garbage and are sliced off below; nothing may consume the padded region.
    if bp != B:
        x = jnp.pad(x, ((0, bp - B), (0, 0)))

    flops = 2 * bp * IN_FEATURES * LANES + 4 * bp * LANES
    bytes_accessed = (bp * IN_FEATURES * 4          # streamed x (f32)
                      + bp * 4                      # packed output
                      + w1p.size * 2 + (b1p.size + w2p.size + 1) * 4)

    out = pl.pallas_call(
        mlp_kernel,
        out_shape=jax.ShapeDtypeStruct((bp // CHUNK, LANES), jnp.float32),
        grid=grid,
        in_specs=[
            pl.BlockSpec((tb, IN_FEATURES), lambda i: (i, 0)),       # streamed x
            pl.BlockSpec((IN_FEATURES, LANES), lambda i: (0, 0)),    # resident w1
            pl.BlockSpec((1, LANES), lambda i: (0, 0)),              # resident b1
            pl.BlockSpec((LANES, 1), lambda i: (0, 0)),              # resident w2
            pl.BlockSpec(memory_space=pltpu.MemorySpace.SMEM),       # b2 scalar
        ],
        out_specs=pl.BlockSpec((tb // CHUNK, LANES), lambda i: (i, 0)),
        compiler_params=pltpu.CompilerParams(
            dimension_semantics=("parallel",)),      # megacore split on v7x
        cost_estimate=pl.CostEstimate(
            flops=flops, transcendentals=0, bytes_accessed=bytes_accessed),
    )(x, w1p, b1p, w2p, b2s)

    # out[r, l] holds batch row r*128 + l; drop batch padding, restore [B, 1].
    return out.reshape(-1)[:B].reshape(B, 1)


def init_params(key):
    """Deterministic init matching nn.Linear(10, 5) / nn.Linear(5, 1) shapes.

    Weights are stored pre-transposed as [in_features, out_features].
    """
    k1, k2, k3, k4 = jax.random.split(key, 4)
    lim1 = 1.0 / jnp.sqrt(10.0)
    lim2 = 1.0 / jnp.sqrt(5.0)
    w1 = jax.random.uniform(k1, (IN_FEATURES, HIDDEN), jnp.float32, -lim1, lim1)
    b1 = jax.random.uniform(k2, (HIDDEN,), jnp.float32, -lim1, lim1)
    w2 = jax.random.uniform(k3, (HIDDEN, 1), jnp.float32, -lim2, lim2)
    b2 = jax.random.uniform(k4, (1,), jnp.float32, -lim2, lim2)
    return w1, b1, w2, b2


if __name__ == "__main__":
    key = jax.random.PRNGKey(0)
    kx, kp = jax.random.split(key)
    w1, b1, w2, b2 = init_params(kp)
    params = prepare_params(w1, b1, w2, b2)      # once, off the forward path

    def reference(x):
        # Reference built from the same bf16-rounded fc1 operands the kernel
        # feeds the MXU (f32 accumulation); fc2 stays exact f32.
        xr = x.astype(jnp.bfloat16).astype(jnp.float32)
        w1r = w1.astype(jnp.bfloat16).astype(jnp.float32)
        h = jnp.maximum(
            jnp.dot(xr, w1r, precision=jax.lax.Precision.HIGHEST)
            + b1.reshape(1, HIDDEN), 0.0)
        return (jnp.sum(h * w2.reshape(1, HIDDEN), axis=-1, keepdims=True)
                + b2.reshape(1, 1))

    # B=2500: multi-step grid (2 blocks of 2048) + ragged-tail padding.
    # B=16:   single-step grid with a small padded tile.
    for B in (2500, 16):
        x = jax.random.normal(jax.random.fold_in(kx, B), (B, IN_FEATURES),
                              jnp.float32)
        out = jax.block_until_ready(net_forward(x, *params))
        assert out.shape == (B, 1)
        ref = reference(x)
        err = float(jnp.max(jnp.abs(out - ref)))
        assert jnp.allclose(out, ref, atol=1e-4, rtol=1e-4), err

    print("KERNEL_OK")
</pallas_src>

<mosaic_0001>
module attributes {stable_mosaic.version = 11 : i64} {
  func.func @mlp_kernel(%arg0: i32, %arg1: memref<2048x10xf32, #tpu.memory_space<vmem>>, %arg2: memref<10x128xbf16, #tpu.memory_space<vmem>>, %arg3: memref<1x128xf32, #tpu.memory_space<vmem>>, %arg4: memref<128x1xf32, #tpu.memory_space<vmem>>, %arg5: memref<1xf32, #tpu.memory_space<smem>>, %arg6: memref<16x128xf32, #tpu.memory_space<vmem>>) attributes {dimension_semantics = [#tpu.dimension_semantics<parallel>], iteration_bounds = array<i64: 2>, scalar_prefetch = 0 : i64, scratch_operands = 0 : i64, tpu.core_type = #tpu.core_type<tc>, window_params = [{transform_indices = @transform_0, window_bounds = array<i64: 2048, 10>}, {pipeline_mode = #tpu.pipeline_mode<synchronous>, transform_indices = @transform_1, window_bounds = array<i64: 10, 128>}, {pipeline_mode = #tpu.pipeline_mode<synchronous>, transform_indices = @transform_2, window_bounds = array<i64: 1, 128>}, {pipeline_mode = #tpu.pipeline_mode<synchronous>, transform_indices = @transform_3, window_bounds = array<i64: 128, 1>}, {transform_indices = @transform_4, window_bounds = array<i64: 1>}, {transform_indices = @transform_5, window_bounds = array<i64: 16, 128>}]} {
    %c0_i32 = arith.constant 0 : i32
    %c128_i32 = arith.constant 128 : i32
    %0 = arith.muli %c0_i32, %c128_i32 : i32
    %1 = tpu.assume_multiple %0, 128 : i32
    %2 = arith.index_cast %1 : i32 to index
    %c0 = arith.constant 0 : index
    %3 = vector.load %arg1[%2, %c0] : memref<2048x10xf32, #tpu.memory_space<vmem>>, vector<128x10xf32>
    %4 = arith.truncf %3 : vector<128x10xf32> to vector<128x10xbf16>
    %c0_0 = arith.constant 0 : index
    %c0_1 = arith.constant 0 : index
    %5 = vector.load %arg2[%c0_0, %c0_1] : memref<10x128xbf16, #tpu.memory_space<vmem>>, vector<10x128xbf16>
    %cst = arith.constant dense<0.000000e+00> : vector<128x128xf32>
    %6 = tpu.matmul %4, %5, %cst {dimension_numbers = #tpu.dot_dimension_numbers<[1], [0], [0], [1], [0, 0, 1, 1], [], []>} : vector<128x10xbf16>, vector<10x128xbf16>, vector<128x128xf32> -> vector<128x128xf32>
    %c0_2 = arith.constant 0 : index
    %c0_3 = arith.constant 0 : index
    %7 = vector.load %arg3[%c0_2, %c0_3] : memref<1x128xf32, #tpu.memory_space<vmem>>, vector<1x128xf32>
    %8 = vector.broadcast %7 : vector<1x128xf32> to vector<128x128xf32>
    %9 = arith.addf %6, %8 : vector<128x128xf32>
    %cst_4 = arith.constant 0.000000e+00 : f32
    %10 = vector.broadcast %cst_4 : f32 to vector<128x128xf32>
    %11 = arith.maximumf %9, %10 : vector<128x128xf32>
    %12 = tpu.transpose %11, [1, 0] : vector<128x128xf32> -> vector<128x128xf32>
    %c0_5 = arith.constant 0 : index
    %c0_6 = arith.constant 0 : index
    %13 = vector.load %arg4[%c0_5, %c0_6] : memref<128x1xf32, #tpu.memory_space<vmem>>, vector<128x1xf32>
    %14 = vector.broadcast %13 : vector<128x1xf32> to vector<128x128xf32>
    %15 = arith.mulf %12, %14 : vector<128x128xf32>
    %cst_7 = arith.constant dense<0.000000e+00> : vector<128xf32>
    %16 = vector.multi_reduction <add>, %15, %cst_7 [0] : vector<128x128xf32> to vector<128xf32>
    %17 = vector.shape_cast %16 : vector<128xf32> to vector<1x128xf32>
    %c0_8 = arith.constant 0 : index
    %18 = memref.load %arg5[%c0_8] : memref<1xf32, #tpu.memory_space<smem>>
    %19 = vector.broadcast %18 : f32 to vector<1x128xf32>
    %20 = arith.addf %17, %19 : vector<1x128xf32>
    %21 = arith.index_cast %c0_i32 : i32 to index
    %c0_9 = arith.constant 0 : index
    %22 = vector.load %arg6[%21, %c0_9] : memref<16x128xf32, #tpu.memory_space<vmem>>, vector<1x128xf32>
    tpu.vector_store %arg6[%21, %c0_9], %20 {strides = array<i32>} : memref<16x128xf32, #tpu.memory_space<vmem>>, vector<1x128xf32>,
    %c1_i32 = arith.constant 1 : i32
    %c128_i32_10 = arith.constant 128 : i32
    %23 = arith.muli %c1_i32, %c128_i32_10 : i32
    %24 = tpu.assume_multiple %23, 128 : i32
    %25 = arith.index_cast %24 : i32 to index
    %c0_11 = arith.constant 0 : index
    %26 = vector.load %arg1[%25, %c0_11] : memref<2048x10xf32, #tpu.memory_space<vmem>>, vector<128x10xf32>
    %27 = arith.truncf %26 : vector<128x10xf32> to vector<128x10xbf16>
    %c0_12 = arith.constant 0 : index
    %c0_13 = arith.constant 0 : index
    %28 = vector.load %arg2[%c0_12, %c0_13] : memref<10x128xbf16, #tpu.memory_space<vmem>>, vector<10x128xbf16>
    %cst_14 = arith.constant dense<0.000000e+00> : vector<128x128xf32>
    %29 = tpu.matmul %27, %28, %cst_14 {dimension_numbers = #tpu.dot_dimension_numbers<[1], [0], [0], [1], [0, 0, 1, 1], [], []>} : vector<128x10xbf16>, vector<10x128xbf16>, vector<128x128xf32> -> vector<128x128xf32>
    %c0_15 = arith.constant 0 : index
    %c0_16 = arith.constant 0 : index
    %30 = vector.load %arg3[%c0_15, %c0_16] : memref<1x128xf32, #tpu.memory_space<vmem>>, vector<1x128xf32>
    %31 = vector.broadcast %30 : vector<1x128xf32> to vector<128x128xf32>
    %32 = arith.addf %29, %31 : vector<128x128xf32>
    %cst_17 = arith.constant 0.000000e+00 : f32
    %33 = vector.broadcast %cst_17 : f32 to vector<128x128xf32>
    %34 = arith.maximumf %32, %33 : vector<128x128xf32>
    %35 = tpu.transpose %34, [1, 0] : vector<128x128xf32> -> vector<128x128xf32>
    %c0_18 = arith.constant 0 : index
    %c0_19 = arith.constant 0 : index
    %36 = vector.load %arg4[%c0_18, %c0_19] : memref<128x1xf32, #tpu.memory_space<vmem>>, vector<128x1xf32>
    %37 = vector.broadcast %36 : vector<128x1xf32> to vector<128x128xf32>
    %38 = arith.mulf %35, %37 : vector<128x128xf32>
    %cst_20 = arith.constant dense<0.000000e+00> : vector<128xf32>
    %39 = vector.multi_reduction <add>, %38, %cst_20 [0] : vector<128x128xf32> to vector<128xf32>
    %40 = vector.shape_cast %39 : vector<128xf32> to vector<1x128xf32>
    %c0_21 = arith.constant 0 : index
    %41 = memref.load %arg5[%c0_21] : memref<1xf32, #tpu.memory_space<smem>>
    %42 = vector.broadcast %41 : f32 to vector<1x128xf32>
    %43 = arith.addf %40, %42 : vector<1x128xf32>
    %44 = arith.index_cast %c1_i32 : i32 to index
    %c0_22 = arith.constant 0 : index
    %45 = vector.load %arg6[%44, %c0_22] : memref<16x128xf32, #tpu.memory_space<vmem>>, vector<1x128xf32>
    tpu.vector_store %arg6[%44, %c0_22], %43 {strides = array<i32>} : memref<16x128xf32, #tpu.memory_space<vmem>>, vector<1x128xf32>,
    %c2_i32 = arith.constant 2 : i32
    %c128_i32_23 = arith.constant 128 : i32
    %46 = arith.muli %c2_i32, %c128_i32_23 : i32
    %47 = tpu.assume_multiple %46, 128 : i32
    %48 = arith.index_cast %47 : i32 to index
    %c0_24 = arith.constant 0 : index
    %49 = vector.load %arg1[%48, %c0_24] : memref<2048x10xf32, #tpu.memory_space<vmem>>, vector<128x10xf32>
    %50 = arith.truncf %49 : vector<128x10xf32> to vector<128x10xbf16>
    %c0_25 = arith.constant 0 : index
    %c0_26 = arith.constant 0 : index
    %51 = vector.load %arg2[%c0_25, %c0_26] : memref<10x128xbf16, #tpu.memory_space<vmem>>, vector<10x128xbf16>
    %cst_27 = arith.constant dense<0.000000e+00> : vector<128x128xf32>
    %52 = tpu.matmul %50, %51, %cst_27 {dimension_numbers = #tpu.dot_dimension_numbers<[1], [0], [0], [1], [0, 0, 1, 1], [], []>} : vector<128x10xbf16>, vector<10x128xbf16>, vector<128x128xf32> -> vector<128x128xf32>
    %c0_28 = arith.constant 0 : index
    %c0_29 = arith.constant 0 : index
    %53 = vector.load %arg3[%c0_28, %c0_29] : memref<1x128xf32, #tpu.memory_space<vmem>>, vector<1x128xf32>
    %54 = vector.broadcast %53 : vector<1x128xf32> to vector<128x128xf32>
    %55 = arith.addf %52, %54 : vector<128x128xf32>
    %cst_30 = arith.constant 0.000000e+00 : f32
    %56 = vector.broadcast %cst_30 : f32 to vector<128x128xf32>
    %57 = arith.maximumf %55, %56 : vector<128x128xf32>
    %58 = tpu.transpose %57, [1, 0] : vector<128x128xf32> -> vector<128x128xf32>
    %c0_31 = arith.constant 0 : index
    %c0_32 = arith.constant 0 : index
    %59 = vector.load %arg4[%c0_31, %c0_32] : memref<128x1xf32, #tpu.memory_space<vmem>>, vector<128x1xf32>
    %60 = vector.broadcast %59 : vector<128x1xf32> to vector<128x128xf32>
    %61 = arith.mulf %58, %60 : vector<128x128xf32>
    %cst_33 = arith.constant dense<0.000000e+00> : vector<128xf32>
    %62 = vector.multi_reduction <add>, %61, %cst_33 [0] : vector<128x128xf32> to vector<128xf32>
    %63 = vector.shape_cast %62 : vector<128xf32> to vector<1x128xf32>
    %c0_34 = arith.constant 0 : index
    %64 = memref.load %arg5[%c0_34] : memref<1xf32, #tpu.memory_space<smem>>
    %65 = vector.broadcast %64 : f32 to vector<1x128xf32>
    %66 = arith.addf %63, %65 : vector<1x128xf32>
    %67 = arith.index_cast %c2_i32 : i32 to index
    %c0_35 = arith.constant 0 : index
    %68 = vector.load %arg6[%67, %c0_35] : memref<16x128xf32, #tpu.memory_space<vmem>>, vector<1x128xf32>
    tpu.vector_store %arg6[%67, %c0_35], %66 {strides = array<i32>} : memref<16x128xf32, #tpu.memory_space<vmem>>, vector<1x128xf32>,
    %c3_i32 = arith.constant 3 : i32
    %c128_i32_36 = arith.constant 128 : i32
    %69 = arith.muli %c3_i32, %c128_i32_36 : i32
    %70 = tpu.assume_multiple %69, 128 : i32
    %71 = arith.index_cast %70 : i32 to index
    %c0_37 = arith.constant 0 : index
    %72 = vector.load %arg1[%71, %c0_37] : memref<2048x10xf32, #tpu.memory_space<vmem>>, vector<128x10xf32>
    %73 = arith.truncf %72 : vector<128x10xf32> to vector<128x10xbf16>
    %c0_38 = arith.constant 0 : index
    %c0_39 = arith.constant 0 : index
    %74 = vector.load %arg2[%c0_38, %c0_39] : memref<10x128xbf16, #tpu.memory_space<vmem>>, vector<10x128xbf16>
    %cst_40 = arith.constant dense<0.000000e+00> : vector<128x128xf32>
    %75 = tpu.matmul %73, %74, %cst_40 {dimension_numbers = #tpu.dot_dimension_numbers<[1], [0], [0], [1], [0, 0, 1, 1], [], []>} : vector<128x10xbf16>, vector<10x128xbf16>, vector<128x128xf32> -> vector<128x128xf32>
    %c0_41 = arith.constant 0 : index
    %c0_42 = arith.constant 0 : index
    %76 = vector.load %arg3[%c0_41, %c0_42] : memref<1x128xf32, #tpu.memory_space<vmem>>, vector<1x128xf32>
    %77 = vector.broadcast %76 : vector<1x128xf32> to vector<128x128xf32>
    %78 = arith.addf %75, %77 : vector<128x128xf32>
    %cst_43 = arith.constant 0.000000e+00 : f32
    %79 = vector.broadcast %cst_43 : f32 to vector<128x128xf32>
    %80 = arith.maximumf %78, %79 : vector<128x128xf32>
    %81 = tpu.transpose %80, [1, 0] : vector<128x128xf32> -> vector<128x128xf32>
    %c0_44 = arith.constant 0 : index
    %c0_45 = arith.constant 0 : index
    %82 = vector.load %arg4[%c0_44, %c0_45] : memref<128x1xf32, #tpu.memory_space<vmem>>, vector<128x1xf32>
    %83 = vector.broadcast %82 : vector<128x1xf32> to vector<128x128xf32>
    %84 = arith.mulf %81, %83 : vector<128x128xf32>
    %cst_46 = arith.constant dense<0.000000e+00> : vector<128xf32>
    %85 = vector.multi_reduction <add>, %84, %cst_46 [0] : vector<128x128xf32> to vector<128xf32>
    %86 = vector.shape_cast %85 : vector<128xf32> to vector<1x128xf32>
    %c0_47 = arith.constant 0 : index
    %87 = memref.load %arg5[%c0_47] : memref<1xf32, #tpu.memory_space<smem>>
    %88 = vector.broadcast %87 : f32 to vector<1x128xf32>
    %89 = arith.addf %86, %88 : vector<1x128xf32>
    %90 = arith.index_cast %c3_i32 : i32 to index
    %c0_48 = arith.constant 0 : index
    %91 = vector.load %arg6[%90, %c0_48] : memref<16x128xf32, #tpu.memory_space<vmem>>, vector<1x128xf32>
    tpu.vector_store %arg6[%90, %c0_48], %89 {strides = array<i32>} : memref<16x128xf32, #tpu.memory_space<vmem>>, vector<1x128xf32>,
    %c4_i32 = arith.constant 4 : i32
    %c128_i32_49 = arith.constant 128 : i32
    %92 = arith.muli %c4_i32, %c128_i32_49 : i32
    %93 = tpu.assume_multiple %92, 128 : i32
    %94 = arith.index_cast %93 : i32 to index
    %c0_50 = arith.constant 0 : index
    %95 = vector.load %arg1[%94, %c0_50] : memref<2048x10xf32, #tpu.memory_space<vmem>>, vector<128x10xf32>
    %96 = arith.truncf %95 : vector<128x10xf32> to vector<128x10xbf16>
    %c0_51 = arith.constant 0 : index
    %c0_52 = arith.constant 0 : index
    %97 = vector.load %arg2[%c0_51, %c0_52] : memref<10x128xbf16, #tpu.memory_space<vmem>>, vector<10x128xbf16>
    %cst_53 = arith.constant dense<0.000000e+00> : vector<128x128xf32>
    %98 = tpu.matmul %96, %97, %cst_53 {dimension_numbers = #tpu.dot_dimension_numbers<[1], [0], [0], [1], [0, 0, 1, 1], [], []>} : vector<128x10xbf16>, vector<10x128xbf16>, vector<128x128xf32> -> vector<128x128xf32>
    %c0_54 = arith.constant 0 : index
    %c0_55 = arith.constant 0 : index
    %99 = vector.load %arg3[%c0_54, %c0_55] : memref<1x128xf32, #tpu.memory_space<vmem>>, vector<1x128xf32>
    %100 = vector.broadcast %99 : vector<1x128xf32> to vector<128x128xf32>
    %101 = arith.addf %98, %100 : vector<128x128xf32>
    %cst_56 = arith.constant 0.000000e+00 : f32
    %102 = vector.broadcast %cst_56 : f32 to vector<128x128xf32>
    %103 = arith.maximumf %101, %102 : vector<128x128xf32>
    %104 = tpu.transpose %103, [1, 0] : vector<128x128xf32> -> vector<128x128xf32>
    %c0_57 = arith.constant 0 : index
    %c0_58 = arith.constant 0 : index
    %105 = vector.load %arg4[%c0_57, %c0_58] : memref<128x1xf32, #tpu.memory_space<vmem>>, vector<128x1xf32>
    %106 = vector.broadcast %105 : vector<128x1xf32> to vector<128x128xf32>
    %107 = arith.mulf %104, %106 : vector<128x128xf32>
    %cst_59 = arith.constant dense<0.000000e+00> : vector<128xf32>
    %108 = vector.multi_reduction <add>, %107, %cst_59 [0] : vector<128x128xf32> to vector<128xf32>
    %109 = vector.shape_cast %108 : vector<128xf32> to vector<1x128xf32>
    %c0_60 = arith.constant 0 : index
    %110 = memref.load %arg5[%c0_60] : memref<1xf32, #tpu.memory_space<smem>>
    %111 = vector.broadcast %110 : f32 to vector<1x128xf32>
    %112 = arith.addf %109, %111 : vector<1x128xf32>
    %113 = arith.index_cast %c4_i32 : i32 to index
    %c0_61 = arith.constant 0 : index
    %114 = vector.load %arg6[%113, %c0_61] : memref<16x128xf32, #tpu.memory_space<vmem>>, vector<1x128xf32>
    tpu.vector_store %arg6[%113, %c0_61], %112 {strides = array<i32>} : memref<16x128xf32, #tpu.memory_space<vmem>>, vector<1x128xf32>,
    %c5_i32 = arith.constant 5 : i32
    %c128_i32_62 = arith.constant 128 : i32
    %115 = arith.muli %c5_i32, %c128_i32_62 : i32
    %116 = tpu.assume_multiple %115, 128 : i32
    %117 = arith.index_cast %116 : i32 to index
    %c0_63 = arith.constant 0 : index
    %118 = vector.load %arg1[%117, %c0_63] : memref<2048x10xf32, #tpu.memory_space<vmem>>, vector<128x10xf32>
    %119 = arith.truncf %118 : vector<128x10xf32> to vector<128x10xbf16>
    %c0_64 = arith.constant 0 : index
    %c0_65 = arith.constant 0 : index
    %120 = vector.load %arg2[%c0_64, %c0_65] : memref<10x128xbf16, #tpu.memory_space<vmem>>, vector<10x128xbf16>
    %cst_66 = arith.constant dense<0.000000e+00> : vector<128x128xf32>
    %121 = tpu.matmul %119, %120, %cst_66 {dimension_numbers = #tpu.dot_dimension_numbers<[1], [0], [0], [1], [0, 0, 1, 1], [], []>} : vector<128x10xbf16>, vector<10x128xbf16>, vector<128x128xf32> -> vector<128x128xf32>
    %c0_67 = arith.constant 0 : index
    %c0_68 = arith.constant 0 : index
    %122 = vector.load %arg3[%c0_67, %c0_68] : memref<1x128xf32, #tpu.memory_space<vmem>>, vector<1x128xf32>
    %123 = vector.broadcast %122 : vector<1x128xf32> to vector<128x128xf32>
    %124 = arith.addf %121, %123 : vector<128x128xf32>
    %cst_69 = arith.constant 0.000000e+00 : f32
    %125 = vector.broadcast %cst_69 : f32 to vector<128x128xf32>
    %126 = arith.maximumf %124, %125 : vector<128x128xf32>
    %127 = tpu.transpose %126, [1, 0] : vector<128x128xf32> -> vector<128x128xf32>
    %c0_70 = arith.constant 0 : index
    %c0_71 = arith.constant 0 : index
    %128 = vector.load %arg4[%c0_70, %c0_71] : memref<128x1xf32, #tpu.memory_space<vmem>>, vector<128x1xf32>
    %129 = vector.broadcast %128 : vector<128x1xf32> to vector<128x128xf32>
    %130 = arith.mulf %127, %129 : vector<128x128xf32>
    %cst_72 = arith.constant dense<0.000000e+00> : vector<128xf32>
    %131 = vector.multi_reduction <add>, %130, %cst_72 [0] : vector<128x128xf32> to vector<128xf32>
    %132 = vector.shape_cast %131 : vector<128xf32> to vector<1x128xf32>
    %c0_73 = arith.constant 0 : index
    %133 = memref.load %arg5[%c0_73] : memref<1xf32, #tpu.memory_space<smem>>
    %134 = vector.broadcast %133 : f32 to vector<1x128xf32>
    %135 = arith.addf %132, %134 : vector<1x128xf32>
    %136 = arith.index_cast %c5_i32 : i32 to index
    %c0_74 = arith.constant 0 : index
    %137 = vector.load %arg6[%136, %c0_74] : memref<16x128xf32, #tpu.memory_space<vmem>>, vector<1x128xf32>
    tpu.vector_store %arg6[%136, %c0_74], %135 {strides = array<i32>} : memref<16x128xf32, #tpu.memory_space<vmem>>, vector<1x128xf32>,
    %c6_i32 = arith.constant 6 : i32
    %c128_i32_75 = arith.constant 128 : i32
    %138 = arith.muli %c6_i32, %c128_i32_75 : i32
    %139 = tpu.assume_multiple %138, 128 : i32
    %140 = arith.index_cast %139 : i32 to index
    %c0_76 = arith.constant 0 : index
    %141 = vector.load %arg1[%140, %c0_76] : memref<2048x10xf32, #tpu.memory_space<vmem>>, vector<128x10xf32>
    %142 = arith.truncf %141 : vector<128x10xf32> to vector<128x10xbf16>
    %c0_77 = arith.constant 0 : index
    %c0_78 = arith.constant 0 : index
    %143 = vector.load %arg2[%c0_77, %c0_78] : memref<10x128xbf16, #tpu.memory_space<vmem>>, vector<10x128xbf16>
    %cst_79 = arith.constant dense<0.000000e+00> : vector<128x128xf32>
    %144 = tpu.matmul %142, %143, %cst_79 {dimension_numbers = #tpu.dot_dimension_numbers<[1], [0], [0], [1], [0, 0, 1, 1], [], []>} : vector<128x10xbf16>, vector<10x128xbf16>, vector<128x128xf32> -> vector<128x128xf32>
    %c0_80 = arith.constant 0 : index
    %c0_81 = arith.constant 0 : index
    %145 = vector.load %arg3[%c0_80, %c0_81] : memref<1x128xf32, #tpu.memory_space<vmem>>, vector<1x128xf32>
    %146 = vector.broadcast %145 : vector<1x128xf32> to vector<128x128xf32>
    %147 = arith.addf %144, %146 : vector<128x128xf32>
    %cst_82 = arith.constant 0.000000e+00 : f32
    %148 = vector.broadcast %cst_82 : f32 to vector<128x128xf32>
    %149 = arith.maximumf %147, %148 : vector<128x128xf32>
    %150 = tpu.transpose %149, [1, 0] : vector<128x128xf32> -> vector<128x128xf32>
    %c0_83 = arith.constant 0 : index
    %c0_84 = arith.constant 0 : index
    %151 = vector.load %arg4[%c0_83, %c0_84] : memref<128x1xf32, #tpu.memory_space<vmem>>, vector<128x1xf32>
    %152 = vector.broadcast %151 : vector<128x1xf32> to vector<128x128xf32>
    %153 = arith.mulf %150, %152 : vector<128x128xf32>
    %cst_85 = arith.constant dense<0.000000e+00> : vector<128xf32>
    %154 = vector.multi_reduction <add>, %153, %cst_85 [0] : vector<128x128xf32> to vector<128xf32>
    %155 = vector.shape_cast %154 : vector<128xf32> to vector<1x128xf32>
    %c0_86 = arith.constant 0 : index
    %156 = memref.load %arg5[%c0_86] : memref<1xf32, #tpu.memory_space<smem>>
    %157 = vector.broadcast %156 : f32 to vector<1x128xf32>
    %158 = arith.addf %155, %157 : vector<1x128xf32>
    %159 = arith.index_cast %c6_i32 : i32 to index
    %c0_87 = arith.constant 0 : index
    %160 = vector.load %arg6[%159, %c0_87] : memref<16x128xf32, #tpu.memory_space<vmem>>, vector<1x128xf32>
    tpu.vector_store %arg6[%159, %c0_87], %158 {strides = array<i32>} : memref<16x128xf32, #tpu.memory_space<vmem>>, vector<1x128xf32>,
    %c7_i32 = arith.constant 7 : i32
    %c128_i32_88 = arith.constant 128 : i32
    %161 = arith.muli %c7_i32, %c128_i32_88 : i32
    %162 = tpu.assume_multiple %161, 128 : i32
    %163 = arith.index_cast %162 : i32 to index
    %c0_89 = arith.constant 0 : index
    %164 = vector.load %arg1[%163, %c0_89] : memref<2048x10xf32, #tpu.memory_space<vmem>>, vector<128x10xf32>
    %165 = arith.truncf %164 : vector<128x10xf32> to vector<128x10xbf16>
    %c0_90 = arith.constant 0 : index
    %c0_91 = arith.constant 0 : index
    %166 = vector.load %arg2[%c0_90, %c0_91] : memref<10x128xbf16, #tpu.memory_space<vmem>>, vector<10x128xbf16>
    %cst_92 = arith.constant dense<0.000000e+00> : vector<128x128xf32>
    %167 = tpu.matmul %165, %166, %cst_92 {dimension_numbers = #tpu.dot_dimension_numbers<[1], [0], [0], [1], [0, 0, 1, 1], [], []>} : vector<128x10xbf16>, vector<10x128xbf16>, vector<128x128xf32> -> vector<128x128xf32>
    %c0_93 = arith.constant 0 : index
    %c0_94 = arith.constant 0 : index
    %168 = vector.load %arg3[%c0_93, %c0_94] : memref<1x128xf32, #tpu.memory_space<vmem>>, vector<1x128xf32>
    %169 = vector.broadcast %168 : vector<1x128xf32> to vector<128x128xf32>
    %170 = arith.addf %167, %169 : vector<128x128xf32>
    %cst_95 = arith.constant 0.000000e+00 : f32
    %171 = vector.broadcast %cst_95 : f32 to vector<128x128xf32>
    %172 = arith.maximumf %170, %171 : vector<128x128xf32>
    %173 = tpu.transpose %172, [1, 0] : vector<128x128xf32> -> vector<128x128xf32>
    %c0_96 = arith.constant 0 : index
    %c0_97 = arith.constant 0 : index
    %174 = vector.load %arg4[%c0_96, %c0_97] : memref<128x1xf32, #tpu.memory_space<vmem>>, vector<128x1xf32>
    %175 = vector.broadcast %174 : vector<128x1xf32> to vector<128x128xf32>
    %176 = arith.mulf %173, %175 : vector<128x128xf32>
    %cst_98 = arith.constant dense<0.000000e+00> : vector<128xf32>
    %177 = vector.multi_reduction <add>, %176, %cst_98 [0] : vector<128x128xf32> to vector<128xf32>
    %178 = vector.shape_cast %177 : vector<128xf32> to vector<1x128xf32>
    %c0_99 = arith.constant 0 : index
    %179 = memref.load %arg5[%c0_99] : memref<1xf32, #tpu.memory_space<smem>>
    %180 = vector.broadcast %179 : f32 to vector<1x128xf32>
    %181 = arith.addf %178, %180 : vector<1x128xf32>
    %182 = arith.index_cast %c7_i32 : i32 to index
    %c0_100 = arith.constant 0 : index
    %183 = vector.load %arg6[%182, %c0_100] : memref<16x128xf32, #tpu.memory_space<vmem>>, vector<1x128xf32>
    tpu.vector_store %arg6[%182, %c0_100], %181 {strides = array<i32>} : memref<16x128xf32, #tpu.memory_space<vmem>>, vector<1x128xf32>,
    %c8_i32 = arith.constant 8 : i32
    %c128_i32_101 = arith.constant 128 : i32
    %184 = arith.muli %c8_i32, %c128_i32_101 : i32
    %185 = tpu.assume_multiple %184, 128 : i32
    %186 = arith.index_cast %185 : i32 to index
    %c0_102 = arith.constant 0 : index
    %187 = vector.load %arg1[%186, %c0_102] : memref<2048x10xf32, #tpu.memory_space<vmem>>, vector<128x10xf32>
    %188 = arith.truncf %187 : vector<128x10xf32> to vector<128x10xbf16>
    %c0_103 = arith.constant 0 : index
    %c0_104 = arith.constant 0 : index
    %189 = vector.load %arg2[%c0_103, %c0_104] : memref<10x128xbf16, #tpu.memory_space<vmem>>, vector<10x128xbf16>
    %cst_105 = arith.constant dense<0.000000e+00> : vector<128x128xf32>
    %190 = tpu.matmul %188, %189, %cst_105 {dimension_numbers = #tpu.dot_dimension_numbers<[1], [0], [0], [1], [0, 0, 1, 1], [], []>} : vector<128x10xbf16>, vector<10x128xbf16>, vector<128x128xf32> -> vector<128x128xf32>
    %c0_106 = arith.constant 0 : index
    %c0_107 = arith.constant 0 : index
    %191 = vector.load %arg3[%c0_106, %c0_107] : memref<1x128xf32, #tpu.memory_space<vmem>>, vector<1x128xf32>
    %192 = vector.broadcast %191 : vector<1x128xf32> to vector<128x128xf32>
    %193 = arith.addf %190, %192 : vector<128x128xf32>
    %cst_108 = arith.constant 0.000000e+00 : f32
    %194 = vector.broadcast %cst_108 : f32 to vector<128x128xf32>
    %195 = arith.maximumf %193, %194 : vector<128x128xf32>
    %196 = tpu.transpose %195, [1, 0] : vector<128x128xf32> -> vector<128x128xf32>
    %c0_109 = arith.constant 0 : index
    %c0_110 = arith.constant 0 : index
    %197 = vector.load %arg4[%c0_109, %c0_110] : memref<128x1xf32, #tpu.memory_space<vmem>>, vector<128x1xf32>
    %198 = vector.broadcast %197 : vector<128x1xf32> to vector<128x128xf32>
    %199 = arith.mulf %196, %198 : vector<128x128xf32>
    %cst_111 = arith.constant dense<0.000000e+00> : vector<128xf32>
    %200 = vector.multi_reduction <add>, %199, %cst_111 [0] : vector<128x128xf32> to vector<128xf32>
    %201 = vector.shape_cast %200 : vector<128xf32> to vector<1x128xf32>
    %c0_112 = arith.constant 0 : index
    %202 = memref.load %arg5[%c0_112] : memref<1xf32, #tpu.memory_space<smem>>
    %203 = vector.broadcast %202 : f32 to vector<1x128xf32>
    %204 = arith.addf %201, %203 : vector<1x128xf32>
    %205 = arith.index_cast %c8_i32 : i32 to index
    %c0_113 = arith.constant 0 : index
    %206 = vector.load %arg6[%205, %c0_113] : memref<16x128xf32, #tpu.memory_space<vmem>>, vector<1x128xf32>
    tpu.vector_store %arg6[%205, %c0_113], %204 {strides = array<i32>} : memref<16x128xf32, #tpu.memory_space<vmem>>, vector<1x128xf32>,
    %c9_i32 = arith.constant 9 : i32
    %c128_i32_114 = arith.constant 128 : i32
    %207 = arith.muli %c9_i32, %c128_i32_114 : i32
    %208 = tpu.assume_multiple %207, 128 : i32
    %209 = arith.index_cast %208 : i32 to index
    %c0_115 = arith.constant 0 : index
    %210 = vector.load %arg1[%209, %c0_115] : memref<2048x10xf32, #tpu.memory_space<vmem>>, vector<128x10xf32>
    %211 = arith.truncf %210 : vector<128x10xf32> to vector<128x10xbf16>
    %c0_116 = arith.constant 0 : index
    %c0_117 = arith.constant 0 : index
    %212 = vector.load %arg2[%c0_116, %c0_117] : memref<10x128xbf16, #tpu.memory_space<vmem>>, vector<10x128xbf16>
    %cst_118 = arith.constant dense<0.000000e+00> : vector<128x128xf32>
    %213 = tpu.matmul %211, %212, %cst_118 {dimension_numbers = #tpu.dot_dimension_numbers<[1], [0], [0], [1], [0, 0, 1, 1], [], []>} : vector<128x10xbf16>, vector<10x128xbf16>, vector<128x128xf32> -> vector<128x128xf32>
    %c0_119 = arith.constant 0 : index
    %c0_120 = arith.constant 0 : index
    %214 = vector.load %arg3[%c0_119, %c0_120] : memref<1x128xf32, #tpu.memory_space<vmem>>, vector<1x128xf32>
    %215 = vector.broadcast %214 : vector<1x128xf32> to vector<128x128xf32>
    %216 = arith.addf %213, %215 : vector<128x128xf32>
    %cst_121 = arith.constant 0.000000e+00 : f32
    %217 = vector.broadcast %cst_121 : f32 to vector<128x128xf32>
    %218 = arith.maximumf %216, %217 : vector<128x128xf32>
    %219 = tpu.transpose %218, [1, 0] : vector<128x128xf32> -> vector<128x128xf32>
    %c0_122 = arith.constant 0 : index
    %c0_123 = arith.constant 0 : index
    %220 = vector.load %arg4[%c0_122, %c0_123] : memref<128x1xf32, #tpu.memory_space<vmem>>, vector<128x1xf32>
    %221 = vector.broadcast %220 : vector<128x1xf32> to vector<128x128xf32>
    %222 = arith.mulf %219, %221 : vector<128x128xf32>
    %cst_124 = arith.constant dense<0.000000e+00> : vector<128xf32>
    %223 = vector.multi_reduction <add>, %222, %cst_124 [0] : vector<128x128xf32> to vector<128xf32>
    %224 = vector.shape_cast %223 : vector<128xf32> to vector<1x128xf32>
    %c0_125 = arith.constant 0 : index
    %225 = memref.load %arg5[%c0_125] : memref<1xf32, #tpu.memory_space<smem>>
    %226 = vector.broadcast %225 : f32 to vector<1x128xf32>
    %227 = arith.addf %224, %226 : vector<1x128xf32>
    %228 = arith.index_cast %c9_i32 : i32 to index
    %c0_126 = arith.constant 0 : index
    %229 = vector.load %arg6[%228, %c0_126] : memref<16x128xf32, #tpu.memory_space<vmem>>, vector<1x128xf32>
    tpu.vector_store %arg6[%228, %c0_126], %227 {strides = array<i32>} : memref<16x128xf32, #tpu.memory_space<vmem>>, vector<1x128xf32>,
    %c10_i32 = arith.constant 10 : i32
    %c128_i32_127 = arith.constant 128 : i32
    %230 = arith.muli %c10_i32, %c128_i32_127 : i32
    %231 = tpu.assume_multiple %230, 128 : i32
    %232 = arith.index_cast %231 : i32 to index
    %c0_128 = arith.constant 0 : index
    %233 = vector.load %arg1[%232, %c0_128] : memref<2048x10xf32, #tpu.memory_space<vmem>>, vector<128x10xf32>
    %234 = arith.truncf %233 : vector<128x10xf32> to vector<128x10xbf16>
    %c0_129 = arith.constant 0 : index
    %c0_130 = arith.constant 0 : index
    %235 = vector.load %arg2[%c0_129, %c0_130] : memref<10x128xbf16, #tpu.memory_space<vmem>>, vector<10x128xbf16>
    %cst_131 = arith.constant dense<0.000000e+00> : vector<128x128xf32>
    %236 = tpu.matmul %234, %235, %cst_131 {dimension_numbers = #tpu.dot_dimension_numbers<[1], [0], [0], [1], [0, 0, 1, 1], [], []>} : vector<128x10xbf16>, vector<10x128xbf16>, vector<128x128xf32> -> vector<128x128xf32>
    %c0_132 = arith.constant 0 : index
    %c0_133 = arith.constant 0 : index
    %237 = vector.load %arg3[%c0_132, %c0_133] : memref<1x128xf32, #tpu.memory_space<vmem>>, vector<1x128xf32>
    %238 = vector.broadcast %237 : vector<1x128xf32> to vector<128x128xf32>
    %239 = arith.addf %236, %238 : vector<128x128xf32>
    %cst_134 = arith.constant 0.000000e+00 : f32
    %240 = vector.broadcast %cst_134 : f32 to vector<128x128xf32>
    %241 = arith.maximumf %239, %240 : vector<128x128xf32>
    %242 = tpu.transpose %241, [1, 0] : vector<128x128xf32> -> vector<128x128xf32>
    %c0_135 = arith.constant 0 : index
    %c0_136 = arith.constant 0 : index
    %243 = vector.load %arg4[%c0_135, %c0_136] : memref<128x1xf32, #tpu.memory_space<vmem>>, vector<128x1xf32>
    %244 = vector.broadcast %243 : vector<128x1xf32> to vector<128x128xf32>
    %245 = arith.mulf %242, %244 : vector<128x128xf32>
    %cst_137 = arith.constant dense<0.000000e+00> : vector<128xf32>
    %246 = vector.multi_reduction <add>, %245, %cst_137 [0] : vector<128x128xf32> to vector<128xf32>
    %247 = vector.shape_cast %246 : vector<128xf32> to vector<1x128xf32>
    %c0_138 = arith.constant 0 : index
    %248 = memref.load %arg5[%c0_138] : memref<1xf32, #tpu.memory_space<smem>>
    %249 = vector.broadcast %248 : f32 to vector<1x128xf32>
    %250 = arith.addf %247, %249 : vector<1x128xf32>
    %251 = arith.index_cast %c10_i32 : i32 to index
    %c0_139 = arith.constant 0 : index
    %252 = vector.load %arg6[%251, %c0_139] : memref<16x128xf32, #tpu.memory_space<vmem>>, vector<1x128xf32>
    tpu.vector_store %arg6[%251, %c0_139], %250 {strides = array<i32>} : memref<16x128xf32, #tpu.memory_space<vmem>>, vector<1x128xf32>,
    %c11_i32 = arith.constant 11 : i32
    %c128_i32_140 = arith.constant 128 : i32
    %253 = arith.muli %c11_i32, %c128_i32_140 : i32
    %254 = tpu.assume_multiple %253, 128 : i32
    %255 = arith.index_cast %254 : i32 to index
    %c0_141 = arith.constant 0 : index
    %256 = vector.load %arg1[%255, %c0_141] : memref<2048x10xf32, #tpu.memory_space<vmem>>, vector<128x10xf32>
    %257 = arith.truncf %256 : vector<128x10xf32> to vector<128x10xbf16>
    %c0_142 = arith.constant 0 : index
    %c0_143 = arith.constant 0 : index
    %258 = vector.load %arg2[%c0_142, %c0_143] : memref<10x128xbf16, #tpu.memory_space<vmem>>, vector<10x128xbf16>
    %cst_144 = arith.constant dense<0.000000e+00> : vector<128x128xf32>
    %259 = tpu.matmul %257, %258, %cst_144 {dimension_numbers = #tpu.dot_dimension_numbers<[1], [0], [0], [1], [0, 0, 1, 1], [], []>} : vector<128x10xbf16>, vector<10x128xbf16>, vector<128x128xf32> -> vector<128x128xf32>
    %c0_145 = arith.constant 0 : index
    %c0_146 = arith.constant 0 : index
    %260 = vector.load %arg3[%c0_145, %c0_146] : memref<1x128xf32, #tpu.memory_space<vmem>>, vector<1x128xf32>
    %261 = vector.broadcast %260 : vector<1x128xf32> to vector<128x128xf32>
    %262 = arith.addf %259, %261 : vector<128x128xf32>
    %cst_147 = arith.constant 0.000000e+00 : f32
    %263 = vector.broadcast %cst_147 : f32 to vector<128x128xf32>
    %264 = arith.maximumf %262, %263 : vector<128x128xf32>
    %265 = tpu.transpose %264, [1, 0] : vector<128x128xf32> -> vector<128x128xf32>
    %c0_148 = arith.constant 0 : index
    %c0_149 = arith.constant 0 : index
    %266 = vector.load %arg4[%c0_148, %c0_149] : memref<128x1xf32, #tpu.memory_space<vmem>>, vector<128x1xf32>
    %267 = vector.broadcast %266 : vector<128x1xf32> to vector<128x128xf32>
    %268 = arith.mulf %265, %267 : vector<128x128xf32>
    %cst_150 = arith.constant dense<0.000000e+00> : vector<128xf32>
    %269 = vector.multi_reduction <add>, %268, %cst_150 [0] : vector<128x128xf32> to vector<128xf32>
    %270 = vector.shape_cast %269 : vector<128xf32> to vector<1x128xf32>
    %c0_151 = arith.constant 0 : index
    %271 = memref.load %arg5[%c0_151] : memref<1xf32, #tpu.memory_space<smem>>
    %272 = vector.broadcast %271 : f32 to vector<1x128xf32>
    %273 = arith.addf %270, %272 : vector<1x128xf32>
    %274 = arith.index_cast %c11_i32 : i32 to index
    %c0_152 = arith.constant 0 : index
    %275 = vector.load %arg6[%274, %c0_152] : memref<16x128xf32, #tpu.memory_space<vmem>>, vector<1x128xf32>
    tpu.vector_store %arg6[%274, %c0_152], %273 {strides = array<i32>} : memref<16x128xf32, #tpu.memory_space<vmem>>, vector<1x128xf32>,
    %c12_i32 = arith.constant 12 : i32
    %c128_i32_153 = arith.constant 128 : i32
    %276 = arith.muli %c12_i32, %c128_i32_153 : i32
    %277 = tpu.assume_multiple %276, 128 : i32
    %278 = arith.index_cast %277 : i32 to index
    %c0_154 = arith.constant 0 : index
    %279 = vector.load %arg1[%278, %c0_154] : memref<2048x10xf32, #tpu.memory_space<vmem>>, vector<128x10xf32>
    %280 = arith.truncf %279 : vector<128x10xf32> to vector<128x10xbf16>
    %c0_155 = arith.constant 0 : index
    %c0_156 = arith.constant 0 : index
    %281 = vector.load %arg2[%c0_155, %c0_156] : memref<10x128xbf16, #tpu.memory_space<vmem>>, vector<10x128xbf16>
    %cst_157 = arith.constant dense<0.000000e+00> : vector<128x128xf32>
    %282 = tpu.matmul %280, %281, %cst_157 {dimension_numbers = #tpu.dot_dimension_numbers<[1], [0], [0], [1], [0, 0, 1, 1], [], []>} : vector<128x10xbf16>, vector<10x128xbf16>, vector<128x128xf32> -> vector<128x128xf32>
    %c0_158 = arith.constant 0 : index
    %c0_159 = arith.constant 0 : index
    %283 = vector.load %arg3[%c0_158, %c0_159] : memref<1x128xf32, #tpu.memory_space<vmem>>, vector<1x128xf32>
    %284 = vector.broadcast %283 : vector<1x128xf32> to vector<128x128xf32>
    %285 = arith.addf %282, %284 : vector<128x128xf32>
    %cst_160 = arith.constant 0.000000e+00 : f32
    %286 = vector.broadcast %cst_160 : f32 to vector<128x128xf32>
    %287 = arith.maximumf %285, %286 : vector<128x128xf32>
    %288 = tpu.transpose %287, [1, 0] : vector<128x128xf32> -> vector<128x128xf32>
    %c0_161 = arith.constant 0 : index
    %c0_162 = arith.constant 0 : index
    %289 = vector.load %arg4[%c0_161, %c0_162] : memref<128x1xf32, #tpu.memory_space<vmem>>, vector<128x1xf32>
    %290 = vector.broadcast %289 : vector<128x1xf32> to vector<128x128xf32>
    %291 = arith.mulf %288, %290 : vector<128x128xf32>
    %cst_163 = arith.constant dense<0.000000e+00> : vector<128xf32>
    %292 = vector.multi_reduction <add>, %291, %cst_163 [0] : vector<128x128xf32> to vector<128xf32>
    %293 = vector.shape_cast %292 : vector<128xf32> to vector<1x128xf32>
    %c0_164 = arith.constant 0 : index
    %294 = memref.load %arg5[%c0_164] : memref<1xf32, #tpu.memory_space<smem>>
    %295 = vector.broadcast %294 : f32 to vector<1x128xf32>
    %296 = arith.addf %293, %295 : vector<1x128xf32>
    %297 = arith.index_cast %c12_i32 : i32 to index
    %c0_165 = arith.constant 0 : index
    %298 = vector.load %arg6[%297, %c0_165] : memref<16x128xf32, #tpu.memory_space<vmem>>, vector<1x128xf32>
    tpu.vector_store %arg6[%297, %c0_165], %296 {strides = array<i32>} : memref<16x128xf32, #tpu.memory_space<vmem>>, vector<1x128xf32>,
    %c13_i32 = arith.constant 13 : i32
    %c128_i32_166 = arith.constant 128 : i32
    %299 = arith.muli %c13_i32, %c128_i32_166 : i32
    %300 = tpu.assume_multiple %299, 128 : i32
    %301 = arith.index_cast %300 : i32 to index
    %c0_167 = arith.constant 0 : index
    %302 = vector.load %arg1[%301, %c0_167] : memref<2048x10xf32, #tpu.memory_space<vmem>>, vector<128x10xf32>
    %303 = arith.truncf %302 : vector<128x10xf32> to vector<128x10xbf16>
    %c0_168 = arith.constant 0 : index
    %c0_169 = arith.constant 0 : index
    %304 = vector.load %arg2[%c0_168, %c0_169] : memref<10x128xbf16, #tpu.memory_space<vmem>>, vector<10x128xbf16>
    %cst_170 = arith.constant dense<0.000000e+00> : vector<128x128xf32>
    %305 = tpu.matmul %303, %304, %cst_170 {dimension_numbers = #tpu.dot_dimension_numbers<[1], [0], [0], [1], [0, 0, 1, 1], [], []>} : vector<128x10xbf16>, vector<10x128xbf16>, vector<128x128xf32> -> vector<128x128xf32>
    %c0_171 = arith.constant 0 : index
    %c0_172 = arith.constant 0 : index
    %306 = vector.load %arg3[%c0_171, %c0_172] : memref<1x128xf32, #tpu.memory_space<vmem>>, vector<1x128xf32>
    %307 = vector.broadcast %306 : vector<1x128xf32> to vector<128x128xf32>
    %308 = arith.addf %305, %307 : vector<128x128xf32>
    %cst_173 = arith.constant 0.000000e+00 : f32
    %309 = vector.broadcast %cst_173 : f32 to vector<128x128xf32>
    %310 = arith.maximumf %308, %309 : vector<128x128xf32>
    %311 = tpu.transpose %310, [1, 0] : vector<128x128xf32> -> vector<128x128xf32>
    %c0_174 = arith.constant 0 : index
    %c0_175 = arith.constant 0 : index
    %312 = vector.load %arg4[%c0_174, %c0_175] : memref<128x1xf32, #tpu.memory_space<vmem>>, vector<128x1xf32>
    %313 = vector.broadcast %312 : vector<128x1xf32> to vector<128x128xf32>
    %314 = arith.mulf %311, %313 : vector<128x128xf32>
    %cst_176 = arith.constant dense<0.000000e+00> : vector<128xf32>
    %315 = vector.multi_reduction <add>, %314, %cst_176 [0] : vector<128x128xf32> to vector<128xf32>
    %316 = vector.shape_cast %315 : vector<128xf32> to vector<1x128xf32>
    %c0_177 = arith.constant 0 : index
    %317 = memref.load %arg5[%c0_177] : memref<1xf32, #tpu.memory_space<smem>>
    %318 = vector.broadcast %317 : f32 to vector<1x128xf32>
    %319 = arith.addf %316, %318 : vector<1x128xf32>
    %320 = arith.index_cast %c13_i32 : i32 to index
    %c0_178 = arith.constant 0 : index
    %321 = vector.load %arg6[%320, %c0_178] : memref<16x128xf32, #tpu.memory_space<vmem>>, vector<1x128xf32>
    tpu.vector_store %arg6[%320, %c0_178], %319 {strides = array<i32>} : memref<16x128xf32, #tpu.memory_space<vmem>>, vector<1x128xf32>,
    %c14_i32 = arith.constant 14 : i32
    %c128_i32_179 = arith.constant 128 : i32
    %322 = arith.muli %c14_i32, %c128_i32_179 : i32
    %323 = tpu.assume_multiple %322, 128 : i32
    %324 = arith.index_cast %323 : i32 to index
    %c0_180 = arith.constant 0 : index
    %325 = vector.load %arg1[%324, %c0_180] : memref<2048x10xf32, #tpu.memory_space<vmem>>, vector<128x10xf32>
    %326 = arith.truncf %325 : vector<128x10xf32> to vector<128x10xbf16>
    %c0_181 = arith.constant 0 : index
    %c0_182 = arith.constant 0 : index
    %327 = vector.load %arg2[%c0_181, %c0_182] : memref<10x128xbf16, #tpu.memory_space<vmem>>, vector<10x128xbf16>
    %cst_183 = arith.constant dense<0.000000e+00> : vector<128x128xf32>
    %328 = tpu.matmul %326, %327, %cst_183 {dimension_numbers = #tpu.dot_dimension_numbers<[1], [0], [0], [1], [0, 0, 1, 1], [], []>} : vector<128x10xbf16>, vector<10x128xbf16>, vector<128x128xf32> -> vector<128x128xf32>
    %c0_184 = arith.constant 0 : index
    %c0_185 = arith.constant 0 : index
    %329 = vector.load %arg3[%c0_184, %c0_185] : memref<1x128xf32, #tpu.memory_space<vmem>>, vector<1x128xf32>
    %330 = vector.broadcast %329 : vector<1x128xf32> to vector<128x128xf32>
    %331 = arith.addf %328, %330 : vector<128x128xf32>
    %cst_186 = arith.constant 0.000000e+00 : f32
    %332 = vector.broadcast %cst_186 : f32 to vector<128x128xf32>
    %333 = arith.maximumf %331, %332 : vector<128x128xf32>
    %334 = tpu.transpose %333, [1, 0] : vector<128x128xf32> -> vector<128x128xf32>
    %c0_187 = arith.constant 0 : index
    %c0_188 = arith.constant 0 : index
    %335 = vector.load %arg4[%c0_187, %c0_188] : memref<128x1xf32, #tpu.memory_space<vmem>>, vector<128x1xf32>
    %336 = vector.broadcast %335 : vector<128x1xf32> to vector<128x128xf32>
    %337 = arith.mulf %334, %336 : vector<128x128xf32>
    %cst_189 = arith.constant dense<0.000000e+00> : vector<128xf32>
    %338 = vector.multi_reduction <add>, %337, %cst_189 [0] : vector<128x128xf32> to vector<128xf32>
    %339 = vector.shape_cast %338 : vector<128xf32> to vector<1x128xf32>
    %c0_190 = arith.constant 0 : index
    %340 = memref.load %arg5[%c0_190] : memref<1xf32, #tpu.memory_space<smem>>
    %341 = vector.broadcast %340 : f32 to vector<1x128xf32>
    %342 = arith.addf %339, %341 : vector<1x128xf32>
    %343 = arith.index_cast %c14_i32 : i32 to index
    %c0_191 = arith.constant 0 : index
    %344 = vector.load %arg6[%343, %c0_191] : memref<16x128xf32, #tpu.memory_space<vmem>>, vector<1x128xf32>
    tpu.vector_store %arg6[%343, %c0_191], %342 {strides = array<i32>} : memref<16x128xf32, #tpu.memory_space<vmem>>, vector<1x128xf32>,
    %c15_i32 = arith.constant 15 : i32
    %c128_i32_192 = arith.constant 128 : i32
    %345 = arith.muli %c15_i32, %c128_i32_192 : i32
    %346 = tpu.assume_multiple %345, 128 : i32
    %347 = arith.index_cast %346 : i32 to index
    %c0_193 = arith.constant 0 : index
    %348 = vector.load %arg1[%347, %c0_193] : memref<2048x10xf32, #tpu.memory_space<vmem>>, vector<128x10xf32>
    %349 = arith.truncf %348 : vector<128x10xf32> to vector<128x10xbf16>
    %c0_194 = arith.constant 0 : index
    %c0_195 = arith.constant 0 : index
    %350 = vector.load %arg2[%c0_194, %c0_195] : memref<10x128xbf16, #tpu.memory_space<vmem>>, vector<10x128xbf16>
    %cst_196 = arith.constant dense<0.000000e+00> : vector<128x128xf32>
    %351 = tpu.matmul %349, %350, %cst_196 {dimension_numbers = #tpu.dot_dimension_numbers<[1], [0], [0], [1], [0, 0, 1, 1], [], []>} : vector<128x10xbf16>, vector<10x128xbf16>, vector<128x128xf32> -> vector<128x128xf32>
    %c0_197 = arith.constant 0 : index
    %c0_198 = arith.constant 0 : index
    %352 = vector.load %arg3[%c0_197, %c0_198] : memref<1x128xf32, #tpu.memory_space<vmem>>, vector<1x128xf32>
    %353 = vector.broadcast %352 : vector<1x128xf32> to vector<128x128xf32>
    %354 = arith.addf %351, %353 : vector<128x128xf32>
    %cst_199 = arith.constant 0.000000e+00 : f32
    %355 = vector.broadcast %cst_199 : f32 to vector<128x128xf32>
    %356 = arith.maximumf %354, %355 : vector<128x128xf32>
    %357 = tpu.transpose %356, [1, 0] : vector<128x128xf32> -> vector<128x128xf32>
    %c0_200 = arith.constant 0 : index
    %c0_201 = arith.constant 0 : index
    %358 = vector.load %arg4[%c0_200, %c0_201] : memref<128x1xf32, #tpu.memory_space<vmem>>, vector<128x1xf32>
    %359 = vector.broadcast %358 : vector<128x1xf32> to vector<128x128xf32>
    %360 = arith.mulf %357, %359 : vector<128x128xf32>
    %cst_202 = arith.constant dense<0.000000e+00> : vector<128xf32>
    %361 = vector.multi_reduction <add>, %360, %cst_202 [0] : vector<128x128xf32> to vector<128xf32>
    %362 = vector.shape_cast %361 : vector<128xf32> to vector<1x128xf32>
    %c0_203 = arith.constant 0 : index
    %363 = memref.load %arg5[%c0_203] : memref<1xf32, #tpu.memory_space<smem>>
    %364 = vector.broadcast %363 : f32 to vector<1x128xf32>
    %365 = arith.addf %362, %364 : vector<1x128xf32>
    %366 = arith.index_cast %c15_i32 : i32 to index
    %c0_204 = arith.constant 0 : index
    %367 = vector.load %arg6[%366, %c0_204] : memref<16x128xf32, #tpu.memory_space<vmem>>, vector<1x128xf32>
    tpu.vector_store %arg6[%366, %c0_204], %365 {strides = array<i32>} : memref<16x128xf32, #tpu.memory_space<vmem>>, vector<1x128xf32>,
    %c16_i32 = arith.constant 16 : i32
    return
  }
  func.func @transform_0(%arg0: i32) -> (i32, i32) {
    %c0_i32 = arith.constant 0 : i32
    %c0_i32_0 = arith.constant 0 : i32
    return %arg0, %c0_i32 : i32, i32
  }
  func.func @transform_1(%arg0: i32) -> (i32, i32) {
    %c0_i32 = arith.constant 0 : i32
    %c0_i32_0 = arith.constant 0 : i32
    %c0_i32_1 = arith.constant 0 : i32
    return %c0_i32, %c0_i32_0 : i32, i32
  }
  func.func @transform_2(%arg0: i32) -> (i32, i32) {
    %c0_i32 = arith.constant 0 : i32
    %c0_i32_0 = arith.constant 0 : i32
    %c0_i32_1 = arith.constant 0 : i32
    return %c0_i32, %c0_i32_0 : i32, i32
  }
  func.func @transform_3(%arg0: i32) -> (i32, i32) {
    %c0_i32 = arith.constant 0 : i32
    %c0_i32_0 = arith.constant 0 : i32
    %c0_i32_1 = arith.constant 0 : i32
    return %c0_i32, %c0_i32_0 : i32, i32
  }
  func.func @transform_4(%arg0: i32) -> i32 {
    %c0_i32 = arith.constant 0 : i32
    %c0_i32_0 = arith.constant 0 : i32
    return %c0_i32 : i32
  }
  func.func @transform_5(%arg0: i32) -> (i32, i32) {
    %c0_i32 = arith.constant 0 : i32
    %c0_i32_0 = arith.constant 0 : i32
    return %arg0, %c0_i32 : i32, i32
  }
}

</mosaic_0001>

<bundles_post_ra>
// kernel: net_forward.1
= control target key start
LH: loop header
LB: loop body
LE: loop exit
PB: predicated region body
PF: predicated region fallthrough
CT: control target
= control target key end

     0   :  { %s6786_s20 = smov 0   ;;  %s9823_s0 = inlined_call_operand.vmem [shape: f32[4096,10], index: 0, kind: input, shape index: {}]   ;;  %s9824_s1 = inlined_call_operand.vmem [shape: bf16[10,128], index: 1, kind: input, shape index: {}]   ;;  %s9825_s2 = inlined_call_operand.vmem [shape: f32[1,128], index: 2, kind: input, shape index: {}]   ;;  %s9826_s3 = inlined_call_operand.vmem [shape: f32[128,1], index: 3, kind: input, shape index: {}]   ;;  %s9827_s4 = inlined_call_operand.<no memory space> [shape: f32[1], index: 4, kind: input, shape index: {}]   ;;  %s9828_s5 = inlined_call_operand.vmem [shape: f32[32,128], index: 5, kind: output, shape index: {}]  }
   0x1   :  { %10 = sst [smem:[#allocation2]] %s9827_s4 }
   0x2 LB: > { %s5855_s21 = sadd.s32 4294967295, %s6750_s20   ;;  %p5859_p0 = scmp.ge.s32.totalorder %s6750_s20, 1  ;;  %s6750_s20 = sphi %s6786_s20, %s16_s20  }
   0x3   : > { %p189_p1 = scmp.lt.s32.totalorder %s6750_s20, 3 }
   0x5   : > { %p190_p2 = pnand %p5859_p0, %p189_p1 }
   0x7   : > { %193 = sbr.rel (%p190_p2) target bundleno = 1409 (0x581), region = 40 }
   0xe   : > { %v6797_v0 = vld [vmem:[%s9826_s3] sm:$0xff]  ;;  %vm293_vm0 = vcmask 1044480   ;;  %v9829_v1 = vmov 0   ;;  %s5860_s25 = sshll.u32 %s5855_s21, 8  ;;  %v6809_v3 = vld [vmem:[%s9826_s3 + $0x8] sm:$0xff]  ;;  %v6817_v5 = vld [vmem:[%s9826_s3 + $0x10] sm:$0xff] }
   0xf   : > { %6723 = vset.pattern.permute.xlu1 %v9829_v1  ;;  %v6725_v2 = vld [vmem:[%s9824_s1] sm:$0x1f]   ;;  %p218_p3 = scmp.lt.s32.totalorder %s5860_s25, 511  ;;  %vm268_vm1 = vcmask 80896   ;;  %v6840_v17 = vld [vmem:[%s9826_s3 + $0x18] sm:$0xff]  ;;  %v6872_v37 = vld [vmem:[%s9826_s3 + $0x28] sm:$0xff] }
  0x10   : > { %460 = vperm.xlu1 %6723, %v6797_v0   ;;  %6698 = vmatprep.subr.msk.bf16.mxu0 %vm293_vm0, %v6725_v2  ;;  %v295_v4 = vsel %vm293_vm0, %v6725_v2, 0  ;;  %v6726_v6 = vld [vmem:[%s9824_s1] sm:$0x1f]   ;;  %v6882_v41 = vld [vmem:[%s9826_s3 + $0x30] sm:$0xff]  ;;  %v6895_v51 = vld [vmem:[%s9826_s3 + $0x38] sm:$0xff]  ;;  %s5862_s16 = sshll.u32 %s5855_s21, 1 }
  0x11   : > { %6411 = vmatpush3.bf16.msra.mxu0 %v295_v4  ;;  %s10330_s25 = smov (!%p218_p3, %s5860_s25), 511  ;;  %6699 = vmatprep.subr.msk.bf16.mxu1 %vm293_vm0, %v6726_v6  ;;  %v643_v14 = vsel %vm293_vm0, %v6726_v6, 0  ;;  %v6857_v28 = vld [vmem:[%s9826_s3 + $0x20] sm:$0xff]  ;;  %v6922_v6 = vld [vmem:[%s9826_s3 + $0x48] sm:$0xff]  ;;  %p224_p4 = scmp.lt.s32.totalorder %s5862_s16, 3 }
  0x12   : > { %s5861_s30 = sshll.u32 %s10330_s25, 3  ;;  %6429 = vmatpush3.bf16.msra.mxu1 %v643_v14  ;;  %v6727_v34 = vld [vmem:[%s9824_s1] sm:$0x1f]   ;;  %s575_s21 = sld [smem:[#allocation2]] }
  0x13   : > { %s6822_s8 = scalar_lea.vmem %s9823_s0, %s5861_s30  ;;  %6700 = vmatprep.subr.msk.bf16.mxu0 %vm293_vm0, %v6727_v34  ;;  %v991_v40 = vsel %vm293_vm0, %v6727_v34, 0  ;;  %v6912_v61 = vld [vmem:[%s9826_s3 + $0x40] sm:$0xff]  ;;  %s10332_s16 = smov (!%p224_p4, %s5862_s16), 3 }
  0x14   : > { %465 = vperm.xlu1 %6723, %v6809_v3   ;;  %v230_v7 = vld [vmem:[%s6822_s8] sm:$0xff]  ;;  %v231_v8 = vld [vmem:[%s6822_s8 + $0x8] sm:$0xff]  ;;  %v232_v9 = vld [vmem:[%s6822_s8 + $0x10] sm:$0xff]  ;;  %s5863_s19 = sshll.u32 %s10332_s16, 3  ;;  %s1619_s17 = sld [smem:[#allocation2]] }
  0x15   : > { %v246_v10 = vpack.c.bf16 %v231_v8, %v230_v7  ;;  %v233_v11 = vld [vmem:[%s6822_s8 + $0x18] sm:$0xff]  ;;  %v234_v12 = vld [vmem:[%s6822_s8 + $0x20] sm:$0xff]  ;;  %v235_v13 = vld [vmem:[%s6822_s8 + $0x28] sm:$0xff]  ;;  %s7778_s4 = scalar_lea.vmem %s9828_s5, %s5863_s19  ;;  %s2663_s14 = sld [smem:[#allocation2]] }
  0x16   : > { %v247_v15 = vpack.c.bf16 %v233_v11, %v232_v9  ;;  %v248_v16 = vpack.c.bf16 %v235_v13, %v234_v12  ;;  %v236_v18 = vld [vmem:[%s6822_s8 + $0x30] sm:$0xff]  ;;  %v237_v19 = vld [vmem:[%s6822_s8 + $0x38] sm:$0xff]  ;;  %v238_v20 = vld [vmem:[%s6822_s8 + $0x40] sm:$0xff]  ;;  %s3707_s29 = sld [smem:[#allocation2]] }
  0x17   : > { %6412 = vmatprep.mubr.msk.bf16.mxu0 %vm268_vm1, %v246_v10  ;;  %v239_v21 = vld [vmem:[%s6822_s8 + $0x48] sm:$0xff]  ;;  %v5874_v22 = vld [vmem:[%s6822_s8 + $0x80] sm:$0xff]  ;;  %v5876_v25 = vld [vmem:[%s6822_s8 + $0x90] sm:$0xff]  ;;  %v249_v31 = vpack.c.bf16 %v237_v19, %v236_v18  ;;  %s5099_s7 = sld [smem:[#allocation2]] }
  0x18   : > { %470 = vperm.xlu1 %6723, %v6817_v5   ;;  %6413 = vmatmul.mubr.msk.bf16.vlgmr.msra.gmra.mrb[0].mxu0 %vm268_vm1, %v247_v15  ;;  %v5875_v23 = vld [vmem:[%s6822_s8 + $0x88] sm:$0xff]  ;;  %v5877_v26 = vld [vmem:[%s6822_s8 + $0x98] sm:$0xff]  ;;  %v5878_v27 = vld [vmem:[%s6822_s8 + $0xa0] sm:$0xff]  ;;  %v250_v33 = vpack.c.bf16 %v239_v21, %v238_v20 }
  0x19   : > { %6416 = vmatprep.mubr.msk.bf16.mxu0 %vm268_vm1, %v248_v16  ;;  %v596_v24 = vpack.c.bf16 %v5875_v23, %v5874_v22  ;;  %v597_v29 = vpack.c.bf16 %v5877_v26, %v5876_v25  ;;  %v5879_v30 = vld [vmem:[%s6822_s8 + $0xa8] sm:$0xff]  ;;  %v5880_v35 = vld [vmem:[%s6822_s8 + $0xb0] sm:$0xff]  ;;  %v5881_v36 = vld [vmem:[%s6822_s8 + $0xb8] sm:$0xff]  ;;  %6447 = vmatpush3.bf16.msra.mxu0 %v991_v40 }
  0x1a   : > { %v598_v32 = vpack.c.bf16 %v5879_v30, %v5878_v27  ;;  %v5882_v38 = vld [vmem:[%s6822_s8 + $0xc0] sm:$0xff]  ;;  %v5883_v39 = vld [vmem:[%s6822_s8 + $0xc8] sm:$0xff]  ;;  %v240_v42 = vld [vmem:[%s6822_s8 + $0x50] sm:$0xff]  ;;  %v599_v44 = vpack.c.bf16 %v5881_v36, %v5880_v35 }
  0x1b   : > { %6430 = vmatprep.mubr.msk.bf16.mxu1 %vm268_vm1, %v596_v24  ;;  %v241_v43 = vld [vmem:[%s6822_s8 + $0x58] sm:$0xff]  ;;  %v242_v45 = vld [vmem:[%s6822_s8 + $0x60] sm:$0xff]  ;;  %v243_v46 = vld [vmem:[%s6822_s8 + $0x68] sm:$0xff]  ;;  %v600_v47 = vpack.c.bf16 %v5883_v39, %v5882_v38 }
  0x1c   : > { %475 = vperm.xlu1 %6723, %v6840_v17   ;;  %6431 = vmatmul.mubr.msk.bf16.vlgmr.msra.gmra.mrb[0].mxu1 %vm268_vm1, %v597_v29  ;;  %v251_v48 = vpack.c.bf16 %v241_v43, %v240_v42  ;;  %v5884_v49 = vld [vmem:[%s6822_s8 + $0xd0] sm:$0xff]  ;;  %v5885_v50 = vld [vmem:[%s6822_s8 + $0xd8] sm:$0xff]  ;;  %v252_v52 = vpack.c.bf16 %v243_v46, %v242_v45  ;;  %v5886_v53 = vld [vmem:[%s6822_s8 + $0xe0] sm:$0xff] }
  0x1d   : > { %6434 = vmatprep.mubr.msk.bf16.mxu1 %vm268_vm1, %v598_v32  ;;  %v5887_v54 = vld [vmem:[%s6822_s8 + $0xe8] sm:$0xff]  ;;  %v244_v55 = vld [vmem:[%s6822_s8 + $0x70] sm:$0xff]  ;;  %v245_v56 = vld [vmem:[%s6822_s8 + $0x78] sm:$0xff]  ;;  %v601_v57 = vpack.c.bf16 %v5885_v50, %v5884_v49 }
  0x1e   : > { %v602_v58 = vpack.c.bf16 %v5887_v54, %v5886_v53  ;;  %v5900_v59 = vld [vmem:[%s6822_s8 + $0x100] sm:$0xff]  ;;  %v5901_v60 = vld [vmem:[%s6822_s8 + $0x108] sm:$0xff]  ;;  %v253_v62 = vpack.c.bf16 %v245_v56, %v244_v55  ;;  %v5888_v2 = vld [vmem:[%s6822_s8 + $0xf0] sm:$0xff] }
  0x1f   : > { %v944_v63 = vpack.c.bf16 %v5901_v60, %v5900_v59  ;;  %v5889_v4 = vld [vmem:[%s6822_s8 + $0xf8] sm:$0xff]  ;;  %v5902_v8 = vld [vmem:[%s6822_s8 + $0x110] sm:$0xff]  ;;  %v5904_v10 = vld [vmem:[%s6822_s8 + $0x120] sm:$0xff] }
  0x20   : > { %480 = vperm.xlu1 %6723, %v6857_v28   ;;  %6417 = vmatmul.mubr.msk.bf16.gmra.mrb[4].mxu0 %vm268_vm1, %v249_v31  ;;  %v603_v7 = vpack.c.bf16 %v5889_v4, %v5888_v2  ;;  %v5903_v9 = vld [vmem:[%s6822_s8 + $0x118] sm:$0xff]  ;;  %v5905_v11 = vld [vmem:[%s6822_s8 + $0x128] sm:$0xff]  ;;  %v6934_v12 = vld [vmem:[%s9826_s3 + $0x50] sm:$0xff] }
  0x21   : > { %6420 = vmatprep.mubr.msk.bf16.mxu0 %vm268_vm1, %v250_v33  ;;  %v945_v13 = vpack.c.bf16 %v5903_v9, %v5902_v8  ;;  %v946_v14 = vpack.c.bf16 %v5905_v11, %v5904_v10  ;;  %v6728_v15 = vld [vmem:[%s9824_s1] sm:$0x1f]   ;;  %v6944_v16 = vld [vmem:[%s9826_s3 + $0x58] sm:$0xff]  ;;  %v5906_v19 = vld [vmem:[%s6822_s8 + $0x130] sm:$0xff] }
  0x22   : > { %6701 = vmatprep.subr.msk.bf16.mxu1 %vm293_vm0, %v6728_v15  ;;  %v1339_v18 = vsel %vm293_vm0, %v6728_v15, 0  ;;  %v5907_v20 = vld [vmem:[%s6822_s8 + $0x138] sm:$0xff]  ;;  %v5908_v21 = vld [vmem:[%s6822_s8 + $0x140] sm:$0xff]  ;;  %v5909_v22 = vld [vmem:[%s6822_s8 + $0x148] sm:$0xff] }
  0x23   : > { %6465 = vmatpush3.bf16.msra.mxu1 %v1339_v18  ;;  %v6958_v23 = vld [vmem:[%s9826_s3 + $0x60] sm:$0xff]  ;;  %v947_v24 = vpack.c.bf16 %v5907_v20, %v5906_v19  ;;  %v948_v25 = vpack.c.bf16 %v5909_v22, %v5908_v21  ;;  %v6964_v26 = vld [vmem:[%s9826_s3 + $0x68] sm:$0xff]  ;;  %v5910_v27 = vld [vmem:[%s6822_s8 + $0x150] sm:$0xff] }
  0x24   : > { %485 = vperm.xlu1 %6723, %v6872_v37   ;;  %6435 = vmatmul.mubr.msk.bf16.gmra.mrb[4].mxu1 %vm268_vm1, %v599_v44  ;;  %v5911_v29 = vld [vmem:[%s6822_s8 + $0x158] sm:$0xff]  ;;  %v5912_v30 = vld [vmem:[%s6822_s8 + $0x160] sm:$0xff]  ;;  %v5913_v31 = vld [vmem:[%s6822_s8 + $0x168] sm:$0xff] }
  0x25   : > { %6438 = vmatprep.mubr.msk.bf16.mxu1 %vm268_vm1, %v600_v47  ;;  %v6976_v32 = vld [vmem:[%s9826_s3 + $0x70] sm:$0xff]  ;;  %v949_v33 = vpack.c.bf16 %v5911_v29, %v5910_v27  ;;  %v950_v34 = vpack.c.bf16 %v5913_v31, %v5912_v30  ;;  %v6982_v35 = vld [vmem:[%s9826_s3 + $0x78] sm:$0xff]  ;;  %v5926_v40 = vld [vmem:[%s6822_s8 + $0x180] sm:$0xff] }
  0x26   : > { %v5914_v36 = vld [vmem:[%s6822_s8 + $0x170] sm:$0xff]  ;;  %v5915_v38 = vld [vmem:[%s6822_s8 + $0x178] sm:$0xff]  ;;  %v5927_v42 = vld [vmem:[%s6822_s8 + $0x188] sm:$0xff] }
  0x27   : > { %v951_v39 = vpack.c.bf16 %v5915_v38, %v5914_v36  ;;  %v1292_v43 = vpack.c.bf16 %v5927_v42, %v5926_v40  ;;  %v5928_v44 = vld [vmem:[%s6822_s8 + $0x190] sm:$0xff]  ;;  %v5929_v45 = vld [vmem:[%s6822_s8 + $0x198] sm:$0xff]  ;;  %v5930_v47 = vld [vmem:[%s6822_s8 + $0x1a0] sm:$0xff] }
  0x28   : > { %490 = vperm.xlu1 %6723, %v6882_v41   ;;  %6421 = vmatmul.mubr.msk.bf16.gmra.mrb[8].mxu0 %vm268_vm1, %v251_v48  ;;  %v1293_v46 = vpack.c.bf16 %v5929_v45, %v5928_v44  ;;  %v5931_v48 = vld [vmem:[%s6822_s8 + $0x1a8] sm:$0xff]  ;;  %v5932_v50 = vld [vmem:[%s6822_s8 + $0x1b0] sm:$0xff]  ;;  %v5934_v54 = vld [vmem:[%s6822_s8 + $0x1c0] sm:$0xff] }
  0x29   : > { %6424 = vmatprep.mubr.msk.bf16.mxu0 %vm268_vm1, %v252_v52  ;;  %v1294_v49 = vpack.c.bf16 %v5931_v48, %v5930_v47  ;;  %v5933_v52 = vld [vmem:[%s6822_s8 + $0x1b8] sm:$0xff]  ;;  %v5935_v55 = vld [vmem:[%s6822_s8 + $0x1c8] sm:$0xff]  ;;  %v6729_v60 = vld [vmem:[%s9824_s1] sm:$0x1f]  }
  0x2a   : > { %v1295_v53 = vpack.c.bf16 %v5933_v52, %v5932_v50  ;;  %v1296_v56 = vpack.c.bf16 %v5935_v55, %v5934_v54  ;;  %6702 = vmatprep.subr.msk.bf16.mxu0 %vm293_vm0, %v6729_v60  ;;  %v5939_v2 = vld [vmem:[%s6822_s8 + $0x1e8] sm:$0xff]  ;;  %v5941_v8 = vld [vmem:[%s6822_s8 + $0x1f8] sm:$0xff]  ;;  %v5954_v18 = vld [vmem:[%s6822_s8 + $0x210] sm:$0xff] }
  0x2b   : > { %v5955_v19 = vld [vmem:[%s6822_s8 + $0x218] sm:$0xff]  ;;  %v5956_v27 = vld [vmem:[%s6822_s8 + $0x220] sm:$0xff]  ;;  %v5957_v29 = vld [vmem:[%s6822_s8 + $0x228] sm:$0xff] }
  0x2c   : > { %495 = vperm.xlu1 %6723, %v6895_v51   ;;  %6439 = vmatmul.mubr.msk.bf16.gmra.mrb[8].mxu1 %vm268_vm1, %v601_v57  ;;  %v5936_v57 = vld [vmem:[%s6822_s8 + $0x1d0] sm:$0xff]  ;;  %v1641_v20 = vpack.c.bf16 %v5955_v19, %v5954_v18  ;;  %v1642_v30 = vpack.c.bf16 %v5957_v29, %v5956_v27  ;;  %v5960_v42 = vld [vmem:[%s6822_s8 + $0x240] sm:$0xff] }
  0x2d   : > { %6442 = vmatprep.mubr.msk.bf16.mxu1 %vm268_vm1, %v602_v58  ;;  %v5937_v58 = vld [vmem:[%s6822_s8 + $0x1d8] sm:$0xff]  ;;  %v5958_v31 = vld [vmem:[%s6822_s8 + $0x230] sm:$0xff]  ;;  %v5964_v55 = vld [vmem:[%s6822_s8 + $0x260] sm:$0xff] }
  0x2e   : > { %v1297_v59 = vpack.c.bf16 %v5937_v58, %v5936_v57  ;;  %v5962_v45 = vld [vmem:[%s6822_s8 + $0x250] sm:$0xff]  ;;  %v5982_v29 = vld [vmem:[%s6822_s8 + $0x2a0] sm:$0xff] }
  0x2f   : > { %v5966_v58 = vld [vmem:[%s6822_s8 + $0x270] sm:$0xff] }
  0x30   : > { %500 = vperm.xlu1 %6723, %v6912_v61   ;;  %6425 = vmatmul.mubr.msk.bf16.gmra.mrb[12].mxu0 %vm268_vm1, %v253_v62  ;;  %v1687_v62 = vsel %vm293_vm0, %v6729_v60, 0 }
  0x31   : > { %6448 = vmatprep.mubr.msk.bf16.mxu0 %vm268_vm1, %v944_v63  ;;  %v5938_v63 = vld [vmem:[%s6822_s8 + $0x1e0] sm:$0xff] }
  0x32   : > { %v1298_v4 = vpack.c.bf16 %v5939_v2, %v5938_v63 }
  0x34   : > { %505 = vperm.xlu1 %6723, %v6922_v6   ;;  %6443 = vmatmul.mubr.msk.bf16.gmra.mrb[12].mxu1 %vm268_vm1, %v603_v7  ;;  %v5940_v7 = vld [vmem:[%s6822_s8 + $0x1f0] sm:$0xff] }
  0x35   : > { %6466 = vmatprep.mubr.msk.bf16.mxu1 %vm268_vm1, %v1292_v43  ;;  %v1299_v9 = vpack.c.bf16 %v5941_v8, %v5940_v7  ;;  %v5961_v43 = vld [vmem:[%s6822_s8 + $0x248] sm:$0xff]  ;;  %v5978_v7 = vld [vmem:[%s6822_s8 + $0x280] sm:$0xff] }
  0x36   : > { %v1644_v44 = vpack.c.bf16 %v5961_v43, %v5960_v42  ;;  %v5979_v8 = vld [vmem:[%s6822_s8 + $0x288] sm:$0xff] }
  0x38   : > { %510 = vperm.xlu1 %6723, %v6934_v12   ;;  %6449 = vmatmul.mubr.msk.bf16.vlgmr.msra.gmra.mrb[16].mxu0 %vm268_vm1, %v945_v13  ;;  %v5952_v13 = vld [vmem:[%s6822_s8 + $0x200] sm:$0xff] }
  0x39   : > { %6452 = vmatprep.mubr.msk.bf16.mxu0 %vm268_vm1, %v946_v14  ;;  %6483 = vmatpush3.bf16.msra.mxu0 %v1687_v62  ;;  %v5953_v14 = vld [vmem:[%s6822_s8 + $0x208] sm:$0xff] }
  0x3a   : > { %v1640_v15 = vpack.c.bf16 %v5953_v14, %v5952_v13  ;;  %v5980_v13 = vld [vmem:[%s6822_s8 + $0x290] sm:$0xff]  ;;  %v5981_v14 = vld [vmem:[%s6822_s8 + $0x298] sm:$0xff] }
  0x3c   : > { %515 = vperm.xlu1 %6723, %v6944_v16   ;;  %6467 = vmatmul.mubr.msk.bf16.vlgmr.msra.gmra.mrb[16].mxu1 %vm268_vm1, %v1293_v46  ;;  %v5963_v46 = vld [vmem:[%s6822_s8 + $0x258] sm:$0xff] }
  0x3d   : > { %6470 = vmatprep.mubr.msk.bf16.mxu1 %vm268_vm1, %v1294_v49  ;;  %v1645_v47 = vpack.c.bf16 %v5963_v46, %v5962_v45  ;;  %v6730_v49 = vld [vmem:[%s9824_s1] sm:$0x1f]  }
  0x3e   : > { %6703 = vmatprep.subr.msk.bf16.mxu1 %vm293_vm0, %v6730_v49  ;;  %v2035_v50 = vsel %vm293_vm0, %v6730_v49, 0  ;;  %v7151_v45 = vld [vmem:[%s9825_s2] ss:$0 sm:$0xff] }
  0x3f   : > { %6501 = vmatpush3.bf16.msra.mxu1 %v2035_v50 }
  0x40   : > { %520 = vperm.xlu1 %6723, %v6958_v23   ;;  %6453 = vmatmul.mubr.msk.bf16.gmra.mrb[20].mxu0 %vm268_vm1, %v947_v24 }
  0x41   : > { %6456 = vmatprep.mubr.msk.bf16.mxu0 %vm268_vm1, %v948_v25 }
  0x44   : > { %525 = vperm.xlu1 %6723, %v6964_v26   ;;  %6471 = vmatmul.mubr.msk.bf16.gmra.mrb[20].mxu1 %vm268_vm1, %v1295_v53 }
  0x45   : > { %6474 = vmatprep.mubr.msk.bf16.mxu1 %vm268_vm1, %v1296_v56  ;;  %v5965_v56 = vld [vmem:[%s6822_s8 + $0x268] sm:$0xff] }
  0x46   : > { %v1646_v57 = vpack.c.bf16 %v5965_v56, %v5964_v55 }
  0x48   : > { %530 = vperm.xlu1 %6723, %v6976_v32   ;;  %6457 = vmatmul.mubr.msk.bf16.gmra.mrb[24].mxu0 %vm268_vm1, %v949_v33  ;;  %v5959_v33 = vld [vmem:[%s6822_s8 + $0x238] sm:$0xff] }
  0x49   : > { %6460 = vmatprep.mubr.msk.bf16.mxu0 %vm268_vm1, %v950_v34  ;;  %v1643_v34 = vpack.c.bf16 %v5959_v33, %v5958_v31  ;;  %v5984_v33 = vld [vmem:[%s6822_s8 + $0x2b0] sm:$0xff] }
  0x4c   : > { %535 = vperm.xlu1 %6723, %v6982_v35   ;;  %6475 = vmatmul.mubr.msk.bf16.gmra.mrb[24].mxu1 %vm268_vm1, %v1297_v59  ;;  %v5967_v59 = vld [vmem:[%s6822_s8 + $0x278] sm:$0xff] }
  0x4d   : > { %6478 = vmatprep.mubr.msk.bf16.mxu1 %vm268_vm1, %v1298_v4  ;;  %v1647_v60 = vpack.c.bf16 %v5967_v59, %v5966_v58 }
  0x50   : > { %808 = vperm.xlu1 %6723, %v6797_v0   ;;  %6461 = vmatmul.mubr.msk.bf16.gmra.mrb[28].mxu0 %vm268_vm1, %v951_v39 }
  0x51   : > { %6484 = vmatprep.mubr.msk.bf16.mxu0 %vm268_vm1, %v1640_v15  ;;  %v1989_v15 = vpack.c.bf16 %v5981_v14, %v5980_v13 }
  0x54   : > { %813 = vperm.xlu1 %6723, %v6809_v3   ;;  %6479 = vmatmul.mubr.msk.bf16.gmra.mrb[28].mxu1 %vm268_vm1, %v1299_v9  ;;  %v1988_v9 = vpack.c.bf16 %v5979_v8, %v5978_v7  ;;  %v5986_v8 = vld [vmem:[%s6822_s8 + $0x2c0] sm:$0xff] }
  0x56   : > { %6502 = vmatprep.mubr.msk.bf16.mxu1 %vm268_vm1, %v1988_v9  ;;  %v5987_v9 = vld [vmem:[%s6822_s8 + $0x2c8] sm:$0xff] }
  0x57   : > { %v1992_v14 = vpack.c.bf16 %v5987_v9, %v5986_v8  ;;  %v6731_v9 = vld [vmem:[%s9824_s1] sm:$0x1f]  }
  0x58   : > { %818 = vperm.xlu1 %6723, %v6817_v5   ;;  %6485 = vmatmul.mubr.msk.bf16.vlgmr.msra.gmra.mrb[32].mxu0 %vm268_vm1, %v1641_v20 }
  0x59   : > { %6488 = vmatprep.mubr.msk.bf16.mxu0 %vm268_vm1, %v1642_v30  ;;  %v5983_v30 = vld [vmem:[%s6822_s8 + $0x2a8] sm:$0xff]  ;;  %6704 = vmatprep.subr.msk.bf16.mxu0 %vm293_vm0, %v6731_v9 }
  0x5a   : > { %v1990_v31 = vpack.c.bf16 %v5983_v30, %v5982_v29  ;;  %v5989_v29 = vld [vmem:[%s6822_s8 + $0x2d8] sm:$0xff] }
  0x5c   : > { %823 = vperm.xlu1 %6723, %v6840_v17   ;;  %6503 = vmatmul.mubr.msk.bf16.vlgmr.msra.gmra.mrb[32].mxu1 %vm268_vm1, %v1989_v15  ;;  %v5988_v15 = vld [vmem:[%s6822_s8 + $0x2d0] sm:$0xff] }
  0x5d   : > { %6506 = vmatprep.mubr.msk.bf16.mxu1 %vm268_vm1, %v1990_v31 }
  0x60   : > { %828 = vperm.xlu1 %6723, %v6857_v28   ;;  %6489 = vmatmul.mubr.msk.bf16.gmra.mrb[36].mxu0 %vm268_vm1, %v1643_v34  ;;  %v5985_v34 = vld [vmem:[%s6822_s8 + $0x2b8] sm:$0xff] }
  0x61   : > { %6492 = vmatprep.mubr.msk.bf16.mxu0 %vm268_vm1, %v1644_v44  ;;  %v1991_v42 = vpack.c.bf16 %v5985_v34, %v5984_v33 }
  0x64   : > { %833 = vperm.xlu1 %6723, %v6872_v37   ;;  %6507 = vmatmul.mubr.msk.bf16.gmra.mrb[36].mxu1 %vm268_vm1, %v1991_v42  ;;  %v1993_v42 = vpack.c.bf16 %v5989_v29, %v5988_v15 }
  0x65   : > { %6510 = vmatprep.mubr.msk.bf16.mxu1 %vm268_vm1, %v1992_v14 }
  0x68   : > { %838 = vperm.xlu1 %6723, %v6882_v41   ;;  %6493 = vmatmul.mubr.msk.bf16.gmra.mrb[40].mxu0 %vm268_vm1, %v1645_v47 }
  0x69   : > { %6496 = vmatprep.mubr.msk.bf16.mxu0 %vm268_vm1, %v1646_v57 }
  0x6c   : > { %843 = vperm.xlu1 %6723, %v6895_v51   ;;  %6511 = vmatmul.mubr.msk.bf16.gmra.mrb[40].mxu1 %vm268_vm1, %v1993_v42 }
  0x70   : > { %848 = vperm.xlu1 %6723, %v6912_v61   ;;  %6497 = vmatmul.mubr.msk.bf16.gmra.mrb[44].mxu0 %vm268_vm1, %v1647_v60 }
  0x74   : > { %853 = vperm.xlu1 %6723, %v6922_v6  }
  0x78   : > { %858 = vperm.xlu1 %6723, %v6934_v12  }
  0x7c   : > { %863 = vperm.xlu1 %6723, %v6944_v16  }
  0x80   : > { %868 = vperm.xlu1 %6723, %v6958_v23  }
  0x84   : > { %873 = vperm.xlu1 %6723, %v6964_v26  }
  0x88   : > { %878 = vperm.xlu1 %6723, %v6976_v32  }
  0x8c   : > { %883 = vperm.xlu1 %6723, %v6982_v35  }
  0x8f   : > { %v7035_v10 = vpop.permute.xlu1 %460 }
  0x90   : > { %1156 = vperm.xlu1 %6723, %v6797_v0  }
  0x93   : > { %v7038_v11 = vpop.permute.xlu1 %465 }
  0x94   : > { %1161 = vperm.xlu1 %6723, %v6809_v3  }
  0x97   : > { %v7046_v21 = vpop.permute.xlu1 %470 }
  0x98   : > { %1166 = vperm.xlu1 %6723, %v6817_v5  }
  0x9b   : > { %v7050_v22 = vpop.permute.xlu1 %475 }
  0x9c   : > { %1171 = vperm.xlu1 %6723, %v6840_v17  }
  0x9f   : > { %v7053_v24 = vpop.permute.xlu1 %480 }
  0xa0   : > { %1176 = vperm.xlu1 %6723, %v6857_v28  }
  0xa3   : > { %v7056_v25 = vpop.permute.xlu1 %485 }
  0xa4   : > { %1181 = vperm.xlu1 %6723, %v6872_v37  }
  0xa7   : > { %v7064_v36 = vpop.permute.xlu1 %490 }
  0xa8   : > { %1186 = vperm.xlu1 %6723, %v6882_v41  }
  0xab   : > { %v7068_v38 = vpop.permute.xlu1 %495 }
  0xac   : > { %1191 = vperm.xlu1 %6723, %v6895_v51  }
  0xaf   : > { %v7071_v39 = vpop.permute.xlu1 %500 }
  0xb0   : > { %9830 = vst [vmem:[#allocation3_spill] sm:$0xff] %v7071_v39  ;;  %1196 = vperm.xlu1 %6723, %v6912_v61  }
  0xb3   : > { %v7074_v40 = vpop.permute.xlu1 %505 }
  0xb4   : > { %9831 = vst [vmem:[#allocation4_spill] sm:$0xff] %v7074_v40  ;;  %1201 = vperm.xlu1 %6723, %v6922_v6  }
  0xb7   : > { %v7082_v48 = vpop.permute.xlu1 %510 }
  0xb8   : > { %9832 = vst [vmem:[#allocation5_spill] sm:$0xff] %v7082_v48  ;;  %1206 = vperm.xlu1 %6723, %v6934_v12  }
  0xbb   : > { %v7091_v52 = vpop.permute.xlu1 %515 }
  0xbc   : > { %9833 = vst [vmem:[#allocation6_spill] sm:$0xff] %v7091_v52  ;;  %1211 = vperm.xlu1 %6723, %v6944_v16  }
  0xbf   : > { %v7094_v53 = vpop.permute.xlu1 %520 }
  0xc0   : > { %9834 = vst [vmem:[#allocation7_spill] sm:$0xff] %v7094_v53  ;;  %1216 = vperm.xlu1 %6723, %v6958_v23   ;;  %v6005_v53 = vld [vmem:[%s6822_s8 + $0x308] sm:$0xff] }
  0xc3   : > { %v7097_v54 = vpop.permute.xlu1 %525 }
  0xc4   : > { %9835 = vst [vmem:[#allocation8_spill] sm:$0xff] %v7097_v54  ;;  %1221 = vperm.xlu1 %6723, %v6964_v26   ;;  %v6004_v54 = vld [vmem:[%s6822_s8 + $0x300] sm:$0xff] }
  0xc5   : > { %v2336_v52 = vpack.c.bf16 %v6005_v53, %v6004_v54 }
  0xc7   : > { %v7105_v62 = vpop.permute.xlu1 %530  ;;  %6520 = vmatprep.mubr.msk.bf16.mxu0 %vm268_vm1, %v2336_v52 }
  0xc8   : > { %9836 = vst [vmem:[#allocation9_spill] sm:$0xff] %v7105_v62  ;;  %1226 = vperm.xlu1 %6723, %v6976_v32  }
  0xcb   : > { %v7109_v63 = vpop.permute.xlu1 %535 }
  0xcc   : > { %9837 = vst [vmem:[#allocation10_spill] sm:$0xff] %v7109_v63  ;;  %1231 = vperm.xlu1 %6723, %v6982_v35  }
  0xcf   : > { %v7112_v2 = vpop.permute.xlu1 %808 }
  0xd0   : > { %9838 = vst [vmem:[#allocation11_spill] sm:$0xff] %v7112_v2  ;;  %1504 = vperm.xlu1 %6723, %v6797_v0  }
  0xd3   : > { %v7115_v4 = vpop.permute.xlu1 %813 }
  0xd4   : > { %9839 = vst [vmem:[#allocation12_spill] sm:$0xff] %v7115_v4  ;;  %1509 = vperm.xlu1 %6723, %v6809_v3  }
  0xd7   : > { %v7123_v18 = vpop.permute.xlu1 %818 }
  0xd8   : > { %9840 = vst [vmem:[#allocation13_spill] sm:$0xff] %v7123_v18  ;;  %1514 = vperm.xlu1 %6723, %v6817_v5  }
  0xdb   : > { %v7127_v19 = vpop.permute.xlu1 %823 }
  0xdc   : > { %9841 = vst [vmem:[#allocation14_spill] sm:$0xff] %v7127_v19  ;;  %1519 = vperm.xlu1 %6723, %v6840_v17  }
  0xdf   : > { %v7130_v20 = vpop.permute.xlu1 %828 }
  0xe0   : > { %9842 = vst [vmem:[#allocation15_spill] sm:$0xff] %v7130_v20  ;;  %1524 = vperm.xlu1 %6723, %v6857_v28  }
  0xe3   : > { %v7133_v27 = vpop.permute.xlu1 %833 }
  0xe4   : > { %9843 = vst [vmem:[#allocation16_spill] sm:$0xff] %v7133_v27  ;;  %1529 = vperm.xlu1 %6723, %v6872_v37   ;;  %v5993_v27 = vld [vmem:[%s6822_s8 + $0x2f8] sm:$0xff] }
  0xe7   : > { %v7141_v43 = vpop.permute.xlu1 %838 }
  0xe8   : > { %9844 = vst [vmem:[#allocation17_spill] sm:$0xff] %v7141_v43  ;;  %1534 = vperm.xlu1 %6723, %v6882_v41   ;;  %v5992_v43 = vld [vmem:[%s6822_s8 + $0x2f0] sm:$0xff] }
  0xeb   : > { %v7145_v44 = vpop.permute.xlu1 %843  ;;  %v6414_v46 = vpop.f32.mrb[0].mxu0 }
  0xec   : > { %9845 = vst [vmem:[#allocation18_spill] sm:$0xff] %v7145_v44  ;;  %1539 = vperm.xlu1 %6723, %v6895_v51   ;;  %v331_v47 = vpop.f32.mrb[1].mxu0  ;;  %v340_v30 = vadd.f32 %v6414_v46, %v7151_v45  ;;  %v5991_v44 = vld [vmem:[%s6822_s8 + $0x2e8] sm:$0xff] }
  0xed   : > { %v6415_v49 = vpop.f32.mrb[2].mxu0  ;;  %v332_v55 = vadd.f32 %v7151_v45, %v331_v47 }
  0xee   : > { %v334_v56 = vpop.f32.mrb[3].mxu0  ;;  %v396_v8 = vmax.f32 %v340_v30, 0.0  ;;  %v343_v46 = vadd.f32 %v6415_v49, %v7151_v45  ;;  %v2383_v49 = vsel %vm293_vm0, %v6731_v9, 0 }
  0xef   : > { %v7153_v50 = vpop.permute.xlu1 %848  ;;  %v335_v57 = vadd.f32 %v7151_v45, %v334_v56  ;;  %v394_v58 = vmax.f32 %v332_v55, 0.0  ;;  %v7158_v59 = vpop.f32.mrb[0].mxu1  ;;  %6519 = vmatpush3.bf16.msra.mxu0 %v2383_v49 }
  0xf0   : > { %9846 = vst [vmem:[#allocation19_spill] sm:$0xff] %v7153_v50  ;;  %1544 = vperm.xlu1 %6723, %v6912_v61   ;;  %v7162_v7 = vpop.f32.mrb[1].mxu1  ;;  %v397_v30 = vmax.f32 %v343_v46, 0.0 }
  0xf1   : > { %410 = vxpose.xlu0.b32.start [1/16] %v394_v58, 128  ;;  %v7167_v13 = vpop.f32.mrb[2].mxu1  ;;  %v395_v31 = vmax.f32 %v335_v57, 0.0 }
  0xf2   : > { %v7172_v34 = vpop.f32.mrb[3].mxu1 }
  0xf3   : > { %v7160_v60 = vpop.permute.xlu1 %853  ;;  %v6418_v33 = vpop.f32.mrb[4].mxu0 }
  0xf4   : > { %9847 = vst [vmem:[#allocation20_spill] sm:$0xff] %v7160_v60  ;;  %1549 = vperm.xlu1 %6723, %v6922_v6   ;;  %v347_v47 = vpop.f32.mrb[5].mxu0  ;;  %v356_v20 = vadd.f32 %v6418_v33, %v7151_v45 }
  0xf5   : > { %411 = vxpose.xlu0.b32.cont [2/16] %v395_v31, 128  ;;  %v6419_v56 = vpop.f32.mrb[6].mxu0  ;;  %v348_v14 = vadd.f32 %v7151_v45, %v347_v47 }
  0xf6   : > { %v350_v58 = vpop.f32.mrb[7].mxu0  ;;  %v400_v33 = vmax.f32 %v356_v20, 0.0 }
  0xf7   : > { %v7175_v55 = vpop.permute.xlu1 %858  ;;  %v7180_v57 = vpop.f32.mrb[4].mxu1  ;;  %v351_v46 = vadd.f32 %v7151_v45, %v350_v58 }
  0xf8   : > { %9848 = vst [vmem:[#allocation21_spill] sm:$0xff] %v7175_v55  ;;  %1554 = vperm.xlu1 %6723, %v6934_v12   ;;  %v7188_v29 = vpop.f32.mrb[5].mxu1 }
  0xf9   : > { %412 = vxpose.xlu0.b32.cont [3/16] %v396_v8, 128  ;;  %v7191_v31 = vpop.f32.mrb[6].mxu1  ;;  %v398_v8 = vmax.f32 %v348_v14, 0.0  ;;  %v5990_v14 = vld [vmem:[%s6822_s8 + $0x2e0] sm:$0xff]  ;;  %v399_v19 = vmax.f32 %v351_v46, 0.0  ;;  %v359_v46 = vadd.f32 %v6419_v56, %v7151_v45 }
  0xfa   : > { %v7197_v1 = vpop.f32.mrb[7].mxu1 }
  0xfb   : > { %v7186_v15 = vpop.permute.xlu1 %863  ;;  %v7195_v42 = vpop.f32.mrb[8].mxu0 }
  0xfc   : > { %9849 = vst [vmem:[#allocation22_spill] sm:$0xff] %v7186_v15  ;;  %1559 = vperm.xlu1 %6723, %v6944_v16   ;;  %v363_v47 = vpop.f32.mrb[9].mxu0 }
  0xfd   : > { %413 = vxpose.xlu0.b32.cont [4/16] %v397_v30, 128  ;;  %v7201_v55 = vpop.f32.mrb[10].mxu0 }
  0xfe   : > { %v366_v9 = vpop.f32.mrb[11].mxu0  ;;  %v375_v54 = vadd.f32 %v7201_v55, %v7151_v45 }
  0xff   : > { %v7199_v15 = vpop.permute.xlu1 %868  ;;  %v7205_v60 = vpop.f32.mrb[8].mxu1 }
 0x100   : > { %9850 = vst [vmem:[#allocation23_spill] sm:$0xff] %v7199_v15  ;;  %1564 = vperm.xlu1 %6723, %v6958_v23   ;;  %v7209_v49 = vpop.f32.mrb[9].mxu1  ;;  %v1994_v15 = vpack.c.bf16 %v5991_v44, %v5990_v14  ;;  %v405_v52 = vmax.f32 %v375_v54, 0.0 }
 0x101   : > { %414 = vxpose.xlu0.b32.cont [5/16] %v398_v8, 128  ;;  %v7214_v30 = vpop.f32.mrb[10].mxu1  ;;  %v1995_v8 = vpack.c.bf16 %v5993_v27, %v5992_v43  ;;  %v364_v27 = vadd.f32 %v7151_v45, %v363_v47 }
 0x102   : > { %v7221_v18 = vpop.f32.mrb[11].mxu1  ;;  %6514 = vmatprep.mubr.msk.bf16.mxu1 %vm268_vm1, %v1994_v15 }
 0x103   : > { %v7207_v50 = vpop.permute.xlu1 %873  ;;  %v7219_v58 = vpop.f32.mrb[12].mxu0  ;;  %6515 = vmatmul.mubr.msk.bf16.gmra.mrb[44].mxu1 %vm268_vm1, %v1995_v8  ;;  %v401_v8 = vmax.f32 %v359_v46, 0.0  ;;  %v402_v47 = vmax.f32 %v364_v27, 0.0  ;;  %v367_v46 = vadd.f32 %v7151_v45, %v366_v9  ;;  %v6006_v27 = vld [vmem:[%s6822_s8 + $0x310] sm:$0xff] }
 0x104   : > { %9851 = vst [vmem:[#allocation24_spill] sm:$0xff] %v7207_v50  ;;  %1569 = vperm.xlu1 %6723, %v6964_v26   ;;  %v379_v50 = vpop.f32.mrb[13].mxu0 }
 0x105   : > { %415 = vxpose.xlu0.b32.cont [6/16] %v399_v19, 128  ;;  %v7226_v4 = vpop.f32.mrb[14].mxu0  ;;  %v403_v48 = vmax.f32 %v367_v46, 0.0 }
 0x106   : > { %v382_v44 = vpop.f32.mrb[15].mxu0 }
 0x107   : > { %v7224_v2 = vpop.permute.xlu1 %878  ;;  %v7231_v14 = vpop.f32.mrb[12].mxu1 }
 0x108   : > { %9852 = vst [vmem:[#allocation25_spill] sm:$0xff] %v7224_v2  ;;  %1574 = vperm.xlu1 %6723, %v6976_v32   ;;  %v7236_v19 = vpop.f32.mrb[13].mxu1 }
 0x109   : > { %416 = vxpose.xlu0.b32.cont [7/16] %v400_v33, 128  ;;  %v7239_v15 = vpop.f32.mrb[14].mxu1 }
 0x10a   : > { %v7241_v2 = vpop.f32.mrb[15].mxu1 }
 0x10b   : > { %v7234_v43 = vpop.permute.xlu1 %883  ;;  %v7243_v20 = vpop.f32.mrb[16].mxu0 }
 0x10c   : > { %9853 = vst [vmem:[#allocation26_spill] sm:$0xff] %v7234_v43  ;;  %1579 = vperm.xlu1 %6723, %v6982_v35   ;;  %v7245_v56 = vpop.f32.mrb[17].mxu0 }
 0x10d   : > { %417 = vxpose.xlu0.b32.cont [8/16] %v401_v8, 128  ;;  %v7249_v43 = vpop.f32.mrb[18].mxu0  ;;  %v6007_v8 = vld [vmem:[%s6822_s8 + $0x318] sm:$0xff] }
 0x10e   : > { %v7252_v63 = vpop.f32.mrb[19].mxu0 }
 0x10f   : > { %v7247_v33 = vpop.permute.xlu1 %1156 }
 0x110   : > { %9854 = vst [vmem:[#allocation27_spill] sm:$0xff] %v7247_v33  ;;  %1852 = vperm.xlu1 %6723, %v6797_v0   ;;  %v372_v33 = vadd.f32 %v7195_v42, %v7151_v45  ;;  %v2337_v0 = vpack.c.bf16 %v6007_v8, %v6006_v27  ;;  %v380_v42 = vadd.f32 %v7151_v45, %v379_v50 }
 0x111   : > { %418 = vxpose.xlu0.b32.cont [9/16] %v402_v47, 128  ;;  %v383_v8 = vadd.f32 %v7151_v45, %v382_v44 }
 0x112   : > { %6521 = vmatmul.mubr.msk.bf16.vlgmr.msra.gmra.mrb[48].mxu0 %vm268_vm1, %v2337_v0  ;;  %v404_v53 = vmax.f32 %v372_v33, 0.0  ;;  %v406_v33 = vmax.f32 %v380_v42, 0.0  ;;  %v6008_v0 = vld [vmem:[%s6822_s8 + $0x320] sm:$0xff]  ;;  %v6010_v42 = vld [vmem:[%s6822_s8 + $0x330] sm:$0xff] }
 0x113   : > { %v7255_v62 = vpop.permute.xlu1 %1161  ;;  %v7264_v40 = vpop.f32.mrb[20].mxu0 }
 0x114   : > { %9855 = vst [vmem:[#allocation28_spill] sm:$0xff] %v7255_v62  ;;  %1857 = vperm.xlu1 %6723, %v6809_v3   ;;  %v7266_v39 = vpop.f32.mrb[21].mxu0 }
 0x115   : > { %419 = vxpose.xlu0.b32.cont [10/16] %v403_v48, 128  ;;  %v7271_v47 = vpop.f32.mrb[22].mxu0 }
 0x116   : > { %v7275_v3 = vpop.f32.mrb[23].mxu0 }
 0x117   : > { %v7269_v9 = vpop.permute.xlu1 %1166 }
 0x118   : > { %9856 = vst [vmem:[#allocation29_spill] sm:$0xff] %v7269_v9  ;;  %1862 = vperm.xlu1 %6723, %v6817_v5  }
 0x119   : > { %420 = vxpose.xlu0.b32.cont [11/16] %v404_v53, 128  ;;  %v6009_v53 = vld [vmem:[%s6822_s8 + $0x328] sm:$0xff] }
 0x11a   : > { %v2338_v54 = vpack.c.bf16 %v6009_v53, %v6008_v0  ;;  %v7319_v0 = vpop.f32.mrb[16].mxu1 }
 0x11b   : > { %v7280_v48 = vpop.permute.xlu1 %1171  ;;  %v7283_v46 = vpop.f32.mrb[24].mxu0 }
 0x11c   : > { %9857 = vst [vmem:[#allocation30_spill] sm:$0xff] %v7280_v48  ;;  %1867 = vperm.xlu1 %6723, %v6840_v17   ;;  %v7285_v5 = vpop.f32.mrb[25].mxu0  ;;  %v407_v48 = vmax.f32 %v383_v8, 0.0  ;;  %6524 = vmatprep.mubr.msk.bf16.mxu0 %vm268_vm1, %v2338_v54  ;;  %v391_v8 = vadd.f32 %v7226_v4, %v7151_v45  ;;  %v7325_v54 = vpop.f32.mrb[17].mxu1 }
 0x11d   : > { %421 = vxpose.xlu0.b32.cont [12/16] %v405_v52, 128  ;;  %v7289_v55 = vpop.f32.mrb[26].mxu0  ;;  %v6011_v52 = vld [vmem:[%s6822_s8 + $0x338] sm:$0xff] }
 0x11e   : > { %v7292_v50 = vpop.f32.mrb[27].mxu0 }
 0x11f   : > { %v7287_v27 = vpop.permute.xlu1 %1176 }
 0x120   : > { %9858 = vst [vmem:[#allocation31_spill] sm:$0xff] %v7287_v27  ;;  %1872 = vperm.xlu1 %6723, %v6857_v28   ;;  %v388_v27 = vadd.f32 %v7219_v58, %v7151_v45  ;;  %v2339_v28 = vpack.c.bf16 %v6011_v52, %v6010_v42 }
 0x121   : > { %422 = vxpose.xlu0.b32.cont [13/16] %v406_v33, 128 }
 0x122   : > { %6525 = vmatmul.mubr.msk.bf16.gmra.mrb[52].mxu0 %vm268_vm1, %v2339_v28  ;;  %v408_v58 = vmax.f32 %v388_v27, 0.0  ;;  %v409_v27 = vmax.f32 %v391_v8, 0.0  ;;  %v6014_v8 = vld [vmem:[%s6822_s8 + $0x350] sm:$0xff] }
 0x123   : > { %v7295_v17 = vpop.permute.xlu1 %1181  ;;  %v7304_v9 = vpop.f32.mrb[28].mxu0 }
 0x124   : > { %9859 = vst [vmem:[#allocation32_spill] sm:$0xff] %v7295_v17  ;;  %1877 = vperm.xlu1 %6723, %v6872_v37   ;;  %v7306_v62 = vpop.f32.mrb[29].mxu0 }
 0x125   : > { %423 = vxpose.xlu0.b32.cont [14/16] %v407_v48, 128  ;;  %v7311_v33 = vpop.f32.mrb[30].mxu0  ;;  %v680_v48 = vadd.f32 %v7151_v45, %v7162_v7  ;;  %v683_v7 = vadd.f32 %v7151_v45, %v7172_v34 }
 0x126   : > { %v7315_v37 = vpop.f32.mrb[31].mxu0 }
 0x127   : > { %v7309_v44 = vpop.permute.xlu1 %1186  ;;  %v742_v42 = vmax.f32 %v680_v48, 0.0  ;;  %v688_v48 = vadd.f32 %v7158_v59, %v7151_v45  ;;  %v696_v59 = vadd.f32 %v7151_v45, %v7188_v29  ;;  %v699_v29 = vadd.f32 %v7151_v45, %v7197_v1 }
 0x128   : > { %9860 = vst [vmem:[#allocation33_spill] sm:$0xff] %v7309_v44  ;;  %1882 = vperm.xlu1 %6723, %v6882_v41   ;;  %v7328_v41 = vpop.f32.mrb[18].mxu1  ;;  %v6015_v44 = vld [vmem:[%s6822_s8 + $0x358] sm:$0xff]  ;;  %v704_v1 = vadd.f32 %v7180_v57, %v7151_v45  ;;  %v712_v57 = vadd.f32 %v7151_v45, %v7209_v49 }
 0x129   : > { %424 = vxpose.xlu0.b32.cont [15/16] %v408_v58, 128  ;;  %v7330_v4 = vpop.f32.mrb[19].mxu1  ;;  %v6012_v58 = vld [vmem:[%s6822_s8 + $0x340] sm:$0xff]  ;;  %v744_v34 = vmax.f32 %v688_v48, 0.0  ;;  %v6017_v48 = vld [vmem:[%s6822_s8 + $0x368] sm:$0xff] }
 0x12b   : > { %v7323_v53 = vpop.permute.xlu1 %1191 }
 0x12c   : > { %9861 = vst [vmem:[#allocation34_spill] sm:$0xff] %v7323_v53  ;;  %1887 = vperm.xlu1 %6723, %v6895_v51   ;;  %v6013_v51 = vld [vmem:[%s6822_s8 + $0x348] sm:$0xff] }
 0x12d   : > { %425 = vxpose.xlu0.b32.end [16/16] %v409_v27, 128  ;;  %v2340_v53 = vpack.c.bf16 %v6013_v51, %v6012_v58  ;;  %v743_v27 = vmax.f32 %v683_v7, 0.0 }
 0x12f   : > { %v7332_v52 = vpop.permute.xlu1 %1196  ;;  %6528 = vmatprep.mubr.msk.bf16.mxu0 %vm268_vm1, %v2340_v53 }
 0x130   : > { %9862 = vst [vmem:[#allocation35_spill] sm:$0xff] %v7332_v52  ;;  %1892 = vperm.xlu1 %6723, %v6912_v61   ;;  %v2341_v52 = vpack.c.bf16 %v6015_v44, %v6014_v8  ;;  %v6016_v8 = vld [vmem:[%s6822_s8 + $0x360] sm:$0xff] }
 0x131   : > { %758 = vxpose.xlu0.b32.start [1/16] %v742_v42, 128  ;;  %v7353_v42 = vpop.f32.mrb[20].mxu1 }
 0x132   : > { %6529 = vmatmul.mubr.msk.bf16.gmra.mrb[56].mxu0 %vm268_vm1, %v2341_v52  ;;  %v7359_v53 = vpop.f32.mrb[21].mxu1 }
 0x133   : > { %v7337_v28 = vpop.permute.xlu1 %1201  ;;  %v7362_v52 = vpop.f32.mrb[22].mxu1 }
 0x134   : > { %9863 = vst [vmem:[#allocation36_spill] sm:$0xff] %v7337_v28  ;;  %1897 = vperm.xlu1 %6723, %v6922_v6   ;;  %v691_v6 = vadd.f32 %v7167_v13, %v7151_v45  ;;  %v7364_v7 = vpop.f32.mrb[23].mxu1  ;;  %v746_v13 = vmax.f32 %v696_v59, 0.0  ;;  %v747_v59 = vmax.f32 %v699_v29, 0.0  ;;  %v6041_v28 = vld [vmem:[%s6822_s8 + $0x3d8] sm:$0xff] }
 0x135   : > { %759 = vxpose.xlu0.b32.cont [2/16] %v743_v27, 128 }
 0x137   : > { %v7347_v61 = vpop.permute.xlu1 %1206 }
 0x138   : > { %9864 = vst [vmem:[#allocation37_spill] sm:$0xff] %v7347_v61  ;;  %1902 = vperm.xlu1 %6723, %v6934_v12   ;;  %v745_v12 = vmax.f32 %v691_v6, 0.0  ;;  %v6019_v6 = vld [vmem:[%s6822_s8 + $0x378] sm:$0xff]  ;;  %v6038_v61 = vld [vmem:[%s6822_s8 + $0x3c0] sm:$0xff] }
 0x139   : > { %760 = vxpose.xlu0.b32.cont [3/16] %v744_v34, 128  ;;  %v2342_v34 = vpack.c.bf16 %v6017_v48, %v6016_v8  ;;  %v7392_v8 = vpop.f32.mrb[24].mxu1 }
 0x13a   : > { %v7398_v48 = vpop.f32.mrb[25].mxu1 }
 0x13b   : > { %v7357_v44 = vpop.permute.xlu1 %1211  ;;  %6532 = vmatprep.mubr.msk.bf16.mxu0 %vm268_vm1, %v2342_v34  ;;  %v750_v34 = vmax.f32 %v712_v57, 0.0  ;;  %v6033_v57 = vld [vmem:[%s6822_s8 + $0x398] sm:$0xff] }
 0x13c   : > { %9865 = vst [vmem:[#allocation38_spill] sm:$0xff] %v7357_v44  ;;  %1907 = vperm.xlu1 %6723, %v6944_v16   ;;  %v6732_v16 = vld [vmem:[%s9824_s1] sm:$0x1f]  }
 0x13d   : > { %761 = vxpose.xlu0.b32.cont [4/16] %v745_v12, 128  ;;  %6705 = vmatprep.subr.msk.bf16.mxu1 %vm293_vm0, %v6732_v16  ;;  %v2731_v27 = vsel %vm293_vm0, %v6732_v16, 0  ;;  %v707_v16 = vadd.f32 %v7191_v31, %v7151_v45  ;;  %v7406_v31 = vld [vmem:[%s9826_s3] sm:$0xff] }
 0x13e   : > { %6537 = vmatpush3.bf16.msra.mxu1 %v2731_v27  ;;  %v7401_v27 = vpop.f32.mrb[26].mxu1 }
 0x13f   : > { %v7366_v58 = vpop.permute.xlu1 %1216  ;;  %v7408_v49 = vpop.f32.mrb[27].mxu1 }
 0x140   : > { %9866 = vst [vmem:[#allocation39_spill] sm:$0xff] %v7366_v58  ;;  %1912 = vperm.xlu1 %6723, %v6958_v23   ;;  %v6018_v23 = vld [vmem:[%s6822_s8 + $0x370] sm:$0xff] }
 0x141   : > { %762 = vxpose.xlu0.b32.cont [5/16] %v746_v13, 128  ;;  %v2343_v12 = vpack.c.bf16 %v6019_v6, %v6018_v23  ;;  %v7418_v6 = vld [vmem:[%s9826_s3 + $0x8] sm:$0xff] }
 0x143   : > { %v7374_v51 = vpop.permute.xlu1 %1221  ;;  %6533 = vmatmul.mubr.msk.bf16.gmra.mrb[60].mxu0 %vm268_vm1, %v2343_v12  ;;  %v6031_v12 = vld [vmem:[%s6822_s8 + $0x388] sm:$0xff] }
 0x144   : > { %9867 = vst [vmem:[#allocation40_spill] sm:$0xff] %v7374_v51  ;;  %1917 = vperm.xlu1 %6723, %v6964_v26   ;;  %v748_v26 = vmax.f32 %v704_v1, 0.0  ;;  %v736_v51 = vadd.f32 %v7231_v14, %v7151_v45  ;;  %v739_v14 = vadd.f32 %v7239_v15, %v7151_v45 }
 0x145   : > { %763 = vxpose.xlu0.b32.cont [6/16] %v747_v59, 128  ;;  %v6030_v59 = vld [vmem:[%s6822_s8 + $0x380] sm:$0xff] }
 0x147   : > { %v7386_v13 = vpop.permute.xlu1 %1226 }
 0x148   : > { %9868 = vst [vmem:[#allocation41_spill] sm:$0xff] %v7386_v13  ;;  %1922 = vperm.xlu1 %6723, %v6976_v32   ;;  %v749_v32 = vmax.f32 %v707_v16, 0.0  ;;  %v6032_v16 = vld [vmem:[%s6822_s8 + $0x390] sm:$0xff]  ;;  %v6035_v13 = vld [vmem:[%s6822_s8 + $0x3a8] sm:$0xff] }
 0x149   : > { %764 = vxpose.xlu0.b32.cont [7/16] %v748_v26, 128  ;;  %v2684_v26 = vpack.c.bf16 %v6031_v12, %v6030_v59  ;;  %v7446_v12 = vpop.f32.mrb[28].mxu1 }
 0x14a   : > { %9873 = vst [vmem:[#allocation46_spill] sm:$0xff] %v7446_v12 }
 0x14b   : > { %v7396_v29 = vpop.permute.xlu1 %1231  ;;  %6538 = vmatprep.mubr.msk.bf16.mxu1 %vm268_vm1, %v2684_v26 }
 0x14c   : > { %9869 = vst [vmem:[#allocation42_spill] sm:$0xff] %v7396_v29  ;;  %1927 = vperm.xlu1 %6723, %v6982_v35   ;;  %v715_v35 = vadd.f32 %v7151_v45, %v7221_v18  ;;  %v7432_v18 = vld [vmem:[%s9826_s3 + $0x10] sm:$0xff]  ;;  %v2685_v29 = vpack.c.bf16 %v6033_v57, %v6032_v16  ;;  %v7460_v57 = vld [vmem:[%s9826_s3 + $0x20] sm:$0xff] }
 0x14d   : > { %765 = vxpose.xlu0.b32.cont [8/16] %v749_v32, 128  ;;  %v720_v32 = vadd.f32 %v7205_v60, %v7151_v45  ;;  %v723_v60 = vadd.f32 %v7214_v30, %v7151_v45 }
 0x14e   : > { %6539 = vmatmul.mubr.msk.bf16.vlgmr.msra.gmra.mrb[48].mxu1 %vm268_vm1, %v2685_v29  ;;  %v7452_v29 = vpop.f32.mrb[29].mxu1 }
 0x14f   : > { %v7410_v23 = vpop.permute.xlu1 %1504  ;;  %v752_v59 = vmax.f32 %v720_v32, 0.0  ;;  %9875 = vst [vmem:[#allocation48_spill] sm:$0xff] %v7452_v29  ;;  %v7455_v30 = vpop.f32.mrb[30].mxu1  ;;  %v753_v16 = vmax.f32 %v723_v60, 0.0  ;;  %v7472_v60 = vld [vmem:[%s9826_s3 + $0x28] sm:$0xff] }
 0x150   : > { %9870 = vst [vmem:[#allocation43_spill] sm:$0xff] %v7410_v23  ;;  %2200 = vperm.xlu1 %6723, %v7406_v31   ;;  %v751_v23 = vmax.f32 %v715_v35, 0.0  ;;  %v7444_v35 = vld [vmem:[%s9826_s3 + $0x18] sm:$0xff]  ;;  %9876 = vst [vmem:[#allocation49_spill] sm:$0xff] %v7455_v30  ;;  %v1052_v30 = vadd.f32 %v7264_v40, %v7151_v45  ;;  %v1055_v40 = vadd.f32 %v7271_v47, %v7151_v45 }
 0x151   : > { %766 = vxpose.xlu0.b32.cont [9/16] %v750_v34, 128 }
 0x152   : > { %v1097_v47 = vmax.f32 %v1055_v40, 0.0 }
 0x153   : > { %v7420_v1 = vpop.permute.xlu1 %1509 }
 0x154   : > { %9871 = vst [vmem:[#allocation44_spill] sm:$0xff] %v7420_v1  ;;  %2205 = vperm.xlu1 %6723, %v7418_v6   ;;  %v6034_v1 = vld [vmem:[%s6822_s8 + $0x3a0] sm:$0xff] }
 0x155   : > { %767 = vxpose.xlu0.b32.cont [10/16] %v751_v23, 128  ;;  %v728_v23 = vadd.f32 %v7151_v45, %v7236_v19  ;;  %v7462_v19 = vpop.f32.mrb[31].mxu1 }
 0x156   : > { %9877 = vst [vmem:[#allocation50_spill] sm:$0xff] %v7462_v19 }
 0x157   : > { %v7435_v34 = vpop.permute.xlu1 %1514  ;;  %v754_v32 = vmax.f32 %v728_v23, 0.0  ;;  %v2686_v23 = vpack.c.bf16 %v6035_v13, %v6034_v1  ;;  %v756_v13 = vmax.f32 %v736_v51, 0.0  ;;  %v7498_v1 = vld [vmem:[%s9826_s3 + $0x38] sm:$0xff]  ;;  %v757_v51 = vmax.f32 %v739_v14, 0.0  ;;  %v7526_v14 = vld [vmem:[%s9826_s3 + $0x48] sm:$0xff] }
 0x158   : > { %9872 = vst [vmem:[#allocation45_spill] sm:$0xff] %v7435_v34  ;;  %2210 = vperm.xlu1 %6723, %v7432_v18  }
 0x159   : > { %768 = vxpose.xlu0.b32.cont [11/16] %v752_v59, 128  ;;  %6542 = vmatprep.mubr.msk.bf16.mxu1 %vm268_vm1, %v2686_v23  ;;  %v7514_v23 = vld [vmem:[%s9826_s3 + $0x40] sm:$0xff] }
 0x15b   : > { %v7450_v26 = vpop.permute.xlu1 %1519 }
 0x15c   : > { %9874 = vst [vmem:[#allocation47_spill] sm:$0xff] %v7450_v26  ;;  %2215 = vperm.xlu1 %6723, %v7444_v35   ;;  %v731_v26 = vadd.f32 %v7151_v45, %v7241_v2  ;;  %v7486_v2 = vld [vmem:[%s9826_s3 + $0x30] sm:$0xff] }
 0x15d   : > { %769 = vxpose.xlu0.b32.cont [12/16] %v753_v16, 128  ;;  %v6036_v16 = vld [vmem:[%s6822_s8 + $0x3b0] sm:$0xff] }
 0x15e   : > { %v755_v58 = vmax.f32 %v731_v26, 0.0  ;;  %v7500_v26 = vpop.f32.mrb[32].mxu0 }
 0x15f   : > { %v7464_v59 = vpop.permute.xlu1 %1524  ;;  %9881 = vst [vmem:[#allocation54_spill] sm:$0xff] %v7500_v26 }
 0x160   : > { %9878 = vst [vmem:[#allocation51_spill] sm:$0xff] %v7464_v59  ;;  %2220 = vperm.xlu1 %6723, %v7460_v57   ;;  %v6037_v59 = vld [vmem:[%s6822_s8 + $0x3b8] sm:$0xff] }
 0x161   : > { %770 = vxpose.xlu0.b32.cont [13/16] %v754_v32, 128  ;;  %v2687_v44 = vpack.c.bf16 %v6037_v59, %v6036_v16 }
 0x163   : > { %v7474_v34 = vpop.permute.xlu1 %1529  ;;  %6543 = vmatmul.mubr.msk.bf16.gmra.mrb[52].mxu1 %vm268_vm1, %v2687_v44  ;;  %v7506_v44 = vpop.f32.mrb[33].mxu0 }
 0x164   : > { %9879 = vst [vmem:[#allocation52_spill] sm:$0xff] %v7474_v34  ;;  %2225 = vperm.xlu1 %6723, %v7472_v60   ;;  %9883 = vst [vmem:[#allocation56_spill] sm:$0xff] %v7506_v44  ;;  %v7509_v15 = vpop.f32.mrb[34].mxu0  ;;  %v6045_v44 = vld [vmem:[%s6822_s8 + $0x3f8] sm:$0xff] }
 0x165   : > { %771 = vxpose.xlu0.b32.cont [14/16] %v755_v58, 128  ;;  %v1028_v58 = vadd.f32 %v7151_v45, %v7245_v56  ;;  %9884 = vst [vmem:[#allocation57_spill] sm:$0xff] %v7509_v15  ;;  %v7516_v56 = vpop.f32.mrb[35].mxu0  ;;  %v7542_v15 = vld [vmem:[%s9826_s3 + $0x50] sm:$0xff] }
 0x166   : > { %9885 = vst [vmem:[#allocation58_spill] sm:$0xff] %v7516_v56  ;;  %v6044_v56 = vld [vmem:[%s6822_s8 + $0x3f0] sm:$0xff] }
 0x167   : > { %v7489_v32 = vpop.permute.xlu1 %1534  ;;  %v1090_v16 = vmax.f32 %v1028_v58, 0.0  ;;  %v6039_v58 = vld [vmem:[%s6822_s8 + $0x3c8] sm:$0xff] }
 0x168   : > { %9880 = vst [vmem:[#allocation53_spill] sm:$0xff] %v7489_v32  ;;  %2230 = vperm.xlu1 %6723, %v7486_v2  }
 0x169   : > { %772 = vxpose.xlu0.b32.cont [15/16] %v756_v13, 128 }
 0x16b   : > { %v7504_v59 = vpop.permute.xlu1 %1539 }
 0x16c   : > { %9882 = vst [vmem:[#allocation55_spill] sm:$0xff] %v7504_v59  ;;  %2235 = vperm.xlu1 %6723, %v7498_v1   ;;  %v1031_v59 = vadd.f32 %v7151_v45, %v7252_v63  ;;  %v1036_v63 = vadd.f32 %v7243_v20, %v7151_v45  ;;  %v1039_v20 = vadd.f32 %v7249_v43, %v7151_v45 }
 0x16d   : > { %773 = vxpose.xlu0.b32.end [16/16] %v757_v51, 128  ;;  %v2688_v51 = vpack.c.bf16 %v6039_v58, %v6038_v61 }
 0x16e   : > { %v1091_v17 = vmax.f32 %v1031_v59, 0.0  ;;  %v1092_v61 = vmax.f32 %v1036_v63, 0.0  ;;  %v7556_v59 = vld [vmem:[%s9826_s3 + $0x58] sm:$0xff]  ;;  %v1093_v43 = vmax.f32 %v1039_v20, 0.0  ;;  %v7572_v63 = vld [vmem:[%s9826_s3 + $0x60] sm:$0xff]  ;;  %v1047_v20 = vadd.f32 %v7151_v45, %v7275_v3 }
 0x16f   : > { %v7518_v13 = vpop.permute.xlu1 %1544  ;;  %6546 = vmatprep.mubr.msk.bf16.mxu1 %vm268_vm1, %v2688_v51 }
 0x170   : > { %9886 = vst [vmem:[#allocation59_spill] sm:$0xff] %v7518_v13  ;;  %2240 = vperm.xlu1 %6723, %v7514_v23   ;;  %v6040_v13 = vld [vmem:[%s6822_s8 + $0x3d0] sm:$0xff]  ;;  %v1095_v12 = vmax.f32 %v1047_v20, 0.0 }
 0x171   : > { %1106 = vxpose.xlu0.b32.start [1/16] %v1090_v16, 128  ;;  %v7528_v32 = vpop.trf.xlu0  ;;  %v2689_v16 = vpack.c.bf16 %v6041_v28, %v6040_v13  ;;  %v7558_v28 = vpop.f32.mrb[36].mxu0 }
 0x172   : > { %9889 = vst [vmem:[#allocation62_spill] sm:$0xff] %v7558_v28  ;;  %v7567_v51 = vpop.f32.mrb[37].mxu0  ;;  %v7588_v28 = vld [vmem:[%s9826_s3 + $0x68] sm:$0xff] }
 0x173   : > { %v7530_v34 = vpop.permute.xlu1 %1549  ;;  %6547 = vmatmul.mubr.msk.bf16.gmra.mrb[56].mxu1 %vm268_vm1, %v2689_v16  ;;  %9891 = vst [vmem:[#allocation64_spill] sm:$0xff] %v7567_v51  ;;  %v7574_v16 = vpop.f32.mrb[38].mxu0 }
 0x174   : > { %9887 = vst [vmem:[#allocation60_spill] sm:$0xff] %v7530_v34  ;;  %2245 = vperm.xlu1 %6723, %v7526_v14   ;;  %9892 = vst [vmem:[#allocation65_spill] sm:$0xff] %v7574_v16 }
 0x175   : > { %1107 = vxpose.xlu0.b32.cont [2/16] %v1091_v17, 128  ;;  %v7545_v34 = vpop.trf.xlu0  ;;  %v1044_v17 = vadd.f32 %v7151_v45, %v7266_v39  ;;  %v7576_v39 = vpop.f32.mrb[39].mxu0 }
 0x176   : > { %9893 = vst [vmem:[#allocation66_spill] sm:$0xff] %v7576_v39  ;;  %v6043_v39 = vld [vmem:[%s6822_s8 + $0x3e8] sm:$0xff] }
 0x177   : > { %v7547_v26 = vpop.permute.xlu1 %1554 }
 0x178   : > { %9888 = vst [vmem:[#allocation61_spill] sm:$0xff] %v7547_v26  ;;  %2250 = vperm.xlu1 %6723, %v7542_v15  }
 0x179   : > { %1108 = vxpose.xlu0.b32.cont [3/16] %v1092_v61, 128  ;;  %v7562_v13 = vpop.trf.xlu0  ;;  %v1094_v61 = vmax.f32 %v1044_v17, 0.0  ;;  %v6733_v17 = vld [vmem:[%s9824_s1] sm:$0x1f]  }
 0x17a   : > { %6706 = vmatprep.subr.msk.bf16.mxu0 %vm293_vm0, %v6733_v17  ;;  %v3079_v3 = vsel %vm293_vm0, %v6733_v17, 0 }
 0x17b   : > { %v7564_v58 = vpop.permute.xlu1 %1559  ;;  %6555 = vmatpush3.bf16.msra.mxu0 %v3079_v3 }
 0x17c   : > { %9890 = vst [vmem:[#allocation63_spill] sm:$0xff] %v7564_v58  ;;  %2255 = vperm.xlu1 %6723, %v7556_v59  }
 0x17d   : > { %1109 = vxpose.xlu0.b32.cont [4/16] %v1093_v43, 128  ;;  %v7578_v58 = vpop.trf.xlu0 }
 0x17f   : > { %v7580_v26 = vpop.permute.xlu1 %1564 }
 0x180   : > { %9894 = vst [vmem:[#allocation67_spill] sm:$0xff] %v7580_v26  ;;  %2260 = vperm.xlu1 %6723, %v7572_v63   ;;  %v6042_v26 = vld [vmem:[%s6822_s8 + $0x3e0] sm:$0xff] }
 0x181   : > { %1110 = vxpose.xlu0.b32.cont [5/16] %v1094_v61, 128  ;;  %v7593_v43 = vpop.trf.xlu0  ;;  %v2690_v51 = vpack.c.bf16 %v6043_v39, %v6042_v26  ;;  %v7609_v61 = vld [vmem:[%s9826_s3 + $0x70] sm:$0xff]  ;;  %v1096_v26 = vmax.f32 %v1052_v30, 0.0  ;;  %v7621_v39 = vld [vmem:[%s9826_s3 + $0x78] sm:$0xff] }
 0x183   : > { %v7595_v16 = vpop.permute.xlu1 %1569  ;;  %6550 = vmatprep.mubr.msk.bf16.mxu1 %vm268_vm1, %v2690_v51 }
 0x184   : > { %9895 = vst [vmem:[#allocation68_spill] sm:$0xff] %v7595_v16  ;;  %2265 = vperm.xlu1 %6723, %v7588_v28   ;;  %v2691_v16 = vpack.c.bf16 %v6045_v44, %v6044_v56  ;;  %v7623_v44 = vpop.f32.mrb[40].mxu0 }
 0x185   : > { %1111 = vxpose.xlu0.b32.cont [6/16] %v1095_v12, 128  ;;  %v431_v19 = vpop.trf.xlu0  ;;  %9897 = vst [vmem:[#allocation70_spill] sm:$0xff] %v7623_v44  ;;  %v1060_v12 = vadd.f32 %v7151_v45, %v7285_v5  ;;  %v7630_v30 = vpop.f32.mrb[41].mxu0 }
 0x186   : > { %6551 = vmatmul.mubr.msk.bf16.gmra.mrb[60].mxu1 %vm268_vm1, %v2691_v16  ;;  %9899 = vst [vmem:[#allocation72_spill] sm:$0xff] %v7630_v30  ;;  %v7632_v16 = vpop.f32.mrb[42].mxu0 }
 0x187   : > { %v7612_v29 = vpop.permute.xlu1 %1574  ;;  %9900 = vst [vmem:[#allocation73_spill] sm:$0xff] %v7632_v16  ;;  %v7634_v20 = vpop.f32.mrb[43].mxu0  ;;  %v1098_v17 = vmax.f32 %v1060_v12, 0.0  ;;  %v6056_v16 = vld [vmem:[%s6822_s8 + $0x400] sm:$0xff]  ;;  %v6057_v12 = vld [vmem:[%s6822_s8 + $0x408] sm:$0xff] }
 0x188   : > { %9896 = vst [vmem:[#allocation69_spill] sm:$0xff] %v7612_v29  ;;  %2270 = vperm.xlu1 %6723, %v7609_v61   ;;  %9901 = vst [vmem:[#allocation74_spill] sm:$0xff] %v7634_v20  ;;  %v3032_v44 = vpack.c.bf16 %v6057_v12, %v6056_v16  ;;  %v6058_v20 = vld [vmem:[%s6822_s8 + $0x410] sm:$0xff] }
 0x189   : > { %1112 = vxpose.xlu0.b32.cont [7/16] %v1096_v26, 128  ;;  %v432_v56 = vpop.trf.xlu0  ;;  %v1063_v26 = vadd.f32 %v7151_v45, %v7292_v50  ;;  %v6059_v50 = vld [vmem:[%s6822_s8 + $0x418] sm:$0xff] }
 0x18a   : > { %6556 = vmatprep.mubr.msk.bf16.mxu0 %vm268_vm1, %v3032_v44  ;;  %v1076_v44 = vadd.f32 %v7151_v45, %v7306_v62 }
 0x18b   : > { %v7627_v51 = vpop.permute.xlu1 %1579 }
 0x18c   : > { %9898 = vst [vmem:[#allocation71_spill] sm:$0xff] %v7627_v51  ;;  %2275 = vperm.xlu1 %6723, %v7621_v39   ;;  %v539_v51 = vmul.f32 %v7038_v11, %v7545_v34  ;;  %v1068_v11 = vadd.f32 %v7283_v46, %v7151_v45  ;;  %v1099_v34 = vmax.f32 %v1063_v26, 0.0  ;;  %v1102_v26 = vmax.f32 %v1076_v44, 0.0  ;;  %v6062_v44 = vld [vmem:[%s6822_s8 + $0x430] sm:$0xff] }
 0x18d   : > { %1113 = vxpose.xlu0.b32.cont [8/16] %v1097_v47, 128  ;;  %v433_v5 = vpop.trf.xlu0  ;;  %v538_v47 = vmul.f32 %v7035_v10, %v7528_v32 }
 0x18e   : > { %v1100_v46 = vmax.f32 %v1068_v11, 0.0  ;;  %v1079_v11 = vadd.f32 %v7151_v45, %v7315_v37  ;;  %v1084_v37 = vadd.f32 %v7304_v9, %v7151_v45  ;;  %v1087_v9 = vadd.f32 %v7311_v33, %v7151_v45 }
 0x18f   : > { %v7636_v3 = vpop.permute.xlu1 %1852  ;;  %v554_v30 = vadd.f32 %v539_v51, %v538_v47  ;;  %v1071_v51 = vadd.f32 %v7289_v55, %v7151_v45 }
 0x190   : > { %9902 = vst [vmem:[#allocation75_spill] sm:$0xff] %v7636_v3  ;;  %2548 = vperm.xlu1 %6723, %v7406_v31   ;;  %v540_v3 = vmul.f32 %v7046_v21, %v7562_v13  ;;  %v542_v13 = vmul.f32 %v7053_v24, %v7593_v43  ;;  %v544_v24 = vmul.f32 %v7064_v36, %v432_v56  ;;  %v9904_v56 = vld [vmem:[#allocation3_spill] sm:$0xff]  ;;  %v1105_v33 = vmax.f32 %v1087_v9, 0.0  ;;  %v6065_v9 = vld [vmem:[%s6822_s8 + $0x448] sm:$0xff] }
 0x191   : > { %1114 = vxpose.xlu0.b32.cont [9/16] %v1098_v17, 128  ;;  %v434_v40 = vpop.trf.xlu0  ;;  %v3033_v17 = vpack.c.bf16 %v6059_v50, %v6058_v20  ;;  %v1101_v55 = vmax.f32 %v1071_v51, 0.0 }
 0x192   : > { %v555_v21 = vadd.f32 %v554_v30, %v540_v3  ;;  %v546_v50 = vmul.f32 %v9904_v56, %v434_v40  ;;  %v9910_v56 = vld [vmem:[#allocation7_spill] sm:$0xff] }
 0x193   : > { %v7643_v29 = vpop.permute.xlu1 %1857  ;;  %6557 = vmatmul.mubr.msk.bf16.vlgmr.msra.gmra.mrb[64].mxu0 %vm268_vm1, %v3033_v17 }
 0x194   : > { %9903 = vst [vmem:[#allocation76_spill] sm:$0xff] %v7643_v29  ;;  %2553 = vperm.xlu1 %6723, %v7418_v6   ;;  %v541_v29 = vmul.f32 %v7050_v22, %v7578_v58  ;;  %v543_v22 = vmul.f32 %v7056_v25, %v431_v19  ;;  %v7668_v58 = vpop.f32.mrb[44].mxu0  ;;  %v545_v19 = vmul.f32 %v7068_v38, %v433_v5  ;;  %v9905_v38 = vld [vmem:[#allocation4_spill] sm:$0xff] }
 0x195   : > { %1115 = vxpose.xlu0.b32.cont [10/16] %v1099_v34, 128  ;;  %v435_v10 = vpop.trf.xlu0  ;;  %v7676_v43 = vpop.f32.mrb[45].mxu0 }
 0x196   : > { %v556_v16 = vadd.f32 %v555_v21, %v541_v29  ;;  %v7678_v29 = vpop.f32.mrb[46].mxu0  ;;  %v547_v5 = vmul.f32 %v9905_v38, %v435_v10  ;;  %v9911_v38 = vld [vmem:[#allocation8_spill] sm:$0xff] }
 0x197   : > { %v7659_v32 = vpop.permute.xlu1 %1862  ;;  %v7681_v62 = vpop.f32.mrb[47].mxu0 }
 0x198   : > { %2558 = vperm.xlu1 %6723, %v7432_v18   ;;  %v557_v3 = vadd.f32 %v556_v16, %v542_v13  ;;  %v6060_v13 = vld [vmem:[%s6822_s8 + $0x420] sm:$0xff]  ;;  %v9907_v16 = vld [vmem:[#allocation5_spill] sm:$0xff] }
 0x199   : > { %1116 = vxpose.xlu0.b32.cont [11/16] %v1100_v46, 128  ;;  %v436_v20 = vpop.trf.xlu0  ;;  %v6061_v46 = vld [vmem:[%s6822_s8 + $0x428] sm:$0xff] }
 0x19a   : > { %v558_v25 = vadd.f32 %v557_v3, %v543_v22  ;;  %v548_v22 = vmul.f32 %v9907_v16, %v436_v20  ;;  %v3034_v40 = vpack.c.bf16 %v6061_v46, %v6060_v13  ;;  %v6063_v3 = vld [vmem:[%s6822_s8 + $0x438] sm:$0xff]  ;;  %v1376_v13 = vadd.f32 %v7151_v45, %v7325_v54 }
 0x19b   : > { %v7672_v30 = vpop.permute.xlu1 %1867 }
 0x19c   : > { %2563 = vperm.xlu1 %6723, %v7444_v35   ;;  %v559_v36 = vadd.f32 %v558_v25, %v544_v24  ;;  %v1103_v24 = vmax.f32 %v1079_v11, 0.0  ;;  %v9908_v25 = vld [vmem:[#allocation6_spill] sm:$0xff]  ;;  %6560 = vmatprep.mubr.msk.bf16.mxu0 %vm268_vm1, %v3034_v40  ;;  %v1438_v54 = vmax.f32 %v1376_v13, 0.0 }
 0x19d   : > { %1117 = vxpose.xlu0.b32.cont [12/16] %v1101_v55, 128  ;;  %v437_v12 = vpop.trf.xlu0  ;;  %v3035_v55 = vpack.c.bf16 %v6063_v3, %v6062_v44  ;;  %v6067_v13 = vld [vmem:[%s6822_s8 + $0x458] sm:$0xff] }
 0x19e   : > { %v560_v34 = vadd.f32 %v559_v36, %v545_v19  ;;  %v549_v19 = vmul.f32 %v9908_v25, %v437_v12  ;;  %v9915_v25 = vld [vmem:[#allocation10_spill] sm:$0xff] }
 0x19f   : > { %v7683_v47 = vpop.permute.xlu1 %1872  ;;  %6561 = vmatmul.mubr.msk.bf16.gmra.mrb[68].mxu0 %vm268_vm1, %v3035_v55 }
 0x1a0   : > { %2568 = vperm.xlu1 %6723, %v7460_v57   ;;  %v561_v51 = vadd.f32 %v560_v34, %v546_v50  ;;  %v1104_v34 = vmax.f32 %v1084_v37, 0.0 }
 0x1a1   : > { %1118 = vxpose.xlu0.b32.cont [13/16] %v1102_v26, 128  ;;  %v438_v17 = vpop.trf.xlu0 }
 0x1a2   : > { %v562_v10 = vadd.f32 %v561_v51, %v547_v5  ;;  %v550_v50 = vmul.f32 %v9910_v56, %v438_v17  ;;  %v7710_v5 = vpop.f32.mrb[32].mxu1  ;;  %v9913_v17 = vld [vmem:[#allocation9_spill] sm:$0xff] }
 0x1a3   : > { %v7690_v21 = vpop.permute.xlu1 %1877  ;;  %v7718_v40 = vpop.f32.mrb[33].mxu1 }
 0x1a4   : > { %9906 = vst [vmem:[#allocation3_spill] sm:$0xff] %v7690_v21  ;;  %2573 = vperm.xlu1 %6723, %v7472_v60   ;;  %v563_v20 = vadd.f32 %v562_v10, %v548_v22  ;;  %v7720_v44 = vpop.f32.mrb[34].mxu1 }
 0x1a5   : > { %1119 = vxpose.xlu0.b32.cont [14/16] %v1103_v24, 128  ;;  %v439_v26 = vpop.trf.xlu0  ;;  %v7722_v37 = vpop.f32.mrb[35].mxu1 }
 0x1a6   : > { %v564_v11 = vadd.f32 %v563_v20, %v549_v19  ;;  %v551_v12 = vmul.f32 %v9911_v38, %v439_v26  ;;  %v1379_v26 = vadd.f32 %v7151_v45, %v7330_v4  ;;  %v7744_v45 = vld [vmem:[%s9825_s2] ss:$0 sm:$0xff] }
 0x1a7   : > { %v7702_v36 = vpop.permute.xlu1 %1882  ;;  %v1384_v4 = vadd.f32 %v7744_v45, %v7319_v0  ;;  %v1387_v0 = vadd.f32 %v7744_v45, %v7328_v41 }
 0x1a8   : > { %9909 = vst [vmem:[#allocation4_spill] sm:$0xff] %v7702_v36  ;;  %2578 = vperm.xlu1 %6723, %v7486_v2   ;;  %v565_v16 = vadd.f32 %v564_v11, %v550_v50 }
 0x1a9   : > { %1120 = vxpose.xlu0.b32.cont [15/16] %v1104_v34, 128  ;;  %v440_v46 = vpop.trf.xlu0  ;;  %v6064_v34 = vld [vmem:[%s6822_s8 + $0x440] sm:$0xff] }
 0x1aa   : > { %v552_v22 = vmul.f32 %v9913_v17, %v440_v46  ;;  %v566_v3 = vadd.f32 %v565_v16, %v551_v12  ;;  %v3036_v38 = vpack.c.bf16 %v6065_v9, %v6064_v34  ;;  %v6066_v12 = vld [vmem:[%s6822_s8 + $0x450] sm:$0xff]  ;;  %v1439_v46 = vmax.f32 %v1379_v26, 0.0 }
 0x1ab   : > { %v7714_v51 = vpop.permute.xlu1 %1887  ;;  %v3037_v16 = vpack.c.bf16 %v6067_v13, %v6066_v12  ;;  %v1441_v9 = vmax.f32 %v1387_v0, 0.0  ;;  %v6068_v0 = vld [vmem:[%s6822_s8 + $0x460] sm:$0xff] }
 0x1ac   : > { %9912 = vst [vmem:[#allocation5_spill] sm:$0xff] %v7714_v51  ;;  %2583 = vperm.xlu1 %6723, %v7498_v1   ;;  %v567_v10 = vadd.f32 %v566_v3, %v552_v22  ;;  %6564 = vmatprep.mubr.msk.bf16.mxu0 %vm268_vm1, %v3036_v38 }
 0x1ad   : > { %1121 = vxpose.xlu0.b32.end [16/16] %v1105_v33, 128  ;;  %v441_v24 = vpop.trf.xlu0  ;;  %6565 = vmatmul.mubr.msk.bf16.gmra.mrb[72].mxu0 %vm268_vm1, %v3037_v16  ;;  %v1395_v16 = vadd.f32 %v7744_v45, %v7364_v7  ;;  %v6071_v7 = vld [vmem:[%s6822_s8 + $0x478] sm:$0xff] }
 0x1ae   : > { %v553_v19 = vmul.f32 %v9915_v25, %v441_v24  ;;  %v1392_v25 = vadd.f32 %v7744_v45, %v7359_v53 }
 0x1af   : > { %v7724_v55 = vpop.permute.xlu1 %1892 }
 0x1b0   : > { %9914 = vst [vmem:[#allocation6_spill] sm:$0xff] %v7724_v55  ;;  %2588 = vperm.xlu1 %6723, %v7514_v23   ;;  %v568_v20 = vadd.f32 %v567_v10, %v553_v19  ;;  %v7758_v10 = vpop.f32.mrb[36].mxu1  ;;  %v1442_v12 = vmax.f32 %v1392_v25, 0.0  ;;  %v6084_v55 = vld [vmem:[%s6822_s8 + $0x490] sm:$0xff] }
 0x1b1   : > { %1454 = vxpose.xlu0.b32.start [1/16] %v1438_v54, 128  ;;  %v7732_v56 = vpop.trf.xlu0  ;;  %v1440_v54 = vmax.f32 %v1384_v4, 0.0  ;;  %v7767_v34 = vpop.f32.mrb[37].mxu1 }
 0x1b2   : > { %v569_v11 = vrot.slane %v568_v20, 4  ;;  %v7771_v41 = vpop.f32.mrb[38].mxu1 }
 0x1b3   : > { %v7734_v50 = vpop.permute.xlu1 %1897  ;;  %v7773_v53 = vpop.f32.mrb[39].mxu1 }
 0x1b4   : > { %9916 = vst [vmem:[#allocation7_spill] sm:$0xff] %v7734_v50  ;;  %2593 = vperm.xlu1 %6723, %v7526_v14   ;;  %v570_v17 = vadd.f32 %v569_v11, %v568_v20  ;;  %v7769_v11 = vstv %s575_s21  ;;  %v9927_v50 = vld [vmem:[#allocation13_spill] sm:$0xff] }
 0x1b5   : > { %1455 = vxpose.xlu0.b32.cont [2/16] %v1439_v46, 128  ;;  %v7749_v22 = vpop.trf.xlu0 }
 0x1b6   : > { %v571_v3 = vrot.slane %v570_v17, 2 }
 0x1b7   : > { %v7751_v33 = vpop.permute.xlu1 %1902 }
 0x1b8   : > { %9917 = vst [vmem:[#allocation8_spill] sm:$0xff] %v7751_v33  ;;  %2598 = vperm.xlu1 %6723, %v7542_v15   ;;  %v572_v24 = vadd.f32 %v571_v3, %v570_v17  ;;  %v6734_v17 = vld [vmem:[%s9824_s1] sm:$0x1f]  }
 0x1b9   : > { %1456 = vxpose.xlu0.b32.cont [3/16] %v1440_v54, 128  ;;  %v7762_v19 = vpop.trf.xlu0  ;;  %6707 = vmatprep.subr.msk.bf16.mxu1 %vm293_vm0, %v6734_v17  ;;  %v3427_v25 = vsel %vm293_vm0, %v6734_v17, 0 }
 0x1ba   : > { %v573_v20 = vrot.slane %v572_v24, 1  ;;  %6573 = vmatpush3.bf16.msra.mxu1 %v3427_v25 }
 0x1bb   : > { %v7764_v26 = vpop.permute.xlu1 %1907 }
 0x1bc   : > { %9918 = vst [vmem:[#allocation9_spill] sm:$0xff] %v7764_v26  ;;  %2603 = vperm.xlu1 %6723, %v7556_v59   ;;  %v574_v38 = vadd.f32 %v573_v20, %v572_v24  ;;  %v6069_v24 = vld [vmem:[%s6822_s8 + $0x468] sm:$0xff]  ;;  %v6082_v26 = vld [vmem:[%s6822_s8 + $0x480] sm:$0xff] }
 0x1bd   : > { %1457 = vxpose.xlu0.b32.cont [4/16] %v1441_v9, 128  ;;  %v777_v13 = vpop.trf.xlu0  ;;  %v3038_v20 = vpack.c.bf16 %v6069_v24, %v6068_v0  ;;  %v6070_v9 = vld [vmem:[%s6822_s8 + $0x470] sm:$0xff]  ;;  %v1403_v0 = vadd.f32 %v7744_v45, %v7362_v52  ;;  %v7808_v24 = vpop.f32.mrb[40].mxu1 }
 0x1be   : > { %v577_v46 = vadd.f32 %v7769_v11, %v574_v38  ;;  %v1400_v38 = vadd.f32 %v7744_v45, %v7353_v42  ;;  %v1408_v42 = vadd.f32 %v7744_v45, %v7398_v48 }
 0x1bf   : > { %v7780_v4 = vpop.permute.xlu1 %1912  ;;  %6568 = vmatprep.mubr.msk.bf16.mxu0 %vm268_vm1, %v3038_v20  ;;  %v7815_v20 = vpop.f32.mrb[41].mxu1 }
 0x1c0   : > { %9919 = vst [vmem:[#allocation10_spill] sm:$0xff] %v7780_v4  ;;  %2608 = vperm.xlu1 %6723, %v7572_v63   ;;  %578 = vst [vmem:[%s7778_s4] sm:$0x1] %v577_v46  ;;  %v1443_v46 = vmax.f32 %v1395_v16, 0.0  ;;  %v1444_v17 = vmax.f32 %v1400_v38, 0.0  ;;  %v1446_v52 = vmax.f32 %v1408_v42, 0.0  ;;  %v6083_v42 = vld [vmem:[%s6822_s8 + $0x488] sm:$0xff] }
 0x1c1   : > { %1458 = vxpose.xlu0.b32.cont [5/16] %v1442_v12, 128  ;;  %v778_v3 = vpop.trf.xlu0  ;;  %v3039_v12 = vpack.c.bf16 %v6071_v7, %v6070_v9  ;;  %v1445_v9 = vmax.f32 %v1403_v0, 0.0  ;;  %v7817_v7 = vpop.f32.mrb[42].mxu1 }
 0x1c2   : > { %v7819_v38 = vpop.f32.mrb[43].mxu1 }
 0x1c3   : > { %v7790_v54 = vpop.permute.xlu1 %1917  ;;  %6569 = vmatmul.mubr.msk.bf16.gmra.mrb[76].mxu0 %vm268_vm1, %v3039_v12  ;;  %v1411_v12 = vadd.f32 %v7744_v45, %v7408_v49  ;;  %v6085_v49 = vld [vmem:[%s6822_s8 + $0x498] sm:$0xff] }
 0x1c4   : > { %9920 = vst [vmem:[#allocation77_spill] sm:$0xff] %v7790_v54  ;;  %2613 = vperm.xlu1 %6723, %v7588_v28  }
 0x1c5   : > { %1459 = vxpose.xlu0.b32.cont [6/16] %v1443_v46, 128  ;;  %v779_v54 = vpop.trf.xlu0 }
 0x1c7   : > { %v7802_v4 = vpop.permute.xlu1 %1922 }
 0x1c8   : > { %9921 = vst [vmem:[#allocation78_spill] sm:$0xff] %v7802_v4  ;;  %2618 = vperm.xlu1 %6723, %v7609_v61  }
 0x1c9   : > { %1460 = vxpose.xlu0.b32.cont [7/16] %v1444_v17, 128  ;;  %v780_v16 = vpop.trf.xlu0  ;;  %v9924_v17 = vld [vmem:[#allocation12_spill] sm:$0xff] }
 0x1cb   : > { %v7812_v25 = vpop.permute.xlu1 %1927 }
 0x1cc   : > { %9922 = vst [vmem:[#allocation79_spill] sm:$0xff] %v7812_v25  ;;  %2623 = vperm.xlu1 %6723, %v7621_v39   ;;  %v887_v25 = vmul.f32 %v9924_v17, %v7749_v22  ;;  %v1416_v22 = vadd.f32 %v7744_v45, %v7392_v8  ;;  %v3381_v17 = vpack.c.bf16 %v6085_v49, %v6084_v55  ;;  %v9935_v49 = vld [vmem:[#allocation18_spill] sm:$0xff] }
 0x1cd   : > { %1461 = vxpose.xlu0.b32.cont [8/16] %v1445_v9, 128  ;;  %v781_v48 = vpop.trf.xlu0  ;;  %v9926_v9 = vld [vmem:[#allocation11_spill] sm:$0xff]  ;;  %v1419_v8 = vadd.f32 %v7744_v45, %v7401_v27 }
 0x1ce   : > { %v886_v33 = vmul.f32 %v9926_v9, %v7732_v56 }
 0x1cf   : > { %v7821_v46 = vpop.permute.xlu1 %2200  ;;  %v1449_v27 = vmax.f32 %v1419_v8, 0.0 }
 0x1d0   : > { %9923 = vst [vmem:[#allocation80_spill] sm:$0xff] %v7821_v46  ;;  %2896 = vperm.xlu1 %6723, %v7406_v31   ;;  %v888_v46 = vmul.f32 %v9927_v50, %v7762_v19  ;;  %v3380_v31 = vpack.c.bf16 %v6083_v42, %v6082_v26  ;;  %v902_v51 = vadd.f32 %v887_v25, %v886_v33  ;;  %v9930_v50 = vld [vmem:[#allocation15_spill] sm:$0xff]  ;;  %v1448_v26 = vmax.f32 %v1416_v22, 0.0  ;;  %v9931_v33 = vld [vmem:[#allocation16_spill] sm:$0xff] }
 0x1d1   : > { %1462 = vxpose.xlu0.b32.cont [9/16] %v1446_v52, 128  ;;  %v782_v0 = vpop.trf.xlu0  ;;  %v1447_v52 = vmax.f32 %v1411_v12, 0.0  ;;  %v890_v19 = vmul.f32 %v9930_v50, %v778_v3  ;;  %v9932_v25 = vld [vmem:[#allocation48_spill] sm:$0xff]  ;;  %v9934_v3 = vld [vmem:[#allocation17_spill] sm:$0xff]  ;;  %v893_v22 = vmul.f32 %v9935_v49, %v781_v48  ;;  %v9942_v49 = vld [vmem:[#allocation46_spill] sm:$0xff] }
 0x1d2   : > { %6574 = vmatprep.mubr.msk.bf16.mxu1 %vm268_vm1, %v3380_v31  ;;  %v1424_v12 = vadd.f32 %v7744_v45, %v9932_v25  ;;  %v9939_v48 = vld [vmem:[#allocation20_spill] sm:$0xff] }
 0x1d3   : > { %v7828_v4 = vpop.permute.xlu1 %2205  ;;  %6575 = vmatmul.mubr.msk.bf16.vlgmr.msra.gmra.mrb[64].mxu1 %vm268_vm1, %v3381_v17 }
 0x1d4   : > { %9925 = vst [vmem:[#allocation12_spill] sm:$0xff] %v7828_v4  ;;  %2901 = vperm.xlu1 %6723, %v7418_v6   ;;  %v9928_v4 = vld [vmem:[#allocation14_spill] sm:$0xff]  ;;  %v903_v6 = vadd.f32 %v902_v51, %v888_v46  ;;  %v892_v46 = vmul.f32 %v9934_v3, %v780_v16  ;;  %v1450_v17 = vmax.f32 %v1424_v12, 0.0  ;;  %v6086_v12 = vld [vmem:[%s6822_s8 + $0x4a0] sm:$0xff] }
 0x1d5   : > { %v889_v36 = vmul.f32 %v9928_v4, %v777_v13  ;;  %1463 = vxpose.xlu0.b32.cont [10/16] %v1447_v52, 128  ;;  %v783_v56 = vpop.trf.xlu0  ;;  %v891_v13 = vmul.f32 %v9931_v33, %v779_v54 }
 0x1d6   : > { %v7851_v4 = vpop.f32.mrb[44].mxu1  ;;  %v895_v33 = vmul.f32 %v9939_v48, %v783_v56 }
 0x1d7   : > { %v7843_v9 = vpop.permute.xlu1 %2210  ;;  %v904_v55 = vadd.f32 %v903_v6, %v889_v36 }
 0x1d8   : > { %9929 = vst [vmem:[#allocation11_spill] sm:$0xff] %v7843_v9  ;;  %2906 = vperm.xlu1 %6723, %v7432_v18   ;;  %v7859_v18 = vpop.f32.mrb[45].mxu1  ;;  %v9974_v9 = vld [vmem:[#allocation70_spill] sm:$0xff] }
 0x1d9   : > { %1464 = vxpose.xlu0.b32.cont [11/16] %v1448_v26, 128  ;;  %v784_v42 = vpop.trf.xlu0  ;;  %v905_v51 = vadd.f32 %v904_v55, %v890_v19  ;;  %v7861_v36 = vpop.f32.mrb[46].mxu1  ;;  %v9938_v26 = vld [vmem:[#allocation50_spill] sm:$0xff] }
 0x1da   : > { %v7864_v52 = vpop.f32.mrb[47].mxu1  ;;  %v1427_v8 = vadd.f32 %v7744_v45, %v9938_v26 }
 0x1db   : > { %v7855_v31 = vpop.permute.xlu1 %2215  ;;  %v906_v54 = vadd.f32 %v905_v51, %v891_v13  ;;  %v6087_v51 = vld [vmem:[%s6822_s8 + $0x4a8] sm:$0xff] }
 0x1dc   : > { %9933 = vst [vmem:[#allocation13_spill] sm:$0xff] %v7855_v31  ;;  %2911 = vperm.xlu1 %6723, %v7444_v35   ;;  %v9937_v35 = vld [vmem:[#allocation19_spill] sm:$0xff]  ;;  %v6111_v31 = vld [vmem:[%s6822_s8 + $0x518] sm:$0xff] }
 0x1dd   : > { %1465 = vxpose.xlu0.b32.cont [12/16] %v1449_v27, 128  ;;  %v785_v6 = vpop.trf.xlu0  ;;  %v907_v16 = vadd.f32 %v906_v54, %v892_v46  ;;  %v894_v19 = vmul.f32 %v9937_v35, %v782_v0  ;;  %v9941_v27 = vld [vmem:[#allocation21_spill] sm:$0xff]  ;;  %v3382_v0 = vpack.c.bf16 %v6087_v51, %v6086_v12  ;;  %v1432_v35 = vadd.f32 %v7744_v45, %v9942_v49 }
 0x1de   : > { %v896_v46 = vmul.f32 %v9941_v27, %v784_v42  ;;  %v6088_v54 = vld [vmem:[%s6822_s8 + $0x4b0] sm:$0xff]  ;;  %v9945_v42 = vld [vmem:[#allocation23_spill] sm:$0xff] }
 0x1df   : > { %v7866_v50 = vpop.permute.xlu1 %2220  ;;  %v908_v55 = vadd.f32 %v907_v16, %v893_v22  ;;  %v1451_v22 = vmax.f32 %v1427_v8, 0.0  ;;  %6578 = vmatprep.mubr.msk.bf16.mxu1 %vm268_vm1, %v3382_v0  ;;  %v7893_v8 = vld [vmem:[%s9825_s2] ss:$0 sm:$0xff]  ;;  %v9950_v49 = vld [vmem:[#allocation25_spill] sm:$0xff] }
 0x1e0   : > { %9936 = vst [vmem:[#allocation14_spill] sm:$0xff] %v7866_v50  ;;  %2916 = vperm.xlu1 %6723, %v7460_v57   ;;  %v6089_v57 = vld [vmem:[%s6822_s8 + $0x4b8] sm:$0xff]  ;;  %v6110_v50 = vld [vmem:[%s6822_s8 + $0x510] sm:$0xff] }
 0x1e1   : > { %1466 = vxpose.xlu0.b32.cont [13/16] %v1450_v17, 128  ;;  %v786_v13 = vpop.trf.xlu0  ;;  %v909_v3 = vadd.f32 %v908_v55, %v894_v19  ;;  %v3383_v16 = vpack.c.bf16 %v6089_v57, %v6088_v54  ;;  %v9943_v17 = vld [vmem:[#allocation22_spill] sm:$0xff]  ;;  %v9948_v54 = vld [vmem:[#allocation56_spill] sm:$0xff] }
 0x1e2   : > { %v897_v26 = vmul.f32 %v9943_v17, %v785_v6  ;;  %v898_v55 = vmul.f32 %v9945_v42, %v786_v13  ;;  %v9946_v6 = vld [vmem:[#allocation49_spill] sm:$0xff] }
 0x1e3   : > { %v7873_v25 = vpop.permute.xlu1 %2225  ;;  %v910_v56 = vadd.f32 %v909_v3, %v895_v33  ;;  %6579 = vmatmul.mubr.msk.bf16.gmra.mrb[68].mxu1 %vm268_vm1, %v3383_v16  ;;  %v1452_v33 = vmax.f32 %v1432_v35, 0.0  ;;  %v1435_v12 = vadd.f32 %v7744_v45, %v9946_v6  ;;  %v9947_v3 = vld [vmem:[#allocation24_spill] sm:$0xff] }
 0x1e4   : > { %9940 = vst [vmem:[#allocation15_spill] sm:$0xff] %v7873_v25  ;;  %2921 = vperm.xlu1 %6723, %v7472_v60  }
 0x1e5   : > { %1467 = vxpose.xlu0.b32.cont [14/16] %v1451_v22, 128  ;;  %v787_v48 = vpop.trf.xlu0  ;;  %v911_v60 = vadd.f32 %v910_v56, %v896_v46  ;;  %v7898_v0 = vpop.f32.mrb[48].mxu0  ;;  %v1724_v46 = vadd.f32 %v7893_v8, %v9948_v54  ;;  %v1453_v45 = vmax.f32 %v1435_v12, 0.0  ;;  %v6091_v54 = vld [vmem:[%s6822_s8 + $0x4c8] sm:$0xff] }
 0x1e6   : > { %v899_v27 = vmul.f32 %v9947_v3, %v787_v48  ;;  %v7906_v35 = vpop.f32.mrb[49].mxu0 }
 0x1e7   : > { %v7885_v19 = vpop.permute.xlu1 %2230  ;;  %v912_v51 = vadd.f32 %v911_v60, %v897_v26  ;;  %v7908_v16 = vpop.f32.mrb[50].mxu0  ;;  %v1786_v26 = vmax.f32 %v1724_v46, 0.0 }
 0x1e8   : > { %9944 = vst [vmem:[#allocation16_spill] sm:$0xff] %v7885_v19  ;;  %2926 = vperm.xlu1 %6723, %v7486_v2   ;;  %v7910_v17 = vpop.f32.mrb[51].mxu0  ;;  %v9973_v19 = vld [vmem:[#allocation29_spill] sm:$0xff] }
 0x1e9   : > { %1468 = vxpose.xlu0.b32.cont [15/16] %v1452_v33, 128  ;;  %v788_v13 = vpop.trf.xlu0  ;;  %v913_v57 = vadd.f32 %v912_v51, %v898_v55  ;;  %v9952_v55 = vld [vmem:[#allocation26_spill] sm:$0xff] }
 0x1ea   : > { %v900_v22 = vmul.f32 %v9950_v49, %v788_v13  ;;  %v9953_v33 = vld [vmem:[#allocation58_spill] sm:$0xff] }
 0x1eb   : > { %v7902_v2 = vpop.permute.xlu1 %2235  ;;  %v914_v56 = vadd.f32 %v913_v57, %v899_v27  ;;  %v1727_v6 = vadd.f32 %v7893_v8, %v9953_v33  ;;  %v6090_v27 = vld [vmem:[%s6822_s8 + $0x4c0] sm:$0xff]  ;;  %v6092_v57 = vld [vmem:[%s6822_s8 + $0x4d0] sm:$0xff]  ;;  %v6093_v49 = vld [vmem:[%s6822_s8 + $0x4d8] sm:$0xff] }
 0x1ec   : > { %9949 = vst [vmem:[#allocation48_spill] sm:$0xff] %v7902_v2  ;;  %2931 = vperm.xlu1 %6723, %v7498_v1   ;;  %v3384_v13 = vpack.c.bf16 %v6091_v54, %v6090_v27 }
 0x1ed   : > { %1469 = vxpose.xlu0.b32.end [16/16] %v1453_v45, 128  ;;  %v789_v48 = vpop.trf.xlu0  ;;  %v915_v42 = vadd.f32 %v914_v56, %v900_v22  ;;  %v9955_v22 = vld [vmem:[#allocation54_spill] sm:$0xff]  ;;  %v1787_v45 = vmax.f32 %v1727_v6, 0.0  ;;  %v3385_v56 = vpack.c.bf16 %v6093_v49, %v6092_v57 }
 0x1ee   : > { %v901_v1 = vmul.f32 %v9952_v55, %v789_v48  ;;  %6582 = vmatprep.mubr.msk.bf16.mxu1 %vm268_vm1, %v3384_v13 }
 0x1ef   : > { %v7912_v60 = vpop.permute.xlu1 %2240  ;;  %6583 = vmatmul.mubr.msk.bf16.gmra.mrb[72].mxu1 %vm268_vm1, %v3385_v56 }
 0x1f0   : > { %9951 = vst [vmem:[#allocation17_spill] sm:$0xff] %v7912_v60  ;;  %2936 = vperm.xlu1 %6723, %v7514_v23   ;;  %v916_v12 = vadd.f32 %v915_v42, %v901_v1  ;;  %v1732_v23 = vadd.f32 %v9955_v22, %v7893_v8  ;;  %v9957_v1 = vld [vmem:[#allocation57_spill] sm:$0xff]  ;;  %v6109_v60 = vld [vmem:[%s6822_s8 + $0x508] sm:$0xff] }
 0x1f1   : > { %1802 = vxpose.xlu0.b32.start [1/16] %v1786_v26, 128  ;;  %v7918_v51 = vpop.trf.xlu0  ;;  %v1735_v33 = vadd.f32 %v9957_v1, %v7893_v8 }
 0x1f2   : > { %v917_v46 = vrot.slane %v916_v12, 4 }
 0x1f3   : > { %v7920_v3 = vpop.permute.xlu1 %2245  ;;  %v1789_v49 = vmax.f32 %v1735_v33, 0.0  ;;  %v6735_v33 = vld [vmem:[%s9824_s1] sm:$0x1f]  }
 0x1f4   : > { %9954 = vst [vmem:[#allocation18_spill] sm:$0xff] %v7920_v3  ;;  %2941 = vperm.xlu1 %6723, %v7526_v14   ;;  %v918_v48 = vadd.f32 %v917_v46, %v916_v12  ;;  %v1788_v14 = vmax.f32 %v1732_v23, 0.0  ;;  %v9958_v12 = vld [vmem:[#allocation64_spill] sm:$0xff]  ;;  %6708 = vmatprep.subr.msk.bf16.mxu0 %vm293_vm0, %v6735_v33  ;;  %v6108_v3 = vld [vmem:[%s6822_s8 + $0x500] sm:$0xff] }
 0x1f5   : > { %1803 = vxpose.xlu0.b32.cont [2/16] %v1787_v45, 128  ;;  %v7930_v26 = vpop.trf.xlu0  ;;  %v7938_v6 = vpop.f32.mrb[52].mxu0  ;;  %v1740_v54 = vadd.f32 %v7893_v8, %v9958_v12  ;;  %v3728_v25 = vpack.c.bf16 %v6109_v60, %v6108_v3  ;;  %v9977_v3 = vld [vmem:[#allocation31_spill] sm:$0xff] }
 0x1f6   : > { %v919_v55 = vrot.slane %v918_v48, 2 }
 0x1f7   : > { %v7932_v42 = vpop.permute.xlu1 %2250  ;;  %v1790_v56 = vmax.f32 %v1740_v54, 0.0  ;;  %v6094_v54 = vld [vmem:[%s6822_s8 + $0x4e0] sm:$0xff]  ;;  %6592 = vmatprep.mubr.msk.bf16.mxu0 %vm268_vm1, %v3728_v25  ;;  %v8047_v25 = vld [vmem:[%s9826_s3 + $0x18] sm:$0xff] }
 0x1f8   : > { %9956 = vst [vmem:[#allocation19_spill] sm:$0xff] %v7932_v42  ;;  %2946 = vperm.xlu1 %6723, %v7542_v15   ;;  %v920_v27 = vadd.f32 %v919_v55, %v918_v48  ;;  %v7947_v15 = vpop.f32.mrb[53].mxu0 }
 0x1f9   : > { %1804 = vxpose.xlu0.b32.cont [3/16] %v1788_v14, 128  ;;  %v7942_v46 = vpop.trf.xlu0  ;;  %v7949_v22 = vpop.f32.mrb[54].mxu0  ;;  %v9961_v14 = vld [vmem:[#allocation66_spill] sm:$0xff] }
 0x1fa   : > { %v921_v57 = vrot.slane %v920_v27, 1  ;;  %v7951_v45 = vpop.f32.mrb[55].mxu0  ;;  %v1743_v1 = vadd.f32 %v7893_v8, %v9961_v14  ;;  %v9963_v14 = vld [vmem:[#allocation62_spill] sm:$0xff] }
 0x1fb   : > { %v7944_v13 = vpop.permute.xlu1 %2255 }
 0x1fc   : > { %9959 = vst [vmem:[#allocation50_spill] sm:$0xff] %v7944_v13  ;;  %2951 = vperm.xlu1 %6723, %v7556_v59   ;;  %v922_v23 = vadd.f32 %v921_v57, %v920_v27  ;;  %v6095_v57 = vld [vmem:[%s6822_s8 + $0x4e8] sm:$0xff]  ;;  %v1791_v13 = vmax.f32 %v1743_v1, 0.0 }
 0x1fd   : > { %1805 = vxpose.xlu0.b32.cont [4/16] %v1789_v49, 128  ;;  %v7953_v48 = vpop.trf.xlu0  ;;  %v3386_v49 = vpack.c.bf16 %v6095_v57, %v6094_v54 }
 0x1fe   : > { %v925_v59 = vadd.f32 %v922_v23, %v7769_v11  ;;  %v6096_v23 = vld [vmem:[%s6822_s8 + $0x4f0] sm:$0xff] }
 0x1ff   : > { %v7955_v55 = vpop.permute.xlu1 %2260  ;;  %6586 = vmatprep.mubr.msk.bf16.mxu1 %vm268_vm1, %v3386_v49 }
 0x200   : > { %9960 = vst [vmem:[#allocation20_spill] sm:$0xff] %v7955_v55  ;;  %2956 = vperm.xlu1 %6723, %v7572_v63   ;;  %926 = vst [vmem:[%s7778_s4 + $0x1] sm:$0x1] %v925_v59  ;;  %v3775_v63 = vsel %vm293_vm0, %v6735_v33, 0  ;;  %v6097_v59 = vld [vmem:[%s6822_s8 + $0x4f8] sm:$0xff]  ;;  %v1748_v55 = vadd.f32 %v9963_v14, %v7893_v8  ;;  %v9965_v33 = vld [vmem:[#allocation65_spill] sm:$0xff] }
 0x201   : > { %1806 = vxpose.xlu0.b32.cont [5/16] %v1790_v56, 128  ;;  %v7965_v27 = vpop.trf.xlu0  ;;  %6591 = vmatpush3.bf16.msra.mxu0 %v3775_v63  ;;  %v3387_v56 = vpack.c.bf16 %v6097_v59, %v6096_v23  ;;  %v1751_v54 = vadd.f32 %v9965_v33, %v7893_v8  ;;  %v9966_v14 = vld [vmem:[#allocation72_spill] sm:$0xff]  ;;  %v9969_v33 = vld [vmem:[#allocation74_spill] sm:$0xff] }
 0x202   : > { %v1756_v1 = vadd.f32 %v7893_v8, %v9966_v14  ;;  %v8011_v14 = vld [vmem:[%s9826_s3 + $0x8] sm:$0xff] }
 0x203   : > { %v7967_v12 = vpop.permute.xlu1 %2265  ;;  %6587 = vmatmul.mubr.msk.bf16.gmra.mrb[76].mxu1 %vm268_vm1, %v3387_v56  ;;  %v1793_v23 = vmax.f32 %v1751_v54, 0.0  ;;  %v1759_v54 = vadd.f32 %v7893_v8, %v9969_v33  ;;  %v1236_v33 = vmul.f32 %v9973_v19, %v7942_v46  ;;  %v1238_v46 = vmul.f32 %v9977_v3, %v7965_v27 }
 0x204   : > { %9962 = vst [vmem:[#allocation21_spill] sm:$0xff] %v7967_v12  ;;  %2961 = vperm.xlu1 %6723, %v7588_v28   ;;  %v1792_v28 = vmax.f32 %v1748_v55, 0.0  ;;  %v1794_v56 = vmax.f32 %v1756_v1, 0.0 }
 0x205   : > { %1807 = vxpose.xlu0.b32.cont [6/16] %v1791_v13, 128  ;;  %v1127_v12 = vpop.trf.xlu0  ;;  %v7985_v57 = vpop.f32.mrb[56].mxu0 }
 0x206   : > { %v7992_v13 = vpop.f32.mrb[57].mxu0 }
 0x207   : > { %v7979_v42 = vpop.permute.xlu1 %2270  ;;  %v7999_v55 = vpop.f32.mrb[58].mxu0 }
 0x208   : > { %9964 = vst [vmem:[#allocation46_spill] sm:$0xff] %v7979_v42  ;;  %2966 = vperm.xlu1 %6723, %v7609_v61   ;;  %v7997_v61 = vld [vmem:[%s9826_s3] sm:$0xff]  ;;  %v8001_v59 = vpop.f32.mrb[59].mxu0 }
 0x209   : > { %1808 = vxpose.xlu0.b32.cont [7/16] %v1792_v28, 128  ;;  %v1128_v63 = vpop.trf.xlu0 }
 0x20b   : > { %v7989_v49 = vpop.permute.xlu1 %2275 }
 0x20c   : > { %9967 = vst [vmem:[#allocation22_spill] sm:$0xff] %v7989_v49  ;;  %2971 = vperm.xlu1 %6723, %v7621_v39   ;;  %v9970_v49 = vld [vmem:[#allocation28_spill] sm:$0xff] }
 0x20d   : > { %1809 = vxpose.xlu0.b32.cont [8/16] %v1793_v23, 128  ;;  %v1129_v28 = vpop.trf.xlu0  ;;  %v1235_v42 = vmul.f32 %v9970_v49, %v7930_v26  ;;  %v1764_v26 = vadd.f32 %v9974_v9, %v7893_v8  ;;  %v1795_v49 = vmax.f32 %v1759_v54, 0.0 }
 0x20f   : > { %v8003_v39 = vpop.permute.xlu1 %2548  ;;  %v1796_v54 = vmax.f32 %v1764_v26, 0.0  ;;  %v9982_v26 = vld [vmem:[#allocation33_spill] sm:$0xff] }
 0x210   : > { %9968 = vst [vmem:[#allocation23_spill] sm:$0xff] %v8003_v39  ;;  %3244 = vperm.xlu1 %6723, %v7997_v61   ;;  %v9972_v39 = vld [vmem:[#allocation27_spill] sm:$0xff] }
 0x211   : > { %1810 = vxpose.xlu0.b32.cont [9/16] %v1794_v56, 128  ;;  %v1130_v1 = vpop.trf.xlu0  ;;  %v1234_v2 = vmul.f32 %v9972_v39, %v7918_v51  ;;  %v8031_v56 = vld [vmem:[%s9826_s3 + $0x10] sm:$0xff]  ;;  %v9975_v51 = vld [vmem:[#allocation30_spill] sm:$0xff] }
 0x212   : > { %v1237_v39 = vmul.f32 %v9975_v51, %v7953_v48  ;;  %v1240_v51 = vmul.f32 %v9982_v26, %v1128_v63  ;;  %v9987_v26 = vld [vmem:[#allocation35_spill] sm:$0xff] }
 0x213   : > { %v8015_v23 = vpop.permute.xlu1 %2553  ;;  %v1250_v21 = vadd.f32 %v1235_v42, %v1234_v2  ;;  %v9979_v42 = vld [vmem:[#allocation32_spill] sm:$0xff] }
 0x214   : > { %9971 = vst [vmem:[#allocation49_spill] sm:$0xff] %v8015_v23  ;;  %3249 = vperm.xlu1 %6723, %v8011_v14   ;;  %v3729_v23 = vpack.c.bf16 %v6111_v31, %v6110_v50  ;;  %v9978_v31 = vld [vmem:[#allocation73_spill] sm:$0xff]  ;;  %v1239_v48 = vmul.f32 %v9979_v42, %v1127_v12  ;;  %v8063_v12 = vld [vmem:[%s9826_s3 + $0x20] sm:$0xff] }
 0x215   : > { %1811 = vxpose.xlu0.b32.cont [10/16] %v1795_v49, 128  ;;  %v1131_v19 = vpop.trf.xlu0  ;;  %v1251_v9 = vadd.f32 %v1250_v21, %v1236_v33  ;;  %v1767_v50 = vadd.f32 %v9978_v31, %v7893_v8  ;;  %v1772_v21 = vadd.f32 %v7893_v8, %v7676_v43 }
 0x216   : > { %6593 = vmatmul.mubr.msk.bf16.vlgmr.msra.gmra.mrb[80].mxu0 %vm268_vm1, %v3729_v23  ;;  %v8050_v49 = vpop.f32.mrb[60].mxu0 }
 0x217   : > { %v8036_v60 = vpop.permute.xlu1 %2558  ;;  %v1252_v2 = vadd.f32 %v1251_v9, %v1237_v39  ;;  %9980 = vst [vmem:[#allocation56_spill] sm:$0xff] %v8050_v49  ;;  %v8058_v3 = vpop.f32.mrb[61].mxu0  ;;  %v1797_v31 = vmax.f32 %v1767_v50, 0.0  ;;  %v9984_v9 = vld [vmem:[#allocation34_spill] sm:$0xff]  ;;  %v1798_v63 = vmax.f32 %v1772_v21, 0.0 }
 0x218   : > { %9976 = vst [vmem:[#allocation24_spill] sm:$0xff] %v8036_v60  ;;  %3254 = vperm.xlu1 %6723, %v8031_v56   ;;  %v8065_v39 = vpop.f32.mrb[62].mxu0  ;;  %v6115_v49 = vld [vmem:[%s6822_s8 + $0x538] sm:$0xff] }
 0x219   : > { %1812 = vxpose.xlu0.b32.cont [11/16] %v1796_v54, 128  ;;  %v1132_v27 = vpop.trf.xlu0  ;;  %v1253_v33 = vadd.f32 %v1252_v2, %v1238_v46  ;;  %9983 = vst [vmem:[#allocation26_spill] sm:$0xff] %v8065_v39  ;;  %v1241_v54 = vmul.f32 %v9984_v9, %v1129_v28  ;;  %v8068_v42 = vpop.f32.mrb[63].mxu0  ;;  %v8079_v28 = vld [vmem:[%s9826_s3 + $0x28] sm:$0xff]  ;;  %v6114_v39 = vld [vmem:[%s6822_s8 + $0x530] sm:$0xff] }
 0x21a   : > { %9985 = vst [vmem:[#allocation58_spill] sm:$0xff] %v8068_v42  ;;  %v1780_v42 = vadd.f32 %v7668_v58, %v7893_v8  ;;  %v9993_v58 = vld [vmem:[#allocation39_spill] sm:$0xff] }
 0x21b   : > { %v8054_v23 = vpop.permute.xlu1 %2563  ;;  %v1254_v43 = vadd.f32 %v1253_v33, %v1239_v48  ;;  %v1775_v48 = vadd.f32 %v7893_v8, %v7681_v62  ;;  %v9988_v33 = vld [vmem:[#allocation36_spill] sm:$0xff] }
 0x21c   : > { %9981 = vst [vmem:[#allocation25_spill] sm:$0xff] %v8054_v23  ;;  %3259 = vperm.xlu1 %6723, %v8047_v25   ;;  %v1242_v23 = vmul.f32 %v9987_v26, %v1130_v1  ;;  %v6113_v1 = vld [vmem:[%s6822_s8 + $0x528] sm:$0xff] }
 0x21d   : > { %1813 = vxpose.xlu0.b32.cont [12/16] %v1797_v31, 128  ;;  %v1133_v46 = vpop.trf.xlu0  ;;  %v1255_v50 = vadd.f32 %v1254_v43, %v1240_v51  ;;  %v1243_v31 = vmul.f32 %v9988_v33, %v1131_v19  ;;  %v6112_v43 = vld [vmem:[%s6822_s8 + $0x520] sm:$0xff]  ;;  %v8095_v19 = vld [vmem:[%s9826_s3 + $0x30] sm:$0xff]  ;;  %v9991_v33 = vld [vmem:[#allocation38_spill] sm:$0xff] }
 0x21e   : > { %v3730_v62 = vpack.c.bf16 %v6113_v1, %v6112_v43  ;;  %v1800_v43 = vmax.f32 %v1780_v42, 0.0 }
 0x21f   : > { %v8070_v2 = vpop.permute.xlu1 %2568  ;;  %v1256_v21 = vadd.f32 %v1255_v50, %v1241_v54  ;;  %v1799_v54 = vmax.f32 %v1775_v48, 0.0 }
 0x220   : > { %9986 = vst [vmem:[#allocation54_spill] sm:$0xff] %v8070_v2  ;;  %3264 = vperm.xlu1 %6723, %v8063_v12   ;;  %v9990_v2 = vld [vmem:[#allocation37_spill] sm:$0xff]  ;;  %6596 = vmatprep.mubr.msk.bf16.mxu0 %vm268_vm1, %v3730_v62 }
 0x221   : > { %1814 = vxpose.xlu0.b32.cont [13/16] %v1798_v63, 128  ;;  %v1134_v9 = vpop.trf.xlu0  ;;  %v1257_v26 = vadd.f32 %v1256_v21, %v1242_v23  ;;  %v1244_v60 = vmul.f32 %v9990_v2, %v1132_v27  ;;  %v3731_v63 = vpack.c.bf16 %v6115_v49, %v6114_v39  ;;  %v1245_v23 = vmul.f32 %v9991_v33, %v1133_v46  ;;  %v8109_v39 = vld [vmem:[%s9826_s3 + $0x38] sm:$0xff]  ;;  %v8125_v33 = vld [vmem:[%s9826_s3 + $0x40] sm:$0xff] }
 0x222   : > { %v1246_v48 = vmul.f32 %v9993_v58, %v1134_v9  ;;  %v1783_v49 = vadd.f32 %v7678_v29, %v7893_v8 }
 0x223   : > { %v8082_v51 = vpop.permute.xlu1 %2573  ;;  %v1258_v50 = vadd.f32 %v1257_v26, %v1243_v31  ;;  %6597 = vmatmul.mubr.msk.bf16.gmra.mrb[84].mxu0 %vm268_vm1, %v3731_v63  ;;  %v9994_v31 = vld [vmem:[#allocation40_spill] sm:$0xff]  ;;  %v8112_v26 = vpop.f32.mrb[48].mxu1 }
 0x224   : > { %9989 = vst [vmem:[#allocation57_spill] sm:$0xff] %v8082_v51  ;;  %3269 = vperm.xlu1 %6723, %v8079_v28   ;;  %9995 = vst [vmem:[#allocation66_spill] sm:$0xff] %v8112_v26  ;;  %v8120_v63 = vpop.f32.mrb[49].mxu1  ;;  %v6122_v51 = vld [vmem:[%s6822_s8 + $0x570] sm:$0xff] }
 0x225   : > { %1815 = vxpose.xlu0.b32.cont [14/16] %v1799_v54, 128  ;;  %v1135_v27 = vpop.trf.xlu0  ;;  %v1259_v21 = vadd.f32 %v1258_v50, %v1244_v60  ;;  %v2072_v60 = vadd.f32 %v7893_v8, %v7718_v40  ;;  %v9997_v54 = vld [vmem:[#allocation41_spill] sm:$0xff]  ;;  %9998 = vst [vmem:[#allocation65_spill] sm:$0xff] %v8120_v63  ;;  %v1801_v50 = vmax.f32 %v1783_v49, 0.0  ;;  %v10002_v49 = vld [vmem:[#allocation42_spill] sm:$0xff] }
 0x226   : > { %v1247_v1 = vmul.f32 %v9994_v31, %v1135_v27  ;;  %v2075_v31 = vadd.f32 %v7893_v8, %v7722_v37  ;;  %v2080_v37 = vadd.f32 %v7710_v5, %v7893_v8  ;;  %v6136_v26 = vld [vmem:[%s6822_s8 + $0x590] sm:$0xff] }
 0x227   : > { %v8099_v2 = vpop.permute.xlu1 %2578  ;;  %v1260_v46 = vadd.f32 %v1259_v21, %v1245_v23  ;;  %v8127_v23 = vpop.f32.mrb[50].mxu1  ;;  %v2134_v21 = vmax.f32 %v2072_v60, 0.0 }
 0x228   : > { %9992 = vst [vmem:[#allocation64_spill] sm:$0xff] %v8099_v2  ;;  %3274 = vperm.xlu1 %6723, %v8095_v19   ;;  %9999 = vst [vmem:[#allocation72_spill] sm:$0xff] %v8127_v23  ;;  %v8129_v27 = vpop.f32.mrb[51].mxu1  ;;  %v2136_v5 = vmax.f32 %v2080_v37, 0.0  ;;  %v2091_v2 = vadd.f32 %v7893_v8, %v7773_v53 }
 0x229   : > { %1816 = vxpose.xlu0.b32.cont [15/16] %v1800_v43, 128  ;;  %v1136_v9 = vpop.trf.xlu0  ;;  %v1261_v42 = vadd.f32 %v1260_v46, %v1246_v48  ;;  %10000 = vst [vmem:[#allocation74_spill] sm:$0xff] %v8129_v27 }
 0x22a   : > { %v1248_v29 = vmul.f32 %v9997_v54, %v1136_v9  ;;  %v6116_v54 = vld [vmem:[%s6822_s8 + $0x540] sm:$0xff] }
 0x22b   : > { %v8116_v62 = vpop.permute.xlu1 %2583  ;;  %v1262_v40 = vadd.f32 %v1261_v42, %v1247_v1  ;;  %v8140_v1 = vld [vmem:[%s9826_s3 + $0x48] sm:$0xff] }
 0x22c   : > { %9996 = vst [vmem:[#allocation62_spill] sm:$0xff] %v8116_v62  ;;  %3279 = vperm.xlu1 %6723, %v8109_v39  }
 0x22d   : > { %1817 = vxpose.xlu0.b32.end [16/16] %v1801_v50, 128  ;;  %v1137_v58 = vpop.trf.xlu0  ;;  %v1263_v43 = vadd.f32 %v1262_v40, %v1248_v29  ;;  %v6117_v29 = vld [vmem:[%s6822_s8 + $0x548] sm:$0xff] }
 0x22e   : > { %v1249_v46 = vmul.f32 %v10002_v49, %v1137_v58  ;;  %v3732_v40 = vpack.c.bf16 %v6117_v29, %v6116_v54  ;;  %v6118_v58 = vld [vmem:[%s6822_s8 + $0x550] sm:$0xff]  ;;  %v6119_v49 = vld [vmem:[%s6822_s8 + $0x558] sm:$0xff] }
 0x22f   : > { %v8131_v48 = vpop.permute.xlu1 %2588 }
 0x230   : > { %10001 = vst [vmem:[#allocation28_spill] sm:$0xff] %v8131_v48  ;;  %3284 = vperm.xlu1 %6723, %v8125_v33   ;;  %v1264_v60 = vadd.f32 %v1263_v43, %v1249_v46  ;;  %v2135_v48 = vmax.f32 %v2075_v31, 0.0  ;;  %v3733_v43 = vpack.c.bf16 %v6119_v49, %v6118_v58  ;;  %6600 = vmatprep.mubr.msk.bf16.mxu0 %vm268_vm1, %v3732_v40 }
 0x231   : > { %2150 = vxpose.xlu0.b32.start [1/16] %v2134_v21, 128  ;;  %v8142_v9 = vpop.trf.xlu0  ;;  %v8156_v21 = vld [vmem:[%s9826_s3 + $0x50] sm:$0xff]  ;;  %v2083_v31 = vadd.f32 %v7720_v44, %v7893_v8 }
 0x232   : > { %v1265_v50 = vrot.slane %v1264_v60, 4  ;;  %6601 = vmatmul.mubr.msk.bf16.gmra.mrb[88].mxu0 %vm268_vm1, %v3733_v43  ;;  %v8186_v43 = vld [vmem:[%s9826_s3 + $0x60] sm:$0xff] }
 0x233   : > { %v8144_v42 = vpop.permute.xlu1 %2593  ;;  %v2137_v37 = vmax.f32 %v2083_v31, 0.0 }
 0x234   : > { %10003 = vst [vmem:[#allocation27_spill] sm:$0xff] %v8144_v42  ;;  %3289 = vperm.xlu1 %6723, %v8140_v1   ;;  %v1266_v46 = vadd.f32 %v1265_v50, %v1264_v60  ;;  %v8170_v60 = vld [vmem:[%s9826_s3 + $0x58] sm:$0xff]  ;;  %v2088_v50 = vadd.f32 %v7893_v8, %v7767_v34 }
 0x235   : > { %2151 = vxpose.xlu0.b32.cont [2/16] %v2135_v48, 128  ;;  %v8159_v42 = vpop.trf.xlu0 }
 0x236   : > { %v1267_v54 = vrot.slane %v1266_v46, 2  ;;  %v8172_v48 = vpop.f32.mrb[52].mxu1 }
 0x237   : > { %v8161_v62 = vpop.permute.xlu1 %2598  ;;  %10005 = vst [vmem:[#allocation70_spill] sm:$0xff] %v8172_v48  ;;  %v8181_v44 = vpop.f32.mrb[53].mxu1  ;;  %v2139_v48 = vmax.f32 %v2091_v2, 0.0  ;;  %v8237_v2 = vld [vmem:[%s9826_s3 + $0x78] sm:$0xff] }
 0x238   : > { %10004 = vst [vmem:[#allocation29_spill] sm:$0xff] %v8161_v62  ;;  %3294 = vperm.xlu1 %6723, %v8156_v21   ;;  %v1268_v29 = vadd.f32 %v1267_v54, %v1266_v46  ;;  %10007 = vst [vmem:[#allocation31_spill] sm:$0xff] %v8181_v44  ;;  %v8188_v46 = vpop.f32.mrb[54].mxu1 }
 0x239   : > { %2152 = vxpose.xlu0.b32.cont [3/16] %v2136_v5, 128  ;;  %v8176_v40 = vpop.trf.xlu0  ;;  %10008 = vst [vmem:[#allocation73_spill] sm:$0xff] %v8188_v46  ;;  %v8190_v54 = vpop.f32.mrb[55].mxu1  ;;  %v2138_v5 = vmax.f32 %v2088_v50, 0.0  ;;  %v6736_v50 = vld [vmem:[%s9824_s1] sm:$0x1f]   ;;  %v2096_v46 = vadd.f32 %v7758_v10, %v7893_v8  ;;  %v2099_v10 = vadd.f32 %v7771_v41, %v7893_v8 }
 0x23a   : > { %v1269_v49 = vrot.slane %v1268_v29, 1  ;;  %10009 = vst [vmem:[#allocation32_spill] sm:$0xff] %v8190_v54  ;;  %6709 = vmatprep.subr.msk.bf16.mxu1 %vm293_vm0, %v6736_v50  ;;  %v4123_v53 = vsel %vm293_vm0, %v6736_v50, 0 }
 0x23b   : > { %v8178_v58 = vpop.permute.xlu1 %2603  ;;  %6609 = vmatpush3.bf16.msra.mxu1 %v4123_v53  ;;  %v2140_v50 = vmax.f32 %v2096_v46, 0.0  ;;  %v2141_v41 = vmax.f32 %v2099_v10, 0.0 }
 0x23c   : > { %10006 = vst [vmem:[#allocation30_spill] sm:$0xff] %v8178_v58  ;;  %3299 = vperm.xlu1 %6723, %v8170_v60   ;;  %v1270_v34 = vadd.f32 %v1269_v49, %v1268_v29  ;;  %v8203_v29 = vld [vmem:[%s9826_s3 + $0x68] sm:$0xff] }
 0x23d   : > { %2153 = vxpose.xlu0.b32.cont [4/16] %v2137_v37, 128  ;;  %v8192_v58 = vpop.trf.xlu0  ;;  %v6120_v37 = vld [vmem:[%s6822_s8 + $0x560] sm:$0xff] }
 0x23e   : > { %v1273_v31 = vadd.f32 %v1270_v34, %v7769_v11  ;;  %v6121_v34 = vld [vmem:[%s6822_s8 + $0x568] sm:$0xff] }
 0x23f   : > { %v8194_v62 = vpop.permute.xlu1 %2608 }
 0x240   : > { %10010 = vst [vmem:[#allocation33_spill] sm:$0xff] %v8194_v62  ;;  %3304 = vperm.xlu1 %6723, %v8186_v43   ;;  %1274 = vst [vmem:[%s7778_s4 + $0x2] sm:$0x1] %v1273_v31  ;;  %v3734_v62 = vpack.c.bf16 %v6121_v34, %v6120_v37  ;;  %v6123_v31 = vld [vmem:[%s6822_s8 + $0x578] sm:$0xff] }
 0x241   : > { %2154 = vxpose.xlu0.b32.cont [5/16] %v2138_v5, 128  ;;  %v8209_v49 = vpop.trf.xlu0  ;;  %v8225_v5 = vld [vmem:[%s9826_s3 + $0x70] sm:$0xff] }
 0x242   : > { %6604 = vmatprep.mubr.msk.bf16.mxu0 %vm268_vm1, %v3734_v62  ;;  %v2104_v62 = vadd.f32 %v7893_v8, %v7815_v20 }
 0x243   : > { %v8211_v11 = vpop.permute.xlu1 %2613 }
 0x244   : > { %10011 = vst [vmem:[#allocation34_spill] sm:$0xff] %v8211_v11  ;;  %3309 = vperm.xlu1 %6723, %v8203_v29   ;;  %v3735_v11 = vpack.c.bf16 %v6123_v31, %v6122_v51  ;;  %v2142_v53 = vmax.f32 %v2104_v62, 0.0  ;;  %v6135_v62 = vld [vmem:[%s6822_s8 + $0x588] sm:$0xff] }
 0x245   : > { %2155 = vxpose.xlu0.b32.cont [6/16] %v2139_v48, 128  ;;  %v1475_v54 = vpop.trf.xlu0 }
 0x246   : > { %6605 = vmatmul.mubr.msk.bf16.gmra.mrb[92].mxu0 %vm268_vm1, %v3735_v11  ;;  %v8239_v51 = vpop.f32.mrb[56].mxu1 }
 0x247   : > { %v8228_v44 = vpop.permute.xlu1 %2618  ;;  %10013 = vst [vmem:[#allocation36_spill] sm:$0xff] %v8239_v51  ;;  %v8246_v46 = vpop.f32.mrb[57].mxu1  ;;  %v6134_v51 = vld [vmem:[%s6822_s8 + $0x580] sm:$0xff] }
 0x248   : > { %10012 = vst [vmem:[#allocation35_spill] sm:$0xff] %v8228_v44  ;;  %3314 = vperm.xlu1 %6723, %v8225_v5   ;;  %10015 = vst [vmem:[#allocation38_spill] sm:$0xff] %v8246_v46  ;;  %v8248_v11 = vpop.f32.mrb[58].mxu1  ;;  %v10022_v46 = vld [vmem:[#allocation45_spill] sm:$0xff]  ;;  %v4076_v23 = vpack.c.bf16 %v6135_v62, %v6134_v51  ;;  %v10024_v51 = vld [vmem:[#allocation51_spill] sm:$0xff] }
 0x249   : > { %2156 = vxpose.xlu0.b32.cont [7/16] %v2140_v50, 128  ;;  %v1476_v48 = vpop.trf.xlu0  ;;  %10016 = vst [vmem:[#allocation39_spill] sm:$0xff] %v8248_v11  ;;  %v8250_v34 = vpop.f32.mrb[59].mxu1  ;;  %v2107_v50 = vadd.f32 %v7893_v8, %v7819_v38  ;;  %v6137_v38 = vld [vmem:[%s6822_s8 + $0x598] sm:$0xff] }
 0x24a   : > { %10017 = vst [vmem:[#allocation40_spill] sm:$0xff] %v8250_v34  ;;  %6610 = vmatprep.mubr.msk.bf16.mxu1 %vm268_vm1, %v4076_v23 }
 0x24b   : > { %v8243_v37 = vpop.permute.xlu1 %2623 }
 0x24c   : > { %10014 = vst [vmem:[#allocation37_spill] sm:$0xff] %v8243_v37  ;;  %3319 = vperm.xlu1 %6723, %v8237_v2   ;;  %v10019_v37 = vld [vmem:[#allocation44_spill] sm:$0xff] }
 0x24d   : > { %2157 = vxpose.xlu0.b32.cont [8/16] %v2141_v41, 128  ;;  %v1477_v20 = vpop.trf.xlu0  ;;  %v1583_v44 = vmul.f32 %v10019_v37, %v8159_v42  ;;  %v10021_v41 = vld [vmem:[#allocation43_spill] sm:$0xff]  ;;  %v2112_v42 = vadd.f32 %v7808_v24, %v7893_v8  ;;  %v2143_v37 = vmax.f32 %v2107_v50, 0.0 }
 0x24e   : > { %v1582_v34 = vmul.f32 %v10021_v41, %v8142_v9 }
 0x24f   : > { %v8252_v31 = vpop.permute.xlu1 %2896  ;;  %v2144_v24 = vmax.f32 %v2112_v42, 0.0  ;;  %v10027_v42 = vld [vmem:[#allocation55_spill] sm:$0xff] }
 0x250   : > { %10018 = vst [vmem:[#allocation41_spill] sm:$0xff] %v8252_v31  ;;  %3592 = vperm.xlu1 %6723, %v7997_v61   ;;  %v1584_v31 = vmul.f32 %v10022_v46, %v8176_v40  ;;  %v1598_v27 = vadd.f32 %v1583_v44, %v1582_v34  ;;  %v1586_v46 = vmul.f32 %v10024_v51, %v8209_v49  ;;  %v10026_v49 = vld [vmem:[#allocation53_spill] sm:$0xff] }
 0x251   : > { %2158 = vxpose.xlu0.b32.cont [9/16] %v2142_v53, 128  ;;  %v1478_v10 = vpop.trf.xlu0  ;;  %v4077_v53 = vpack.c.bf16 %v6137_v38, %v6136_v26  ;;  %v2115_v26 = vadd.f32 %v7817_v7, %v7893_v8  ;;  %v2120_v34 = vadd.f32 %v7893_v8, %v7859_v18  ;;  %v1588_v62 = vmul.f32 %v10026_v49, %v1476_v48  ;;  %v6139_v49 = vld [vmem:[%s6822_s8 + $0x5a8] sm:$0xff] }
 0x252   : > { %v1599_v40 = vadd.f32 %v1598_v27, %v1584_v31 }
 0x253   : > { %v8259_v11 = vpop.permute.xlu1 %2901  ;;  %6611 = vmatmul.mubr.msk.bf16.vlgmr.msra.gmra.mrb[80].mxu1 %vm268_vm1, %v4077_v53  ;;  %v2145_v7 = vmax.f32 %v2115_v26, 0.0  ;;  %v2146_v53 = vmax.f32 %v2120_v34, 0.0  ;;  %v2123_v26 = vadd.f32 %v7893_v8, %v7864_v52  ;;  %v2128_v52 = vadd.f32 %v7851_v4, %v7893_v8 }
 0x254   : > { %10020 = vst [vmem:[#allocation42_spill] sm:$0xff] %v8259_v11  ;;  %3597 = vperm.xlu1 %6723, %v8011_v14   ;;  %v10023_v11 = vld [vmem:[#allocation47_spill] sm:$0xff]  ;;  %v2131_v4 = vadd.f32 %v7861_v36, %v7893_v8 }
 0x255   : > { %v1585_v63 = vmul.f32 %v10023_v11, %v8192_v58  ;;  %2159 = vxpose.xlu0.b32.cont [10/16] %v2143_v37, 128  ;;  %v1479_v9 = vpop.trf.xlu0  ;;  %v10025_v58 = vld [vmem:[#allocation52_spill] sm:$0xff]  ;;  %v1589_v37 = vmul.f32 %v10027_v42, %v1477_v20  ;;  %v10031_v42 = vld [vmem:[#allocation61_spill] sm:$0xff] }
 0x256   : > { %v1587_v11 = vmul.f32 %v10025_v58, %v1475_v54  ;;  %v10029_v20 = vld [vmem:[#allocation60_spill] sm:$0xff]  ;;  %v2149_v36 = vmax.f32 %v2131_v4, 0.0 }
 0x257   : > { %v8275_v41 = vpop.permute.xlu1 %2906  ;;  %v1600_v44 = vadd.f32 %v1599_v40, %v1585_v63  ;;  %v1591_v58 = vmul.f32 %v10029_v20, %v1479_v9 }
 0x258   : > { %3602 = vperm.xlu1 %6723, %v8031_v56  }
 0x259   : > { %v8284_v23 = vpop.f32.mrb[60].mxu1  ;;  %2160 = vxpose.xlu0.b32.cont [11/16] %v2144_v24, 128  ;;  %v1480_v50 = vpop.trf.xlu0  ;;  %v1601_v31 = vadd.f32 %v1600_v44, %v1586_v46  ;;  %v10028_v46 = vld [vmem:[#allocation59_spill] sm:$0xff] }
 0x25a   : > { %v8292_v38 = vpop.f32.mrb[61].mxu1  ;;  %v1590_v24 = vmul.f32 %v10028_v46, %v1478_v10  ;;  %v6141_v46 = vld [vmem:[%s6822_s8 + $0x5b8] sm:$0xff] }
 0x25b   : > { %v8288_v27 = vpop.permute.xlu1 %2911  ;;  %v8294_v63 = vpop.f32.mrb[62].mxu1  ;;  %v1602_v54 = vadd.f32 %v1601_v31, %v1587_v11  ;;  %v6138_v31 = vld [vmem:[%s6822_s8 + $0x5a0] sm:$0xff] }
 0x25c   : > { %3607 = vperm.xlu1 %6723, %v8047_v25   ;;  %v8297_v18 = vpop.f32.mrb[63].mxu1  ;;  %v4078_v10 = vpack.c.bf16 %v6139_v49, %v6138_v31  ;;  %v2148_v49 = vmax.f32 %v2128_v52, 0.0 }
 0x25d   : > { %2161 = vxpose.xlu0.b32.cont [12/16] %v2145_v7, 128  ;;  %v1481_v40 = vpop.trf.xlu0  ;;  %v1603_v48 = vadd.f32 %v1602_v54, %v1588_v62  ;;  %v1592_v62 = vmul.f32 %v10031_v42, %v1480_v50  ;;  %v6140_v54 = vld [vmem:[%s6822_s8 + $0x5b0] sm:$0xff]  ;;  %v2420_v42 = vadd.f32 %v7893_v8, %v7906_v35 }
 0x25e   : > { %6614 = vmatprep.mubr.msk.bf16.mxu1 %vm268_vm1, %v4078_v10 }
 0x25f   : > { %v8299_v51 = vpop.permute.xlu1 %2916  ;;  %v1604_v44 = vadd.f32 %v1603_v48, %v1589_v37  ;;  %v2147_v37 = vmax.f32 %v2123_v26, 0.0  ;;  %v4079_v48 = vpack.c.bf16 %v6141_v46, %v6140_v54  ;;  %v2482_v35 = vmax.f32 %v2420_v42, 0.0 }
 0x260   : > { %3612 = vperm.xlu1 %6723, %v8063_v12  }
 0x261   : > { %2162 = vxpose.xlu0.b32.cont [13/16] %v2146_v53, 128  ;;  %v1482_v11 = vpop.trf.xlu0  ;;  %v1605_v7 = vadd.f32 %v1604_v44, %v1590_v24  ;;  %v10032_v53 = vld [vmem:[#allocation63_spill] sm:$0xff]  ;;  %6615 = vmatmul.mubr.msk.bf16.gmra.mrb[84].mxu1 %vm268_vm1, %v4079_v48 }
 0x262   : > { %v1593_v20 = vmul.f32 %v10032_v53, %v1481_v40  ;;  %v10034_v44 = vld [vmem:[#allocation67_spill] sm:$0xff] }
 0x263   : > { %v8306_v34 = vpop.permute.xlu1 %2921  ;;  %v1606_v9 = vadd.f32 %v1605_v7, %v1591_v58  ;;  %v1594_v31 = vmul.f32 %v10034_v44, %v1482_v11  ;;  %v10035_v58 = vld [vmem:[#allocation68_spill] sm:$0xff]  ;;  %v10037_v11 = vld [vmem:[#allocation69_spill] sm:$0xff] }
 0x264   : > { %10030 = vst [vmem:[#allocation44_spill] sm:$0xff] %v8306_v34  ;;  %3617 = vperm.xlu1 %6723, %v8079_v28  }
 0x265   : > { %2163 = vxpose.xlu0.b32.cont [14/16] %v2147_v37, 128  ;;  %v1483_v34 = vpop.trf.xlu0  ;;  %v1607_v50 = vadd.f32 %v1606_v9, %v1592_v62 }
 0x266   : > { %v1595_v40 = vmul.f32 %v10035_v58, %v1483_v34  ;;  %v8326_v7 = vpop.f32.mrb[64].mxu0  ;;  %v6142_v58 = vld [vmem:[%s6822_s8 + $0x5c0] sm:$0xff] }
 0x267   : > { %v8318_v24 = vpop.permute.xlu1 %2926  ;;  %v1608_v26 = vadd.f32 %v1607_v50, %v1593_v20  ;;  %v8334_v52 = vpop.f32.mrb[65].mxu0  ;;  %v10039_v50 = vld [vmem:[#allocation71_spill] sm:$0xff] }
 0x268   : > { %10033 = vst [vmem:[#allocation43_spill] sm:$0xff] %v8318_v24  ;;  %3622 = vperm.xlu1 %6723, %v8095_v19   ;;  %v8336_v37 = vpop.f32.mrb[66].mxu0  ;;  %v6162_v24 = vld [vmem:[%s6822_s8 + $0x610] sm:$0xff] }
 0x269   : > { %2164 = vxpose.xlu0.b32.cont [15/16] %v2148_v49, 128  ;;  %v1484_v10 = vpop.trf.xlu0  ;;  %v1609_v62 = vadd.f32 %v1608_v26, %v1594_v31  ;;  %v8338_v48 = vpop.f32.mrb[67].mxu0  ;;  %v2423_v31 = vadd.f32 %v7893_v8, %v7910_v17 }
 0x26a   : > { %v1596_v46 = vmul.f32 %v10037_v11, %v1484_v10  ;;  %v6145_v11 = vld [vmem:[%s6822_s8 + $0x5d8] sm:$0xff] }
 0x26b   : > { %v8330_v54 = vpop.permute.xlu1 %2931  ;;  %v1610_v34 = vadd.f32 %v1609_v62, %v1595_v40  ;;  %v6143_v40 = vld [vmem:[%s6822_s8 + $0x5c8] sm:$0xff]  ;;  %v6144_v62 = vld [vmem:[%s6822_s8 + $0x5d0] sm:$0xff] }
 0x26c   : > { %10036 = vst [vmem:[#allocation45_spill] sm:$0xff] %v8330_v54  ;;  %3627 = vperm.xlu1 %6723, %v8109_v39   ;;  %v4080_v10 = vpack.c.bf16 %v6143_v40, %v6142_v58  ;;  %v4081_v17 = vpack.c.bf16 %v6145_v11, %v6144_v62  ;;  %v8377_v11 = vstv %s1619_s17 }
 0x26d   : > { %2165 = vxpose.xlu0.b32.end [16/16] %v2149_v36, 128  ;;  %v1485_v9 = vpop.trf.xlu0  ;;  %v1611_v20 = vadd.f32 %v1610_v34, %v1596_v46  ;;  %v2428_v46 = vadd.f32 %v7898_v0, %v7893_v8  ;;  %v2483_v36 = vmax.f32 %v2423_v31, 0.0  ;;  %v2431_v0 = vadd.f32 %v7908_v16, %v7893_v8 }
 0x26e   : > { %v1597_v44 = vmul.f32 %v10039_v50, %v1485_v9  ;;  %6618 = vmatprep.mubr.msk.bf16.mxu1 %vm268_vm1, %v4080_v10 }
 0x26f   : > { %v8340_v53 = vpop.permute.xlu1 %2936  ;;  %6619 = vmatmul.mubr.msk.bf16.gmra.mrb[88].mxu1 %vm268_vm1, %v4081_v17  ;;  %v2484_v50 = vmax.f32 %v2428_v46, 0.0  ;;  %v2485_v62 = vmax.f32 %v2431_v0, 0.0  ;;  %v6737_v0 = vld [vmem:[%s9824_s1] sm:$0x1f]  }
 0x270   : > { %10038 = vst [vmem:[#allocation47_spill] sm:$0xff] %v8340_v53  ;;  %3632 = vperm.xlu1 %6723, %v8125_v33   ;;  %v1612_v49 = vadd.f32 %v1611_v20, %v1597_v44  ;;  %6710 = vmatprep.subr.msk.bf16.mxu0 %vm293_vm0, %v6737_v0  ;;  %v6160_v53 = vld [vmem:[%s6822_s8 + $0x600] sm:$0xff] }
 0x271   : > { %2498 = vxpose.xlu0.b32.start [1/16] %v2482_v35, 128  ;;  %v8346_v4 = vpop.trf.xlu0 }
 0x272   : > { %v1613_v42 = vrot.slane %v1612_v49, 4  ;;  %v8366_v31 = vpop.f32.mrb[68].mxu0 }
 0x273   : > { %v8348_v26 = vpop.permute.xlu1 %2941  ;;  %v8375_v10 = vpop.f32.mrb[69].mxu0 }
 0x274   : > { %10040 = vst [vmem:[#allocation51_spill] sm:$0xff] %v8348_v26  ;;  %3637 = vperm.xlu1 %6723, %v8140_v1   ;;  %v1614_v34 = vadd.f32 %v1613_v42, %v1612_v49  ;;  %v2436_v49 = vadd.f32 %v7893_v8, %v7947_v15  ;;  %v8379_v16 = vpop.f32.mrb[70].mxu0 }
 0x275   : > { %2499 = vxpose.xlu0.b32.cont [2/16] %v2483_v36, 128  ;;  %v8358_v35 = vpop.trf.xlu0  ;;  %v8381_v15 = vpop.f32.mrb[71].mxu0 }
 0x276   : > { %v1615_v20 = vrot.slane %v1614_v34, 2  ;;  %v2486_v36 = vmax.f32 %v2436_v49, 0.0 }
 0x277   : > { %v8360_v9 = vpop.permute.xlu1 %2946 }
 0x278   : > { %10041 = vst [vmem:[#allocation52_spill] sm:$0xff] %v8360_v9  ;;  %3642 = vperm.xlu1 %6723, %v8156_v21   ;;  %v1616_v44 = vadd.f32 %v1615_v20, %v1614_v34 }
 0x279   : > { %2500 = vxpose.xlu0.b32.cont [3/16] %v2484_v50, 128  ;;  %v8370_v58 = vpop.trf.xlu0  ;;  %v2439_v50 = vadd.f32 %v7893_v8, %v7951_v45  ;;  %v6149_v45 = vld [vmem:[%s6822_s8 + $0x5f8] sm:$0xff] }
 0x27a   : > { %v1617_v42 = vrot.slane %v1616_v44, 1 }
 0x27b   : > { %v8372_v40 = vpop.permute.xlu1 %2951  ;;  %v2487_v9 = vmax.f32 %v2439_v50, 0.0 }
 0x27c   : > { %10042 = vst [vmem:[#allocation53_spill] sm:$0xff] %v8372_v40  ;;  %3647 = vperm.xlu1 %6723, %v8170_v60   ;;  %v1618_v46 = vadd.f32 %v1617_v42, %v1616_v44  ;;  %v6146_v42 = vld [vmem:[%s6822_s8 + $0x5e0] sm:$0xff]  ;;  %v6148_v40 = vld [vmem:[%s6822_s8 + $0x5f0] sm:$0xff] }
 0x27d   : > { %2501 = vxpose.xlu0.b32.cont [4/16] %v2485_v62, 128  ;;  %v8383_v17 = vpop.trf.xlu0  ;;  %v6147_v62 = vld [vmem:[%s6822_s8 + $0x5e8] sm:$0xff] }
 0x27e   : > { %v1621_v20 = vadd.f32 %v8377_v11, %v1618_v46  ;;  %v4471_v46 = vsel %vm293_vm0, %v6737_v0, 0 }
 0x27f   : > { %v8385_v34 = vpop.permute.xlu1 %2956  ;;  %6627 = vmatpush3.bf16.msra.mxu0 %v4471_v46 }
 0x280   : > { %10043 = vst [vmem:[#allocation55_spill] sm:$0xff] %v8385_v34  ;;  %3652 = vperm.xlu1 %6723, %v8186_v43   ;;  %1622 = vst [vmem:[%s7778_s4 + $0x3] sm:$0x1] %v1621_v20  ;;  %v4082_v34 = vpack.c.bf16 %v6147_v62, %v6146_v42  ;;  %v2444_v20 = vadd.f32 %v7938_v6, %v7893_v8  ;;  %v2447_v42 = vadd.f32 %v7949_v22, %v7893_v8  ;;  %v8413_v62 = vpop.f32.mrb[72].mxu0 }
 0x281   : > { %2502 = vxpose.xlu0.b32.cont [5/16] %v2486_v36, 128  ;;  %v1822_v44 = vpop.trf.xlu0  ;;  %v4083_v36 = vpack.c.bf16 %v6149_v45, %v6148_v40  ;;  %v2452_v6 = vadd.f32 %v7893_v8, %v7992_v13 }
 0x282   : > { %6622 = vmatprep.mubr.msk.bf16.mxu1 %vm268_vm1, %v4082_v34  ;;  %v2488_v0 = vmax.f32 %v2444_v20, 0.0  ;;  %v2489_v50 = vmax.f32 %v2447_v42, 0.0 }
 0x283   : > { %v8395_v49 = vpop.permute.xlu1 %2961  ;;  %6623 = vmatmul.mubr.msk.bf16.gmra.mrb[92].mxu1 %vm268_vm1, %v4083_v36  ;;  %v2490_v22 = vmax.f32 %v2452_v6, 0.0  ;;  %v2455_v36 = vadd.f32 %v7893_v8, %v8001_v59  ;;  %v6161_v6 = vld [vmem:[%s6822_s8 + $0x608] sm:$0xff]  ;;  %v6163_v8 = vld [vmem:[%s6822_s8 + $0x618] sm:$0xff]  ;;  %v8447_v59 = vld [vmem:[%s9825_s2] ss:$0 sm:$0xff] }
 0x284   : > { %10044 = vst [vmem:[#allocation59_spill] sm:$0xff] %v8395_v49  ;;  %3657 = vperm.xlu1 %6723, %v8203_v29  }
 0x285   : > { %2503 = vxpose.xlu0.b32.cont [6/16] %v2487_v9, 128  ;;  %v1823_v49 = vpop.trf.xlu0  ;;  %v8420_v9 = vpop.f32.mrb[73].mxu0 }
 0x286   : > { %v8422_v46 = vpop.f32.mrb[74].mxu0 }
 0x287   : > { %v8407_v26 = vpop.permute.xlu1 %2966  ;;  %v8424_v45 = vpop.f32.mrb[75].mxu0 }
 0x288   : > { %10045 = vst [vmem:[#allocation60_spill] sm:$0xff] %v8407_v26  ;;  %3662 = vperm.xlu1 %6723, %v8225_v5  }
 0x289   : > { %2504 = vxpose.xlu0.b32.cont [7/16] %v2488_v0, 128  ;;  %v1824_v40 = vpop.trf.xlu0  ;;  %v10048_v0 = vld [vmem:[#allocation76_spill] sm:$0xff] }
 0x28b   : > { %v8417_v34 = vpop.permute.xlu1 %2971 }
 0x28c   : > { %10046 = vst [vmem:[#allocation61_spill] sm:$0xff] %v8417_v34  ;;  %3667 = vperm.xlu1 %6723, %v8237_v2   ;;  %v1931_v34 = vmul.f32 %v10048_v0, %v8358_v35  ;;  %v2460_v35 = vadd.f32 %v8447_v59, %v7985_v57  ;;  %v4425_v0 = vpack.c.bf16 %v6163_v8, %v6162_v24 }
 0x28d   : > { %2505 = vxpose.xlu0.b32.cont [8/16] %v2489_v50, 128  ;;  %v1825_v13 = vpop.trf.xlu0  ;;  %v10050_v50 = vld [vmem:[#allocation75_spill] sm:$0xff]  ;;  %v2463_v24 = vadd.f32 %v8447_v59, %v7999_v55 }
 0x28e   : > { %v1930_v54 = vmul.f32 %v10050_v50, %v8346_v4  ;;  %v1933_v4 = vmul.f32 %v7672_v30, %v8383_v17  ;;  %v2492_v57 = vmax.f32 %v2460_v35, 0.0 }
 0x28f   : > { %v8426_v20 = vpop.permute.xlu1 %3244  ;;  %v2493_v55 = vmax.f32 %v2463_v24, 0.0 }
 0x290   : > { %10047 = vst [vmem:[#allocation63_spill] sm:$0xff] %v8426_v20  ;;  %3940 = vperm.xlu1 %6723, %v7997_v61   ;;  %v1932_v20 = vmul.f32 %v7659_v32, %v8370_v58  ;;  %v4424_v61 = vpack.c.bf16 %v6161_v6, %v6160_v53  ;;  %v1934_v58 = vmul.f32 %v7683_v47, %v1822_v44  ;;  %v10054_v47 = vld [vmem:[#allocation4_spill] sm:$0xff] }
 0x291   : > { %2506 = vxpose.xlu0.b32.cont [9/16] %v2490_v22, 128  ;;  %v1826_v42 = vpop.trf.xlu0  ;;  %v2491_v22 = vmax.f32 %v2455_v36, 0.0  ;;  %v2468_v36 = vadd.f32 %v8447_v59, %v8058_v3  ;;  %v1936_v44 = vmul.f32 %v10054_v47, %v1824_v40  ;;  %v10061_v47 = vld [vmem:[#allocation8_spill] sm:$0xff] }
 0x292   : > { %6628 = vmatprep.mubr.msk.bf16.mxu0 %vm268_vm1, %v4424_v61  ;;  %v10055_v61 = vld [vmem:[#allocation5_spill] sm:$0xff] }
 0x293   : > { %v8433_v26 = vpop.permute.xlu1 %3249  ;;  %6629 = vmatmul.mubr.msk.bf16.vlgmr.msra.gmra.mrb[96].mxu0 %vm268_vm1, %v4425_v0  ;;  %v1937_v8 = vmul.f32 %v10055_v61, %v1825_v13  ;;  %v2494_v35 = vmax.f32 %v2468_v36, 0.0  ;;  %v10059_v13 = vld [vmem:[#allocation7_spill] sm:$0xff]  ;;  %v6165_v36 = vld [vmem:[%s6822_s8 + $0x628] sm:$0xff] }
 0x294   : > { %10049 = vst [vmem:[#allocation67_spill] sm:$0xff] %v8433_v26  ;;  %3945 = vperm.xlu1 %6723, %v8011_v14   ;;  %v1946_v26 = vadd.f32 %v1931_v34, %v1930_v54  ;;  %v10052_v34 = vld [vmem:[#allocation3_spill] sm:$0xff] }
 0x295   : > { %2507 = vxpose.xlu0.b32.cont [10/16] %v2491_v22, 128  ;;  %v1827_v32 = vpop.trf.xlu0  ;;  %v1935_v30 = vmul.f32 %v10052_v34, %v1823_v49 }
 0x296   : > { %v1947_v53 = vadd.f32 %v1946_v26, %v1932_v20  ;;  %v8462_v17 = vpop.f32.mrb[76].mxu0  ;;  %v1939_v24 = vmul.f32 %v10059_v13, %v1827_v32 }
 0x297   : > { %v8454_v14 = vpop.permute.xlu1 %3254 }
 0x298   : > { %10051 = vst [vmem:[#allocation68_spill] sm:$0xff] %v8454_v14  ;;  %3950 = vperm.xlu1 %6723, %v8031_v56   ;;  %v1948_v54 = vadd.f32 %v1947_v53, %v1933_v4  ;;  %v8470_v56 = vpop.f32.mrb[77].mxu0  ;;  %v10058_v53 = vld [vmem:[#allocation58_spill] sm:$0xff] }
 0x299   : > { %2508 = vxpose.xlu0.b32.cont [11/16] %v2492_v57, 128  ;;  %v1828_v6 = vpop.trf.xlu0  ;;  %v8472_v20 = vpop.f32.mrb[78].mxu0 }
 0x29a   : > { %v1949_v26 = vadd.f32 %v1948_v54, %v1934_v58  ;;  %v8475_v3 = vpop.f32.mrb[79].mxu0  ;;  %v2471_v58 = vadd.f32 %v8447_v59, %v10058_v53 }
 0x29b   : > { %v8466_v50 = vpop.permute.xlu1 %3259 }
 0x29c   : > { %10053 = vst [vmem:[#allocation69_spill] sm:$0xff] %v8466_v50  ;;  %3955 = vperm.xlu1 %6723, %v8047_v25   ;;  %v1950_v49 = vadd.f32 %v1949_v26, %v1935_v30  ;;  %v10057_v25 = vld [vmem:[#allocation6_spill] sm:$0xff]  ;;  %v6164_v30 = vld [vmem:[%s6822_s8 + $0x620] sm:$0xff]  ;;  %v10094_v50 = vld [vmem:[#allocation36_spill] sm:$0xff] }
 0x29d   : > { %2509 = vxpose.xlu0.b32.cont [12/16] %v2493_v55, 128  ;;  %v1829_v22 = vpop.trf.xlu0  ;;  %v1938_v4 = vmul.f32 %v10057_v25, %v1826_v42  ;;  %v4426_v42 = vpack.c.bf16 %v6165_v36, %v6164_v30  ;;  %v6166_v55 = vld [vmem:[%s6822_s8 + $0x630] sm:$0xff] }
 0x29e   : > { %v1951_v40 = vadd.f32 %v1950_v49, %v1936_v44  ;;  %v1940_v44 = vmul.f32 %v10061_v47, %v1828_v6  ;;  %v10062_v49 = vld [vmem:[#allocation56_spill] sm:$0xff]  ;;  %v10065_v6 = vld [vmem:[#allocation10_spill] sm:$0xff]  ;;  %v10067_v36 = vld [vmem:[#allocation77_spill] sm:$0xff] }
 0x29f   : > { %v8477_v0 = vpop.permute.xlu1 %3264  ;;  %v2476_v61 = vadd.f32 %v8447_v59, %v10062_v49  ;;  %6632 = vmatprep.mubr.msk.bf16.mxu0 %vm268_vm1, %v4426_v42  ;;  %v10068_v42 = vld [vmem:[#allocation65_spill] sm:$0xff] }
 0x2a0   : > { %10056 = vst [vmem:[#allocation71_spill] sm:$0xff] %v8477_v0  ;;  %3960 = vperm.xlu1 %6723, %v8063_v12   ;;  %v1952_v57 = vadd.f32 %v1951_v40, %v1937_v8  ;;  %v6167_v12 = vld [vmem:[%s6822_s8 + $0x638] sm:$0xff]  ;;  %v2495_v8 = vmax.f32 %v2471_v58, 0.0  ;;  %v8504_v58 = vld [vmem:[%s9825_s2] ss:$0 sm:$0xff] }
 0x2a1   : > { %2510 = vxpose.xlu0.b32.cont [13/16] %v2494_v35, 128  ;;  %v1830_v54 = vpop.trf.xlu0  ;;  %v4427_v40 = vpack.c.bf16 %v6167_v12, %v6166_v55  ;;  %v10063_v35 = vld [vmem:[#allocation9_spill] sm:$0xff]  ;;  %v2496_v13 = vmax.f32 %v2476_v61, 0.0  ;;  %v10070_v12 = vld [vmem:[#allocation78_spill] sm:$0xff] }
 0x2a2   : > { %v1953_v26 = vadd.f32 %v1952_v57, %v1938_v4  ;;  %v1941_v25 = vmul.f32 %v10063_v35, %v1829_v22  ;;  %v1942_v57 = vmul.f32 %v10065_v6, %v1830_v54  ;;  %v10066_v22 = vld [vmem:[#allocation26_spill] sm:$0xff]  ;;  %v10072_v6 = vld [vmem:[#allocation79_spill] sm:$0xff] }
 0x2a3   : > { %v8484_v34 = vpop.permute.xlu1 %3269  ;;  %6633 = vmatmul.mubr.msk.bf16.gmra.mrb[100].mxu0 %vm268_vm1, %v4427_v40  ;;  %v6189_v0 = vld [vmem:[%s6822_s8 + $0x698] sm:$0xff] }
 0x2a4   : > { %10060 = vst [vmem:[#allocation76_spill] sm:$0xff] %v8484_v34  ;;  %3965 = vperm.xlu1 %6723, %v8079_v28   ;;  %v1954_v32 = vadd.f32 %v1953_v26, %v1939_v24  ;;  %v2479_v24 = vadd.f32 %v8447_v59, %v10066_v22  ;;  %v6188_v34 = vld [vmem:[%s6822_s8 + $0x690] sm:$0xff] }
 0x2a5   : > { %2511 = vxpose.xlu0.b32.cont [14/16] %v2495_v8, 128  ;;  %v1831_v53 = vpop.trf.xlu0 }
 0x2a6   : > { %v1955_v28 = vadd.f32 %v1954_v32, %v1940_v44  ;;  %v1943_v26 = vmul.f32 %v10067_v36, %v1831_v53  ;;  %v8509_v47 = vpop.f32.mrb[64].mxu1  ;;  %v2768_v44 = vadd.f32 %v8504_v58, %v10068_v42  ;;  %v2497_v59 = vmax.f32 %v2479_v24, 0.0  ;;  %v6168_v36 = vld [vmem:[%s6822_s8 + $0x640] sm:$0xff] }
 0x2a7   : > { %v8496_v4 = vpop.permute.xlu1 %3274  ;;  %v8517_v61 = vpop.f32.mrb[65].mxu1 }
 0x2a8   : > { %10064 = vst [vmem:[#allocation75_spill] sm:$0xff] %v8496_v4  ;;  %3970 = vperm.xlu1 %6723, %v8095_v19   ;;  %v1956_v30 = vadd.f32 %v1955_v28, %v1941_v25  ;;  %v8519_v8 = vpop.f32.mrb[66].mxu1  ;;  %v2830_v35 = vmax.f32 %v2768_v44, 0.0 }
 0x2a9   : > { %2512 = vxpose.xlu0.b32.cont [15/16] %v2496_v13, 128  ;;  %v1832_v54 = vpop.trf.xlu0  ;;  %v8521_v32 = vpop.f32.mrb[67].mxu1 }
 0x2aa   : > { %v1957_v55 = vadd.f32 %v1956_v30, %v1942_v57  ;;  %v1944_v49 = vmul.f32 %v10070_v12, %v1832_v54  ;;  %v10073_v57 = vld [vmem:[#allocation74_spill] sm:$0xff]  ;;  %v6170_v54 = vld [vmem:[%s6822_s8 + $0x650] sm:$0xff] }
 0x2ab   : > { %v8513_v19 = vpop.permute.xlu1 %3279  ;;  %v2771_v13 = vadd.f32 %v8504_v58, %v10073_v57  ;;  %v10075_v12 = vld [vmem:[#allocation66_spill] sm:$0xff] }
 0x2ac   : > { %10069 = vst [vmem:[#allocation3_spill] sm:$0xff] %v8513_v19  ;;  %3975 = vperm.xlu1 %6723, %v8109_v39   ;;  %v1958_v40 = vadd.f32 %v1957_v55, %v1943_v26  ;;  %v6169_v26 = vld [vmem:[%s6822_s8 + $0x648] sm:$0xff]  ;;  %v6171_v55 = vld [vmem:[%s6822_s8 + $0x658] sm:$0xff]  ;;  %v10093_v19 = vld [vmem:[#allocation11_spill] sm:$0xff] }
 0x2ad   : > { %2513 = vxpose.xlu0.b32.end [16/16] %v2497_v59, 128  ;;  %v1833_v25 = vpop.trf.xlu0  ;;  %v4428_v44 = vpack.c.bf16 %v6169_v26, %v6168_v36  ;;  %v4429_v59 = vpack.c.bf16 %v6171_v55, %v6170_v54 }
 0x2ae   : > { %v1959_v28 = vadd.f32 %v1958_v40, %v1944_v49  ;;  %v1945_v39 = vmul.f32 %v10072_v6, %v1833_v25  ;;  %v2831_v49 = vmax.f32 %v2771_v13, 0.0  ;;  %v10077_v6 = vld [vmem:[#allocation72_spill] sm:$0xff] }
 0x2af   : > { %v8523_v53 = vpop.permute.xlu1 %3284  ;;  %6636 = vmatprep.mubr.msk.bf16.mxu0 %vm268_vm1, %v4428_v44 }
 0x2b0   : > { %10071 = vst [vmem:[#allocation4_spill] sm:$0xff] %v8523_v53  ;;  %3980 = vperm.xlu1 %6723, %v8125_v33   ;;  %v1960_v22 = vadd.f32 %v1959_v28, %v1945_v39  ;;  %v2776_v33 = vadd.f32 %v10075_v12, %v8504_v58  ;;  %6637 = vmatmul.mubr.msk.bf16.gmra.mrb[104].mxu0 %vm268_vm1, %v4429_v59 }
 0x2b1   : > { %2846 = vxpose.xlu0.b32.start [1/16] %v2830_v35, 128  ;;  %v8529_v24 = vpop.trf.xlu0  ;;  %v2779_v39 = vadd.f32 %v10077_v6, %v8504_v58  ;;  %v6738_v6 = vld [vmem:[%s9824_s1] sm:$0x1f]  }
 0x2b2   : > { %v1961_v42 = vrot.slane %v1960_v22, 4  ;;  %6711 = vmatprep.subr.msk.bf16.mxu1 %vm293_vm0, %v6738_v6 }
 0x2b3   : > { %v8531_v30 = vpop.permute.xlu1 %3289  ;;  %v2833_v54 = vmax.f32 %v2779_v39, 0.0 }
 0x2b4   : > { %10074 = vst [vmem:[#allocation5_spill] sm:$0xff] %v8531_v30  ;;  %3985 = vperm.xlu1 %6723, %v8140_v1   ;;  %v1962_v40 = vadd.f32 %v1961_v42, %v1960_v22  ;;  %v2832_v1 = vmax.f32 %v2776_v33, 0.0  ;;  %v10078_v22 = vld [vmem:[#allocation31_spill] sm:$0xff]  ;;  %v6187_v30 = vld [vmem:[%s6822_s8 + $0x688] sm:$0xff] }
 0x2b5   : > { %2847 = vxpose.xlu0.b32.cont [2/16] %v2831_v49, 128  ;;  %v8541_v35 = vpop.trf.xlu0  ;;  %v2784_v36 = vadd.f32 %v8504_v58, %v10078_v22  ;;  %v6172_v22 = vld [vmem:[%s6822_s8 + $0x660] sm:$0xff] }
 0x2b6   : > { %v1963_v28 = vrot.slane %v1962_v40, 2  ;;  %v8549_v13 = vpop.f32.mrb[68].mxu1 }
 0x2b7   : > { %v8543_v25 = vpop.permute.xlu1 %3294  ;;  %v2834_v49 = vmax.f32 %v2784_v36, 0.0  ;;  %v6173_v36 = vld [vmem:[%s6822_s8 + $0x668] sm:$0xff] }
 0x2b8   : > { %10076 = vst [vmem:[#allocation6_spill] sm:$0xff] %v8543_v25  ;;  %3990 = vperm.xlu1 %6723, %v8156_v21   ;;  %v1964_v57 = vadd.f32 %v1963_v28, %v1962_v40  ;;  %v8558_v21 = vpop.f32.mrb[69].mxu1  ;;  %v10081_v28 = vld [vmem:[#allocation32_spill] sm:$0xff]  ;;  %v6186_v25 = vld [vmem:[%s6822_s8 + $0x680] sm:$0xff] }
 0x2b9   : > { %2848 = vxpose.xlu0.b32.cont [3/16] %v2832_v1, 128  ;;  %v8553_v26 = vpop.trf.xlu0  ;;  %v8560_v55 = vpop.f32.mrb[70].mxu1  ;;  %v2787_v1 = vadd.f32 %v8504_v58, %v10081_v28  ;;  %v4772_v4 = vpack.c.bf16 %v6187_v30, %v6186_v25  ;;  %v10097_v25 = vld [vmem:[#allocation14_spill] sm:$0xff] }
 0x2ba   : > { %v1965_v44 = vrot.slane %v1964_v57, 1  ;;  %v8562_v33 = vpop.f32.mrb[71].mxu1 }
 0x2bb   : > { %v8555_v42 = vpop.permute.xlu1 %3299  ;;  %6646 = vmatprep.mubr.msk.bf16.mxu1 %vm268_vm1, %v4772_v4  ;;  %v8658_v4 = vld [vmem:[%s9826_s3 + $0x18] sm:$0xff] }
 0x2bc   : > { %10079 = vst [vmem:[#allocation58_spill] sm:$0xff] %v8555_v42  ;;  %3995 = vperm.xlu1 %6723, %v8170_v60   ;;  %v1966_v12 = vadd.f32 %v1965_v44, %v1964_v57  ;;  %v4430_v44 = vpack.c.bf16 %v6173_v36, %v6172_v22 }
 0x2bd   : > { %2849 = vxpose.xlu0.b32.cont [4/16] %v2833_v54, 128  ;;  %v8564_v59 = vpop.trf.xlu0  ;;  %v6174_v54 = vld [vmem:[%s6822_s8 + $0x670] sm:$0xff] }
 0x2be   : > { %v1969_v60 = vadd.f32 %v1966_v12, %v8377_v11  ;;  %v6175_v12 = vld [vmem:[%s6822_s8 + $0x678] sm:$0xff]  ;;  %6640 = vmatprep.mubr.msk.bf16.mxu0 %vm268_vm1, %v4430_v44 }
 0x2bf   : > { %v8566_v40 = vpop.permute.xlu1 %3304 }
 0x2c0   : > { %10080 = vst [vmem:[#allocation7_spill] sm:$0xff] %v8566_v40  ;;  %4000 = vperm.xlu1 %6723, %v8186_v43   ;;  %1970 = vst [vmem:[%s7778_s4 + $0x4] sm:$0x1] %v1969_v60  ;;  %v4819_v43 = vsel %vm293_vm0, %v6738_v6, 0  ;;  %v10083_v60 = vld [vmem:[#allocation70_spill] sm:$0xff]  ;;  %v2835_v40 = vmax.f32 %v2787_v1, 0.0 }
 0x2c1   : > { %2850 = vxpose.xlu0.b32.cont [5/16] %v2834_v49, 128  ;;  %v8576_v39 = vpop.trf.xlu0  ;;  %v2792_v28 = vadd.f32 %v10083_v60, %v8504_v58  ;;  %6645 = vmatpush3.bf16.msra.mxu1 %v4819_v43  ;;  %v4431_v49 = vpack.c.bf16 %v6175_v12, %v6174_v54  ;;  %v10085_v6 = vld [vmem:[#allocation73_spill] sm:$0xff]  ;;  %v10086_v60 = vld [vmem:[#allocation38_spill] sm:$0xff] }
 0x2c2   : > { %v2795_v22 = vadd.f32 %v10085_v6, %v8504_v58  ;;  %v8596_v36 = vpop.f32.mrb[72].mxu1  ;;  %v2800_v1 = vadd.f32 %v8504_v58, %v10086_v60  ;;  %v10089_v6 = vld [vmem:[#allocation40_spill] sm:$0xff] }
 0x2c3   : > { %v8578_v57 = vpop.permute.xlu1 %3309  ;;  %6641 = vmatmul.mubr.msk.bf16.gmra.mrb[108].mxu0 %vm268_vm1, %v4431_v49  ;;  %v8622_v60 = vld [vmem:[%s9826_s3 + $0x8] sm:$0xff] }
 0x2c4   : > { %10082 = vst [vmem:[#allocation8_spill] sm:$0xff] %v8578_v57  ;;  %4005 = vperm.xlu1 %6723, %v8203_v29   ;;  %v2836_v29 = vmax.f32 %v2792_v28, 0.0  ;;  %v2837_v54 = vmax.f32 %v2795_v22, 0.0  ;;  %v2838_v49 = vmax.f32 %v2800_v1, 0.0  ;;  %v2803_v22 = vadd.f32 %v8504_v58, %v10089_v6 }
 0x2c5   : > { %2851 = vxpose.xlu0.b32.cont [6/16] %v2835_v40, 128  ;;  %v2171_v57 = vpop.trf.xlu0  ;;  %v8603_v40 = vpop.f32.mrb[73].mxu1  ;;  %v2280_v6 = vmul.f32 %v10093_v19, %v8553_v26  ;;  %v2282_v26 = vmul.f32 %v10097_v25, %v8576_v39 }
 0x2c6   : > { %v8610_v12 = vpop.f32.mrb[74].mxu1 }
 0x2c7   : > { %v8590_v42 = vpop.permute.xlu1 %3314  ;;  %v8612_v28 = vpop.f32.mrb[75].mxu1 }
 0x2c8   : > { %10084 = vst [vmem:[#allocation56_spill] sm:$0xff] %v8590_v42  ;;  %4010 = vperm.xlu1 %6723, %v8225_v5   ;;  %v8608_v5 = vld [vmem:[%s9826_s3] sm:$0xff] }
 0x2c9   : > { %2852 = vxpose.xlu0.b32.cont [7/16] %v2836_v29, 128  ;;  %v2172_v43 = vpop.trf.xlu0 }
 0x2cb   : > { %v8600_v44 = vpop.permute.xlu1 %3319 }
 0x2cc   : > { %10087 = vst [vmem:[#allocation9_spill] sm:$0xff] %v8600_v44  ;;  %4015 = vperm.xlu1 %6723, %v8237_v2   ;;  %v10090_v44 = vld [vmem:[#allocation12_spill] sm:$0xff] }
 0x2cd   : > { %2853 = vxpose.xlu0.b32.cont [8/16] %v2837_v54, 128  ;;  %v2173_v29 = vpop.trf.xlu0  ;;  %v2279_v42 = vmul.f32 %v10090_v44, %v8541_v35  ;;  %v2808_v35 = vadd.f32 %v10094_v50, %v8504_v58  ;;  %v2839_v44 = vmax.f32 %v2803_v22, 0.0 }
 0x2cf   : > { %v8614_v2 = vpop.permute.xlu1 %3592  ;;  %v2840_v22 = vmax.f32 %v2808_v35, 0.0  ;;  %v10102_v35 = vld [vmem:[#allocation16_spill] sm:$0xff] }
 0x2d0   : > { %10088 = vst [vmem:[#allocation10_spill] sm:$0xff] %v8614_v2  ;;  %4288 = vperm.xlu1 %6723, %v8608_v5   ;;  %v10092_v2 = vld [vmem:[#allocation80_spill] sm:$0xff] }
 0x2d1   : > { %2854 = vxpose.xlu0.b32.cont [9/16] %v2838_v49, 128  ;;  %v2174_v1 = vpop.trf.xlu0  ;;  %v2278_v53 = vmul.f32 %v10092_v2, %v8529_v24  ;;  %v8642_v49 = vld [vmem:[%s9826_s3 + $0x10] sm:$0xff] }
 0x2d2   : > { %v10095_v24 = vld [vmem:[#allocation13_spill] sm:$0xff] }
 0x2d3   : > { %v8626_v54 = vpop.permute.xlu1 %3597  ;;  %v2294_v14 = vadd.f32 %v2279_v42, %v2278_v53  ;;  %v2281_v2 = vmul.f32 %v10095_v24, %v8564_v59  ;;  %v10099_v42 = vld [vmem:[#allocation15_spill] sm:$0xff]  ;;  %v2284_v24 = vmul.f32 %v10102_v35, %v2172_v43  ;;  %v10107_v35 = vld [vmem:[#allocation17_spill] sm:$0xff] }
 0x2d4   : > { %10091 = vst [vmem:[#allocation26_spill] sm:$0xff] %v8626_v54  ;;  %4293 = vperm.xlu1 %6723, %v8622_v60   ;;  %v4773_v54 = vpack.c.bf16 %v6189_v0, %v6188_v34  ;;  %v10098_v0 = vld [vmem:[#allocation39_spill] sm:$0xff]  ;;  %v2283_v59 = vmul.f32 %v10099_v42, %v2171_v57 }
 0x2d5   : > { %2855 = vxpose.xlu0.b32.cont [10/16] %v2839_v44, 128  ;;  %v2175_v19 = vpop.trf.xlu0  ;;  %v2295_v50 = vadd.f32 %v2294_v14, %v2280_v6  ;;  %v2811_v34 = vadd.f32 %v10098_v0, %v8504_v58  ;;  %v2816_v14 = vadd.f32 %v8504_v58, %v8292_v38  ;;  %v8674_v57 = vld [vmem:[%s9826_s3 + $0x20] sm:$0xff] }
 0x2d6   : > { %6647 = vmatmul.mubr.msk.bf16.vlgmr.msra.gmra.mrb[96].mxu1 %vm268_vm1, %v4773_v54  ;;  %v8661_v44 = vpop.f32.mrb[76].mxu1 }
 0x2d7   : > { %v8647_v30 = vpop.permute.xlu1 %3602  ;;  %v2296_v53 = vadd.f32 %v2295_v50, %v2281_v2  ;;  %10100 = vst [vmem:[#allocation65_spill] sm:$0xff] %v8661_v44  ;;  %v8669_v25 = vpop.f32.mrb[77].mxu1  ;;  %v2841_v0 = vmax.f32 %v2811_v34, 0.0  ;;  %v10104_v50 = vld [vmem:[#allocation48_spill] sm:$0xff]  ;;  %v2842_v43 = vmax.f32 %v2816_v14, 0.0  ;;  %v6193_v44 = vld [vmem:[%s6822_s8 + $0x6b8] sm:$0xff] }
 0x2d8   : > { %10096 = vst [vmem:[#allocation77_spill] sm:$0xff] %v8647_v30  ;;  %4298 = vperm.xlu1 %6723, %v8642_v49   ;;  %v8676_v2 = vpop.f32.mrb[78].mxu1 }
 0x2d9   : > { %2856 = vxpose.xlu0.b32.cont [11/16] %v2840_v22, 128  ;;  %v2176_v39 = vpop.trf.xlu0  ;;  %v2297_v6 = vadd.f32 %v2296_v53, %v2282_v26  ;;  %10103 = vst [vmem:[#allocation79_spill] sm:$0xff] %v8676_v2  ;;  %v2285_v22 = vmul.f32 %v10104_v50, %v2173_v29  ;;  %v8679_v42 = vpop.f32.mrb[79].mxu1  ;;  %v8690_v29 = vld [vmem:[%s9826_s3 + $0x28] sm:$0xff]  ;;  %v6192_v2 = vld [vmem:[%s6822_s8 + $0x6b0] sm:$0xff] }
 0x2da   : > { %10105 = vst [vmem:[#allocation74_spill] sm:$0xff] %v8679_v42  ;;  %v2824_v42 = vadd.f32 %v8284_v23, %v8504_v58  ;;  %v10113_v23 = vld [vmem:[#allocation20_spill] sm:$0xff] }
 0x2db   : > { %v8665_v54 = vpop.permute.xlu1 %3607  ;;  %v2298_v38 = vadd.f32 %v2297_v6, %v2283_v59  ;;  %v2819_v59 = vadd.f32 %v8504_v58, %v8297_v18  ;;  %v10108_v6 = vld [vmem:[#allocation18_spill] sm:$0xff] }
 0x2dc   : > { %10101 = vst [vmem:[#allocation78_spill] sm:$0xff] %v8665_v54  ;;  %4303 = vperm.xlu1 %6723, %v8658_v4   ;;  %v2286_v54 = vmul.f32 %v10107_v35, %v2174_v1  ;;  %v6191_v1 = vld [vmem:[%s6822_s8 + $0x6a8] sm:$0xff] }
 0x2dd   : > { %2857 = vxpose.xlu0.b32.cont [12/16] %v2841_v0, 128  ;;  %v2177_v26 = vpop.trf.xlu0  ;;  %v2299_v34 = vadd.f32 %v2298_v38, %v2284_v24  ;;  %v2287_v0 = vmul.f32 %v10108_v6, %v2175_v19  ;;  %v6190_v38 = vld [vmem:[%s6822_s8 + $0x6a0] sm:$0xff]  ;;  %v8706_v19 = vld [vmem:[%s9826_s3 + $0x30] sm:$0xff]  ;;  %v10111_v6 = vld [vmem:[#allocation50_spill] sm:$0xff] }
 0x2de   : > { %v4774_v18 = vpack.c.bf16 %v6191_v1, %v6190_v38  ;;  %v2844_v38 = vmax.f32 %v2824_v42, 0.0 }
 0x2df   : > { %v8681_v53 = vpop.permute.xlu1 %3612  ;;  %v2300_v14 = vadd.f32 %v2299_v34, %v2285_v22  ;;  %v2843_v22 = vmax.f32 %v2819_v59, 0.0 }
 0x2e0   : > { %10106 = vst [vmem:[#allocation66_spill] sm:$0xff] %v8681_v53  ;;  %4308 = vperm.xlu1 %6723, %v8674_v57   ;;  %v10110_v53 = vld [vmem:[#allocation19_spill] sm:$0xff]  ;;  %6650 = vmatprep.mubr.msk.bf16.mxu1 %vm268_vm1, %v4774_v18 }
 0x2e1   : > { %2858 = vxpose.xlu0.b32.cont [13/16] %v2842_v43, 128  ;;  %v2178_v50 = vpop.trf.xlu0  ;;  %v2301_v35 = vadd.f32 %v2300_v14, %v2286_v54  ;;  %v2288_v30 = vmul.f32 %v10110_v53, %v2176_v39  ;;  %v4775_v43 = vpack.c.bf16 %v6193_v44, %v6192_v2  ;;  %v2289_v54 = vmul.f32 %v10111_v6, %v2177_v26  ;;  %v8720_v2 = vld [vmem:[%s9826_s3 + $0x38] sm:$0xff]  ;;  %v8736_v6 = vld [vmem:[%s9826_s3 + $0x40] sm:$0xff] }
 0x2e2   : > { %v2290_v59 = vmul.f32 %v10113_v23, %v2178_v50  ;;  %v2827_v44 = vadd.f32 %v8294_v63, %v8504_v58 }
 0x2e3   : > { %v8693_v24 = vpop.permute.xlu1 %3617  ;;  %v2302_v34 = vadd.f32 %v2301_v35, %v2287_v0  ;;  %6651 = vmatmul.mubr.msk.bf16.gmra.mrb[100].mxu1 %vm268_vm1, %v4775_v43  ;;  %v10114_v0 = vld [vmem:[#allocation21_spill] sm:$0xff] }
 0x2e4   : > { %10109 = vst [vmem:[#allocation72_spill] sm:$0xff] %v8693_v24  ;;  %4313 = vperm.xlu1 %6723, %v8690_v29   ;;  %v6200_v24 = vld [vmem:[%s6822_s8 + $0x6f0] sm:$0xff] }
 0x2e5   : > { %2859 = vxpose.xlu0.b32.cont [14/16] %v2843_v22, 128  ;;  %v2179_v39 = vpop.trf.xlu0  ;;  %v2303_v14 = vadd.f32 %v2302_v34, %v2288_v30  ;;  %v3116_v30 = vadd.f32 %v8504_v58, %v8334_v52  ;;  %v10117_v22 = vld [vmem:[#allocation46_spill] sm:$0xff]  ;;  %v2845_v34 = vmax.f32 %v2827_v44, 0.0 }
 0x2e6   : > { %v2291_v1 = vmul.f32 %v10114_v0, %v2179_v39  ;;  %v10122_v44 = vld [vmem:[#allocation22_spill] sm:$0xff]  ;;  %v3119_v0 = vadd.f32 %v8504_v58, %v8338_v48  ;;  %v3124_v48 = vadd.f32 %v8326_v7, %v8504_v58 }
 0x2e7   : > { %v8710_v53 = vpop.permute.xlu1 %3622  ;;  %v2304_v26 = vadd.f32 %v2303_v14, %v2289_v54  ;;  %v3178_v14 = vmax.f32 %v3116_v30, 0.0 }
 0x2e8   : > { %10112 = vst [vmem:[#allocation31_spill] sm:$0xff] %v8710_v53  ;;  %4318 = vperm.xlu1 %6723, %v8706_v19   ;;  %v3180_v7 = vmax.f32 %v3124_v48, 0.0  ;;  %v3135_v53 = vadd.f32 %v8504_v58, %v8381_v15 }
 0x2e9   : > { %v8723_v35 = vpop.f32.mrb[80].mxu0  ;;  %2860 = vxpose.xlu0.b32.cont [15/16] %v2844_v38, 128  ;;  %v2180_v50 = vpop.trf.xlu0  ;;  %v2305_v42 = vadd.f32 %v2304_v26, %v2290_v59 }
 0x2ea   : > { %10115 = vst [vmem:[#allocation32_spill] sm:$0xff] %v8723_v35  ;;  %v2292_v63 = vmul.f32 %v10117_v22, %v2180_v50  ;;  %v8731_v43 = vpop.f32.mrb[81].mxu0  ;;  %v6194_v22 = vld [vmem:[%s6822_s8 + $0x6c0] sm:$0xff]  ;;  %v6214_v35 = vld [vmem:[%s6822_s8 + $0x710] sm:$0xff] }
 0x2eb   : > { %v8727_v18 = vpop.permute.xlu1 %3627  ;;  %10118 = vst [vmem:[#allocation73_spill] sm:$0xff] %v8731_v43  ;;  %v8738_v54 = vpop.f32.mrb[82].mxu0  ;;  %v2306_v52 = vadd.f32 %v2305_v42, %v2291_v1  ;;  %v8751_v1 = vld [vmem:[%s9826_s3 + $0x48] sm:$0xff] }
 0x2ec   : > { %10116 = vst [vmem:[#allocation70_spill] sm:$0xff] %v8727_v18  ;;  %4323 = vperm.xlu1 %6723, %v8720_v2   ;;  %10119 = vst [vmem:[#allocation38_spill] sm:$0xff] %v8738_v54  ;;  %v8740_v39 = vpop.f32.mrb[83].mxu0 }
 0x2ed   : > { %10120 = vst [vmem:[#allocation40_spill] sm:$0xff] %v8740_v39  ;;  %2861 = vxpose.xlu0.b32.end [16/16] %v2845_v34, 128  ;;  %v2181_v23 = vpop.trf.xlu0  ;;  %v2307_v38 = vadd.f32 %v2306_v52, %v2292_v63  ;;  %v6195_v63 = vld [vmem:[%s6822_s8 + $0x6c8] sm:$0xff] }
 0x2ee   : > { %v2293_v26 = vmul.f32 %v10122_v44, %v2181_v23  ;;  %v4776_v52 = vpack.c.bf16 %v6195_v63, %v6194_v22  ;;  %v6196_v23 = vld [vmem:[%s6822_s8 + $0x6d0] sm:$0xff]  ;;  %v6197_v44 = vld [vmem:[%s6822_s8 + $0x6d8] sm:$0xff] }
 0x2ef   : > { %v8742_v59 = vpop.permute.xlu1 %3632 }
 0x2f0   : > { %10121 = vst [vmem:[#allocation12_spill] sm:$0xff] %v8742_v59  ;;  %4328 = vperm.xlu1 %6723, %v8736_v6   ;;  %v2308_v30 = vadd.f32 %v2307_v38, %v2293_v26  ;;  %v3179_v59 = vmax.f32 %v3119_v0, 0.0  ;;  %v4777_v38 = vpack.c.bf16 %v6197_v44, %v6196_v23  ;;  %6654 = vmatprep.mubr.msk.bf16.mxu1 %vm268_vm1, %v4776_v52 }
 0x2f1   : > { %3194 = vxpose.xlu0.b32.start [1/16] %v3178_v14, 128  ;;  %v8753_v50 = vpop.trf.xlu0  ;;  %v8767_v14 = vld [vmem:[%s9826_s3 + $0x50] sm:$0xff]  ;;  %v3127_v0 = vadd.f32 %v8336_v37, %v8504_v58 }
 0x2f2   : > { %v2309_v34 = vrot.slane %v2308_v30, 4  ;;  %6655 = vmatmul.mubr.msk.bf16.gmra.mrb[104].mxu1 %vm268_vm1, %v4777_v38  ;;  %v8797_v38 = vld [vmem:[%s9826_s3 + $0x60] sm:$0xff] }
 0x2f3   : > { %v8755_v42 = vpop.permute.xlu1 %3637  ;;  %v3181_v48 = vmax.f32 %v3127_v0, 0.0 }
 0x2f4   : > { %10123 = vst [vmem:[#allocation80_spill] sm:$0xff] %v8755_v42  ;;  %4333 = vperm.xlu1 %6723, %v8751_v1   ;;  %v2310_v26 = vadd.f32 %v2309_v34, %v2308_v30  ;;  %v8781_v30 = vld [vmem:[%s9826_s3 + $0x58] sm:$0xff]  ;;  %v3132_v34 = vadd.f32 %v8504_v58, %v8375_v10 }
 0x2f5   : > { %3195 = vxpose.xlu0.b32.cont [2/16] %v3179_v59, 128  ;;  %v8770_v42 = vpop.trf.xlu0 }
 0x2f6   : > { %v2311_v22 = vrot.slane %v2310_v26, 2  ;;  %v8783_v59 = vpop.f32.mrb[84].mxu0 }
 0x2f7   : > { %v8772_v18 = vpop.permute.xlu1 %3642  ;;  %10125 = vst [vmem:[#allocation36_spill] sm:$0xff] %v8783_v59  ;;  %v8792_v37 = vpop.f32.mrb[85].mxu0  ;;  %v3183_v59 = vmax.f32 %v3135_v53, 0.0  ;;  %v8848_v53 = vld [vmem:[%s9826_s3 + $0x78] sm:$0xff] }
 0x2f8   : > { %10124 = vst [vmem:[#allocation11_spill] sm:$0xff] %v8772_v18  ;;  %4338 = vperm.xlu1 %6723, %v8767_v14   ;;  %v2312_v63 = vadd.f32 %v2311_v22, %v2310_v26  ;;  %10127 = vst [vmem:[#allocation14_spill] sm:$0xff] %v8792_v37  ;;  %v8799_v26 = vpop.f32.mrb[86].mxu0 }
 0x2f9   : > { %3196 = vxpose.xlu0.b32.cont [3/16] %v3180_v7, 128  ;;  %v8787_v52 = vpop.trf.xlu0  ;;  %10128 = vst [vmem:[#allocation39_spill] sm:$0xff] %v8799_v26  ;;  %v8801_v22 = vpop.f32.mrb[87].mxu0  ;;  %v3182_v7 = vmax.f32 %v3132_v34, 0.0  ;;  %v6739_v34 = vld [vmem:[%s9824_s1] sm:$0x1f]   ;;  %v3140_v26 = vadd.f32 %v8366_v31, %v8504_v58  ;;  %v3143_v31 = vadd.f32 %v8379_v16, %v8504_v58 }
 0x2fa   : > { %v2313_v44 = vrot.slane %v2312_v63, 1  ;;  %10129 = vst [vmem:[#allocation15_spill] sm:$0xff] %v8801_v22  ;;  %6712 = vmatprep.subr.msk.bf16.mxu0 %vm293_vm0, %v6739_v34  ;;  %v5167_v15 = vsel %vm293_vm0, %v6739_v34, 0 }
 0x2fb   : > { %v8789_v23 = vpop.permute.xlu1 %3647  ;;  %6663 = vmatpush3.bf16.msra.mxu0 %v5167_v15  ;;  %v3184_v34 = vmax.f32 %v3140_v26, 0.0  ;;  %v3185_v16 = vmax.f32 %v3143_v31, 0.0 }
 0x2fc   : > { %10126 = vst [vmem:[#allocation13_spill] sm:$0xff] %v8789_v23  ;;  %4343 = vperm.xlu1 %6723, %v8781_v30   ;;  %v2314_v10 = vadd.f32 %v2313_v44, %v2312_v63  ;;  %v8814_v63 = vld [vmem:[%s9826_s3 + $0x68] sm:$0xff] }
 0x2fd   : > { %3197 = vxpose.xlu0.b32.cont [4/16] %v3181_v48, 128  ;;  %v8803_v23 = vpop.trf.xlu0  ;;  %v6198_v48 = vld [vmem:[%s6822_s8 + $0x6e0] sm:$0xff] }
 0x2fe   : > { %v2317_v0 = vadd.f32 %v2314_v10, %v8377_v11  ;;  %v6199_v10 = vld [vmem:[%s6822_s8 + $0x6e8] sm:$0xff] }
 0x2ff   : > { %v8805_v18 = vpop.permute.xlu1 %3652 }
 0x300   : > { %10130 = vst [vmem:[#allocation16_spill] sm:$0xff] %v8805_v18  ;;  %4348 = vperm.xlu1 %6723, %v8797_v38   ;;  %2318 = vst [vmem:[%s7778_s4 + $0x5] sm:$0x1] %v2317_v0  ;;  %v4778_v18 = vpack.c.bf16 %v6199_v10, %v6198_v48  ;;  %v6201_v0 = vld [vmem:[%s6822_s8 + $0x6f8] sm:$0xff] }
 0x301   : > { %3198 = vxpose.xlu0.b32.cont [5/16] %v3182_v7, 128  ;;  %v8820_v44 = vpop.trf.xlu0  ;;  %v8836_v7 = vld [vmem:[%s9826_s3 + $0x70] sm:$0xff] }
 0x302   : > { %6658 = vmatprep.mubr.msk.bf16.mxu1 %vm268_vm1, %v4778_v18  ;;  %v3148_v18 = vadd.f32 %v8504_v58, %v8420_v9 }
 0x303   : > { %v8822_v11 = vpop.permute.xlu1 %3657 }
 0x304   : > { %10131 = vst [vmem:[#allocation48_spill] sm:$0xff] %v8822_v11  ;;  %4353 = vperm.xlu1 %6723, %v8814_v63   ;;  %v4779_v11 = vpack.c.bf16 %v6201_v0, %v6200_v24  ;;  %v3186_v15 = vmax.f32 %v3148_v18, 0.0  ;;  %v6213_v18 = vld [vmem:[%s6822_s8 + $0x708] sm:$0xff] }
 0x305   : > { %3199 = vxpose.xlu0.b32.cont [6/16] %v3183_v59, 128  ;;  %v2519_v22 = vpop.trf.xlu0  ;;  %v8850_v24 = vpop.f32.mrb[88].mxu0 }
 0x306   : > { %6659 = vmatmul.mubr.msk.bf16.gmra.mrb[108].mxu1 %vm268_vm1, %v4779_v11  ;;  %10133 = vst [vmem:[#allocation18_spill] sm:$0xff] %v8850_v24  ;;  %v8857_v26 = vpop.f32.mrb[89].mxu0  ;;  %v6212_v24 = vld [vmem:[%s6822_s8 + $0x700] sm:$0xff] }
 0x307   : > { %v8839_v37 = vpop.permute.xlu1 %3662  ;;  %10135 = vst [vmem:[#allocation50_spill] sm:$0xff] %v8857_v26  ;;  %v8859_v11 = vpop.f32.mrb[90].mxu0  ;;  %v10142_v26 = vld [vmem:[#allocation24_spill] sm:$0xff]  ;;  %v5120_v54 = vpack.c.bf16 %v6213_v18, %v6212_v24  ;;  %v10144_v24 = vld [vmem:[#allocation54_spill] sm:$0xff] }
 0x308   : > { %10132 = vst [vmem:[#allocation17_spill] sm:$0xff] %v8839_v37  ;;  %4358 = vperm.xlu1 %6723, %v8836_v7   ;;  %10136 = vst [vmem:[#allocation20_spill] sm:$0xff] %v8859_v11  ;;  %v8861_v10 = vpop.f32.mrb[91].mxu0 }
 0x309   : > { %3200 = vxpose.xlu0.b32.cont [7/16] %v3184_v34, 128  ;;  %v2520_v59 = vpop.trf.xlu0  ;;  %10137 = vst [vmem:[#allocation21_spill] sm:$0xff] %v8861_v10  ;;  %v3151_v34 = vadd.f32 %v8504_v58, %v8424_v45  ;;  %v6215_v45 = vld [vmem:[%s6822_s8 + $0x718] sm:$0xff]  ;;  %6664 = vmatprep.mubr.msk.bf16.mxu0 %vm268_vm1, %v5120_v54 }
 0x30b   : > { %v8854_v48 = vpop.permute.xlu1 %3667 }
 0x30c   : > { %10134 = vst [vmem:[#allocation19_spill] sm:$0xff] %v8854_v48  ;;  %4363 = vperm.xlu1 %6723, %v8848_v53   ;;  %v10139_v48 = vld [vmem:[#allocation49_spill] sm:$0xff] }
 0x30d   : > { %3201 = vxpose.xlu0.b32.cont [8/16] %v3185_v16, 128  ;;  %v2521_v9 = vpop.trf.xlu0  ;;  %v2627_v37 = vmul.f32 %v10139_v48, %v8770_v42  ;;  %v10141_v16 = vld [vmem:[#allocation23_spill] sm:$0xff]  ;;  %v3156_v42 = vadd.f32 %v8413_v62, %v8504_v58  ;;  %v3187_v48 = vmax.f32 %v3151_v34, 0.0 }
 0x30e   : > { %v2626_v10 = vmul.f32 %v10141_v16, %v8753_v50 }
 0x30f   : > { %v8863_v0 = vpop.permute.xlu1 %3940  ;;  %v3188_v62 = vmax.f32 %v3156_v42, 0.0  ;;  %v10147_v42 = vld [vmem:[#allocation62_spill] sm:$0xff] }
 0x310   : > { %10138 = vst [vmem:[#allocation46_spill] sm:$0xff] %v8863_v0  ;;  %4636 = vperm.xlu1 %6723, %v8608_v5   ;;  %v2628_v0 = vmul.f32 %v10142_v26, %v8787_v52  ;;  %v2642_v39 = vadd.f32 %v2627_v37, %v2626_v10  ;;  %v2630_v26 = vmul.f32 %v10144_v24, %v8820_v44  ;;  %v10146_v44 = vld [vmem:[#allocation64_spill] sm:$0xff] }
 0x311   : > { %3202 = vxpose.xlu0.b32.cont [9/16] %v3186_v15, 128  ;;  %v2522_v31 = vpop.trf.xlu0  ;;  %v5121_v15 = vpack.c.bf16 %v6215_v45, %v6214_v35  ;;  %v3159_v35 = vadd.f32 %v8422_v46, %v8504_v58  ;;  %v3164_v10 = vadd.f32 %v8504_v58, %v8470_v56  ;;  %v2632_v18 = vmul.f32 %v10146_v44, %v2520_v59  ;;  %v6217_v44 = vld [vmem:[%s6822_s8 + $0x728] sm:$0xff] }
 0x312   : > { %v2643_v52 = vadd.f32 %v2642_v39, %v2628_v0 }
 0x313   : > { %v8870_v11 = vpop.permute.xlu1 %3945  ;;  %6665 = vmatmul.mubr.msk.bf16.vlgmr.msra.gmra.mrb[112].mxu0 %vm268_vm1, %v5121_v15  ;;  %v3189_v46 = vmax.f32 %v3159_v35, 0.0  ;;  %v3190_v15 = vmax.f32 %v3164_v10, 0.0  ;;  %v3167_v35 = vadd.f32 %v8504_v58, %v8475_v3  ;;  %v3172_v3 = vadd.f32 %v8462_v17, %v8504_v58 }
 0x314   : > { %10140 = vst [vmem:[#allocation22_spill] sm:$0xff] %v8870_v11  ;;  %4641 = vperm.xlu1 %6723, %v8622_v60   ;;  %v10143_v11 = vld [vmem:[#allocation25_spill] sm:$0xff]  ;;  %v3175_v17 = vadd.f32 %v8472_v20, %v8504_v58 }
 0x315   : > { %v2629_v43 = vmul.f32 %v10143_v11, %v8803_v23  ;;  %3203 = vxpose.xlu0.b32.cont [10/16] %v3187_v48, 128  ;;  %v2523_v50 = vpop.trf.xlu0  ;;  %v10145_v23 = vld [vmem:[#allocation57_spill] sm:$0xff]  ;;  %v2633_v48 = vmul.f32 %v10147_v42, %v2521_v9  ;;  %v10149_v9 = vld [vmem:[#allocation27_spill] sm:$0xff] }
 0x316   : > { %v2631_v11 = vmul.f32 %v10145_v23, %v2519_v22  ;;  %v2635_v23 = vmul.f32 %v10149_v9, %v2523_v50  ;;  %v10151_v42 = vld [vmem:[#allocation29_spill] sm:$0xff]  ;;  %v3193_v20 = vmax.f32 %v3175_v17, 0.0 }
 0x317   : > { %v8886_v16 = vpop.permute.xlu1 %3950  ;;  %v2644_v37 = vadd.f32 %v2643_v52, %v2629_v43 }
 0x318   : > { %4646 = vperm.xlu1 %6723, %v8642_v49  }
 0x319   : > { %v8895_v54 = vpop.f32.mrb[92].mxu0  ;;  %3204 = vxpose.xlu0.b32.cont [11/16] %v3188_v62, 128  ;;  %v2524_v34 = vpop.trf.xlu0  ;;  %v2645_v0 = vadd.f32 %v2644_v37, %v2630_v26  ;;  %v10148_v26 = vld [vmem:[#allocation28_spill] sm:$0xff] }
 0x31a   : > { %v8903_v45 = vpop.f32.mrb[93].mxu0  ;;  %v2634_v62 = vmul.f32 %v10148_v26, %v2522_v31  ;;  %v6219_v26 = vld [vmem:[%s6822_s8 + $0x738] sm:$0xff] }
 0x31b   : > { %v8899_v39 = vpop.permute.xlu1 %3955  ;;  %v8905_v43 = vpop.f32.mrb[94].mxu0  ;;  %v2646_v22 = vadd.f32 %v2645_v0, %v2631_v11  ;;  %v6216_v0 = vld [vmem:[%s6822_s8 + $0x720] sm:$0xff] }
 0x31c   : > { %4651 = vperm.xlu1 %6723, %v8658_v4   ;;  %v8908_v56 = vpop.f32.mrb[95].mxu0  ;;  %v5122_v31 = vpack.c.bf16 %v6217_v44, %v6216_v0  ;;  %v3192_v44 = vmax.f32 %v3172_v3, 0.0 }
 0x31d   : > { %3205 = vxpose.xlu0.b32.cont [12/16] %v3189_v46, 128  ;;  %v2525_v52 = vpop.trf.xlu0  ;;  %v2647_v59 = vadd.f32 %v2646_v22, %v2632_v18  ;;  %v2636_v18 = vmul.f32 %v10151_v42, %v2524_v34  ;;  %v6218_v22 = vld [vmem:[%s6822_s8 + $0x730] sm:$0xff]  ;;  %v3464_v42 = vadd.f32 %v8504_v58, %v8517_v61 }
 0x31e   : > { %6668 = vmatprep.mubr.msk.bf16.mxu0 %vm268_vm1, %v5122_v31 }
 0x31f   : > { %v8910_v24 = vpop.permute.xlu1 %3960  ;;  %v2648_v37 = vadd.f32 %v2647_v59, %v2633_v48  ;;  %v3191_v48 = vmax.f32 %v3167_v35, 0.0  ;;  %v5123_v59 = vpack.c.bf16 %v6219_v26, %v6218_v22  ;;  %v3526_v61 = vmax.f32 %v3464_v42, 0.0 }
 0x320   : > { %4656 = vperm.xlu1 %6723, %v8674_v57  }
 0x321   : > { %3206 = vxpose.xlu0.b32.cont [13/16] %v3190_v15, 128  ;;  %v2526_v11 = vpop.trf.xlu0  ;;  %v2649_v46 = vadd.f32 %v2648_v37, %v2634_v62  ;;  %v10152_v15 = vld [vmem:[#allocation30_spill] sm:$0xff]  ;;  %6669 = vmatmul.mubr.msk.bf16.gmra.mrb[116].mxu0 %vm268_vm1, %v5123_v59  ;;  %v10154_v37 = vld [vmem:[#allocation33_spill] sm:$0xff] }
 0x322   : > { %v2637_v9 = vmul.f32 %v10152_v15, %v2525_v52  ;;  %v2638_v0 = vmul.f32 %v10154_v37, %v2526_v11  ;;  %v10157_v11 = vld [vmem:[#allocation35_spill] sm:$0xff] }
 0x323   : > { %v8917_v10 = vpop.permute.xlu1 %3965  ;;  %v2650_v50 = vadd.f32 %v2649_v46, %v2635_v23  ;;  %v10155_v23 = vld [vmem:[#allocation34_spill] sm:$0xff] }
 0x324   : > { %10150 = vst [vmem:[#allocation49_spill] sm:$0xff] %v8917_v10  ;;  %4661 = vperm.xlu1 %6723, %v8690_v29  }
 0x325   : > { %3207 = vxpose.xlu0.b32.cont [14/16] %v3191_v48, 128  ;;  %v2527_v10 = vpop.trf.xlu0  ;;  %v2651_v34 = vadd.f32 %v2650_v50, %v2636_v18 }
 0x326   : > { %v2639_v52 = vmul.f32 %v10155_v23, %v2527_v10  ;;  %v8937_v46 = vpop.f32.mrb[80].mxu1  ;;  %v6220_v23 = vld [vmem:[%s6822_s8 + $0x740] sm:$0xff] }
 0x327   : > { %v8929_v62 = vpop.permute.xlu1 %3970  ;;  %v2652_v35 = vadd.f32 %v2651_v34, %v2637_v9  ;;  %v8945_v3 = vpop.f32.mrb[81].mxu1  ;;  %v10159_v34 = vld [vmem:[#allocation37_spill] sm:$0xff] }
 0x328   : > { %10153 = vst [vmem:[#allocation23_spill] sm:$0xff] %v8929_v62  ;;  %4666 = vperm.xlu1 %6723, %v8706_v19   ;;  %v8947_v48 = vpop.f32.mrb[82].mxu1  ;;  %v6240_v62 = vld [vmem:[%s6822_s8 + $0x790] sm:$0xff] }
 0x329   : > { %3208 = vxpose.xlu0.b32.cont [15/16] %v3192_v44, 128  ;;  %v2528_v31 = vpop.trf.xlu0  ;;  %v2653_v18 = vadd.f32 %v2652_v35, %v2638_v0  ;;  %v8949_v59 = vpop.f32.mrb[83].mxu1  ;;  %v3467_v0 = vadd.f32 %v8504_v58, %v8521_v32 }
 0x32a   : > { %v2640_v26 = vmul.f32 %v10157_v11, %v2528_v31  ;;  %v6223_v11 = vld [vmem:[%s6822_s8 + $0x758] sm:$0xff] }
 0x32b   : > { %v8941_v22 = vpop.permute.xlu1 %3975  ;;  %v2654_v10 = vadd.f32 %v2653_v18, %v2639_v52  ;;  %v6221_v52 = vld [vmem:[%s6822_s8 + $0x748] sm:$0xff]  ;;  %v6222_v18 = vld [vmem:[%s6822_s8 + $0x750] sm:$0xff] }
 0x32c   : > { %10156 = vst [vmem:[#allocation24_spill] sm:$0xff] %v8941_v22  ;;  %4671 = vperm.xlu1 %6723, %v8720_v2   ;;  %v5124_v31 = vpack.c.bf16 %v6221_v52, %v6220_v23  ;;  %v5125_v32 = vpack.c.bf16 %v6223_v11, %v6222_v18  ;;  %v10168_v22 = vld [vmem:[#allocation41_spill] sm:$0xff] }
 0x32d   : > { %3209 = vxpose.xlu0.b32.end [16/16] %v3193_v20, 128  ;;  %v2529_v50 = vpop.trf.xlu0  ;;  %v2655_v9 = vadd.f32 %v2654_v10, %v2640_v26  ;;  %v3472_v26 = vadd.f32 %v8509_v47, %v8504_v58  ;;  %v3527_v20 = vmax.f32 %v3467_v0, 0.0  ;;  %v3475_v47 = vadd.f32 %v8519_v8, %v8504_v58 }
 0x32e   : > { %v2641_v37 = vmul.f32 %v10159_v34, %v2529_v50  ;;  %6672 = vmatprep.mubr.msk.bf16.mxu0 %vm268_vm1, %v5124_v31  ;;  %v8988_v8 = vstv %s2663_s14 }
 0x32f   : > { %v8951_v15 = vpop.permute.xlu1 %3980  ;;  %6673 = vmatmul.mubr.msk.bf16.gmra.mrb[120].mxu0 %vm268_vm1, %v5125_v32  ;;  %v3528_v34 = vmax.f32 %v3472_v26, 0.0  ;;  %v3529_v18 = vmax.f32 %v3475_v47, 0.0  ;;  %v6740_v47 = vld [vmem:[%s9824_s1] sm:$0x1f]  }
 0x330   : > { %10158 = vst [vmem:[#allocation25_spill] sm:$0xff] %v8951_v15  ;;  %4676 = vperm.xlu1 %6723, %v8736_v6   ;;  %v2656_v44 = vadd.f32 %v2655_v9, %v2641_v37  ;;  %6713 = vmatprep.subr.msk.bf16.mxu1 %vm293_vm0, %v6740_v47  ;;  %v6239_v15 = vld [vmem:[%s6822_s8 + $0x788] sm:$0xff] }
 0x331   : > { %3542 = vxpose.xlu0.b32.start [1/16] %v3526_v61, 128  ;;  %v8957_v17 = vpop.trf.xlu0 }
 0x332   : > { %v2657_v42 = vrot.slane %v2656_v44, 4 }
 0x333   : > { %v8959_v35 = vpop.permute.xlu1 %3985 }
 0x334   : > { %10160 = vst [vmem:[#allocation54_spill] sm:$0xff] %v8959_v35  ;;  %4681 = vperm.xlu1 %6723, %v8751_v1   ;;  %v2658_v10 = vadd.f32 %v2657_v42, %v2656_v44  ;;  %v8977_v0 = vpop.f32.mrb[84].mxu1  ;;  %v3480_v44 = vadd.f32 %v8504_v58, %v8558_v21 }
 0x335   : > { %3543 = vxpose.xlu0.b32.cont [2/16] %v3527_v20, 128  ;;  %v8969_v61 = vpop.trf.xlu0  ;;  %v8986_v31 = vpop.f32.mrb[85].mxu1 }
 0x336   : > { %v2659_v9 = vrot.slane %v2658_v10, 2  ;;  %v8990_v11 = vpop.f32.mrb[86].mxu1  ;;  %v3530_v20 = vmax.f32 %v3480_v44, 0.0  ;;  %v6224_v44 = vld [vmem:[%s6822_s8 + $0x760] sm:$0xff] }
 0x337   : > { %v8971_v50 = vpop.permute.xlu1 %3990  ;;  %v8992_v21 = vpop.f32.mrb[87].mxu1 }
 0x338   : > { %10161 = vst [vmem:[#allocation57_spill] sm:$0xff] %v8971_v50  ;;  %4686 = vperm.xlu1 %6723, %v8767_v14   ;;  %v2660_v37 = vadd.f32 %v2659_v9, %v2658_v10 }
 0x339   : > { %3544 = vxpose.xlu0.b32.cont [3/16] %v3528_v34, 128  ;;  %v8981_v23 = vpop.trf.xlu0  ;;  %v3483_v34 = vadd.f32 %v8504_v58, %v8562_v33  ;;  %v3488_v33 = vadd.f32 %v8549_v13, %v8504_v58  ;;  %v3496_v13 = vadd.f32 %v8504_v58, %v8603_v40 }
 0x33a   : > { %v2661_v42 = vrot.slane %v2660_v37, 1 }
 0x33b   : > { %v8983_v52 = vpop.permute.xlu1 %3995 }
 0x33c   : > { %10162 = vst [vmem:[#allocation64_spill] sm:$0xff] %v8983_v52  ;;  %4691 = vperm.xlu1 %6723, %v8781_v30   ;;  %v2662_v26 = vadd.f32 %v2661_v42, %v2660_v37  ;;  %v6225_v42 = vld [vmem:[%s6822_s8 + $0x768] sm:$0xff]  ;;  %v6227_v52 = vld [vmem:[%s6822_s8 + $0x778] sm:$0xff] }
 0x33d   : > { %3545 = vxpose.xlu0.b32.cont [4/16] %v3529_v18, 128  ;;  %v2865_v32 = vpop.trf.xlu0  ;;  %v5515_v18 = vsel %vm293_vm0, %v6740_v47, 0  ;;  %v3532_v47 = vmax.f32 %v3488_v33, 0.0  ;;  %v3499_v33 = vadd.f32 %v8504_v58, %v8612_v28  ;;  %v9052_v28 = vld [vmem:[%s9825_s2] ss:$0 sm:$0xff] }
 0x33e   : > { %v2665_v10 = vadd.f32 %v8988_v8, %v2662_v26  ;;  %v5126_v26 = vpack.c.bf16 %v6225_v42, %v6224_v44  ;;  %6681 = vmatpush3.bf16.msra.mxu1 %v5515_v18  ;;  %v3491_v44 = vadd.f32 %v8560_v55, %v8504_v58  ;;  %v3534_v55 = vmax.f32 %v3496_v13, 0.0  ;;  %v6241_v58 = vld [vmem:[%s6822_s8 + $0x798] sm:$0xff] }
 0x33f   : > { %v8995_v9 = vpop.permute.xlu1 %4000  ;;  %v2974_v13 = vmul.f32 %v10168_v22, %v8957_v17  ;;  %v2977_v22 = vmul.f32 %v8288_v27, %v2865_v32 }
 0x340   : > { %10163 = vst [vmem:[#allocation62_spill] sm:$0xff] %v8995_v9  ;;  %4696 = vperm.xlu1 %6723, %v8797_v38   ;;  %2666 = vst [vmem:[%s7778_s4 + $0x6] sm:$0x1] %v2665_v10  ;;  %v6226_v9 = vld [vmem:[%s6822_s8 + $0x770] sm:$0xff]  ;;  %v3531_v10 = vmax.f32 %v3483_v34, 0.0  ;;  %6676 = vmatprep.mubr.msk.bf16.mxu0 %vm268_vm1, %v5126_v26  ;;  %v3533_v34 = vmax.f32 %v3491_v44, 0.0 }
 0x341   : > { %3546 = vxpose.xlu0.b32.cont [5/16] %v3530_v20, 128  ;;  %v2866_v37 = vpop.trf.xlu0  ;;  %v5127_v50 = vpack.c.bf16 %v6227_v52, %v6226_v9 }
 0x342   : > { %v9020_v42 = vpop.f32.mrb[88].mxu1 }
 0x343   : > { %v9013_v35 = vpop.permute.xlu1 %4005  ;;  %6677 = vmatmul.mubr.msk.bf16.gmra.mrb[124].mxu0 %vm268_vm1, %v5127_v50  ;;  %v9027_v50 = vpop.f32.mrb[89].mxu1 }
 0x344   : > { %4701 = vperm.xlu1 %6723, %v8814_v63   ;;  %10164 = vst [vmem:[#allocation28_spill] sm:$0xff] %v9013_v35  ;;  %v9029_v18 = vpop.f32.mrb[90].mxu1  ;;  %v6238_v35 = vld [vmem:[%s6822_s8 + $0x780] sm:$0xff] }
 0x345   : > { %3547 = vxpose.xlu0.b32.cont [6/16] %v3531_v10, 128  ;;  %v2867_v20 = vpop.trf.xlu0  ;;  %v9031_v26 = vpop.f32.mrb[91].mxu1  ;;  %v10166_v10 = vld [vmem:[#allocation42_spill] sm:$0xff] }
 0x347   : > { %v9024_v9 = vpop.permute.xlu1 %4010 }
 0x348   : > { %4706 = vperm.xlu1 %6723, %v8836_v7   ;;  %10165 = vst [vmem:[#allocation27_spill] sm:$0xff] %v9024_v9 }
 0x349   : > { %3548 = vxpose.xlu0.b32.cont [7/16] %v3532_v47, 128  ;;  %v2868_v52 = vpop.trf.xlu0  ;;  %v2975_v47 = vmul.f32 %v10166_v10, %v8969_v61  ;;  %v3504_v61 = vadd.f32 %v9052_v28, %v8596_v36  ;;  %v5469_v10 = vpack.c.bf16 %v6241_v58, %v6240_v62  ;;  %v3507_v36 = vadd.f32 %v9052_v28, %v8610_v12 }
 0x34b   : > { %v9038_v9 = vpop.permute.xlu1 %4015 }
 0x34c   : > { %4711 = vperm.xlu1 %6723, %v8848_v53   ;;  %10167 = vst [vmem:[#allocation29_spill] sm:$0xff] %v9038_v9  ;;  %v2990_v9 = vadd.f32 %v2975_v47, %v2974_v13  ;;  %v3537_v13 = vmax.f32 %v3507_v36, 0.0 }
 0x34d   : > { %3549 = vxpose.xlu0.b32.cont [8/16] %v3533_v34, 128  ;;  %v2869_v40 = vpop.trf.xlu0  ;;  %v2976_v34 = vmul.f32 %v8275_v41, %v8981_v23  ;;  %v10170_v23 = vld [vmem:[#allocation44_spill] sm:$0xff] }
 0x34e   : > { %v2979_v27 = vmul.f32 %v10170_v23, %v2867_v20  ;;  %v10172_v20 = vld [vmem:[#allocation45_spill] sm:$0xff]  ;;  %v6243_v23 = vld [vmem:[%s6822_s8 + $0x7a8] sm:$0xff] }
 0x34f   : > { %v9060_v17 = vpop.permute.xlu1 %4288 }
 0x350   : > { %4984 = vperm.xlu1 %6723, %v8608_v5   ;;  %v5468_v5 = vpack.c.bf16 %v6239_v15, %v6238_v35  ;;  %v2978_v15 = vmul.f32 %v8299_v51, %v2866_v37  ;;  %10169 = vst [vmem:[#allocation30_spill] sm:$0xff] %v9060_v17  ;;  %v3536_v35 = vmax.f32 %v3504_v61, 0.0  ;;  %v10171_v51 = vld [vmem:[#allocation43_spill] sm:$0xff] }
 0x351   : > { %3550 = vxpose.xlu0.b32.cont [9/16] %v3534_v55, 128  ;;  %v2870_v44 = vpop.trf.xlu0  ;;  %v3535_v55 = vmax.f32 %v3499_v33, 0.0  ;;  %v3512_v33 = vadd.f32 %v9052_v28, %v8669_v25  ;;  %v2980_v37 = vmul.f32 %v10171_v51, %v2868_v52 }
 0x352   : > { %6682 = vmatprep.mubr.msk.bf16.mxu1 %vm268_vm1, %v5468_v5  ;;  %v2981_v5 = vmul.f32 %v10172_v20, %v2869_v40 }
 0x353   : > { %6683 = vmatmul.mubr.msk.bf16.vlgmr.msra.gmra.mrb[112].mxu1 %vm268_vm1, %v5469_v10  ;;  %v9077_v58 = vpop.permute.xlu1 %4293  ;;  %v3538_v61 = vmax.f32 %v3512_v33, 0.0 }
 0x354   : > { %4989 = vperm.xlu1 %6723, %v8622_v60   ;;  %v2991_v60 = vadd.f32 %v2990_v9, %v2976_v34  ;;  %10173 = vst [vmem:[#allocation33_spill] sm:$0xff] %v9077_v58 }
 0x355   : > { %3551 = vxpose.xlu0.b32.cont [10/16] %v3535_v55, 128  ;;  %v2871_v41 = vpop.trf.xlu0 }
 0x356   : > { %v2992_v62 = vadd.f32 %v2991_v60, %v2977_v22  ;;  %v9066_v32 = vpop.f32.mrb[92].mxu1  ;;  %v10175_v22 = vld [vmem:[#allocation74_spill] sm:$0xff] }
 0x357   : > { %v3515_v60 = vadd.f32 %v9052_v28, %v10175_v22  ;;  %v9088_v33 = vpop.permute.xlu1 %4298  ;;  %v9104_v22 = vld [vmem:[%s9825_s2] ss:$0 sm:$0xff] }
 0x358   : > { %4994 = vperm.xlu1 %6723, %v8642_v49   ;;  %v2993_v47 = vadd.f32 %v2992_v62, %v2978_v15  ;;  %v9072_v49 = vpop.f32.mrb[93].mxu1  ;;  %v6242_v62 = vld [vmem:[%s6822_s8 + $0x7a0] sm:$0xff]  ;;  %10177 = vst [vmem:[#allocation34_spill] sm:$0xff] %v9088_v33  ;;  %v3863_v58 = vadd.f32 %v9104_v22, %v8908_v56  ;;  %v9272_v56 = vld [vmem:[%s9826_s3 + $0x30] sm:$0xff] }
 0x359   : > { %3552 = vxpose.xlu0.b32.cont [11/16] %v3536_v35, 128  ;;  %v2872_v9 = vpop.trf.xlu0  ;;  %v9074_v34 = vpop.f32.mrb[94].mxu1  ;;  %v10176_v35 = vld [vmem:[#allocation51_spill] sm:$0xff]  ;;  %v3539_v20 = vmax.f32 %v3515_v60, 0.0 }
 0x35a   : > { %v2994_v12 = vadd.f32 %v2993_v47, %v2979_v27  ;;  %v9079_v25 = vpop.f32.mrb[95].mxu1  ;;  %v2983_v40 = vmul.f32 %v10176_v35, %v2871_v41  ;;  %v10178_v47 = vld [vmem:[#allocation52_spill] sm:$0xff] }
 0x35b   : > { %v2984_v51 = vmul.f32 %v10178_v47, %v2872_v9  ;;  %v9108_v35 = vpop.permute.xlu1 %4303  ;;  %v10185_v47 = vld [vmem:[#allocation73_spill] sm:$0xff] }
 0x35c   : > { %4999 = vperm.xlu1 %6723, %v8658_v4   ;;  %v2995_v52 = vadd.f32 %v2994_v12, %v2980_v37  ;;  %v10174_v4 = vld [vmem:[#allocation47_spill] sm:$0xff]  ;;  %v6244_v37 = vld [vmem:[%s6822_s8 + $0x7b0] sm:$0xff]  ;;  %10183 = vst [vmem:[#allocation35_spill] sm:$0xff] %v9108_v35 }
 0x35d   : > { %3553 = vxpose.xlu0.b32.cont [12/16] %v3537_v13, 128  ;;  %v2873_v55 = vpop.trf.xlu0  ;;  %v2982_v10 = vmul.f32 %v10174_v4, %v2870_v44  ;;  %v5470_v44 = vpack.c.bf16 %v6243_v23, %v6242_v62  ;;  %v10179_v13 = vld [vmem:[#allocation65_spill] sm:$0xff]  ;;  %v10184_v62 = vld [vmem:[#allocation59_spill] sm:$0xff] }
 0x35e   : > { %v2996_v15 = vadd.f32 %v2995_v52, %v2981_v5  ;;  %v3520_v12 = vadd.f32 %v9052_v28, %v10179_v13  ;;  %v9220_v35 = vld [vmem:[%s9826_s3 + $0x10] sm:$0xff] }
 0x35f   : > { %6686 = vmatprep.mubr.msk.bf16.mxu1 %vm268_vm1, %v5470_v44  ;;  %v10186_v44 = vld [vmem:[#allocation60_spill] sm:$0xff] }
 0x360   : > { %5004 = vperm.xlu1 %6723, %v8674_v57   ;;  %v2997_v27 = vadd.f32 %v2996_v15, %v2982_v10  ;;  %v6245_v57 = vld [vmem:[%s6822_s8 + $0x7b8] sm:$0xff]  ;;  %v10181_v10 = vld [vmem:[#allocation55_spill] sm:$0xff]  ;;  %v3540_v60 = vmax.f32 %v3520_v12, 0.0 }
 0x361   : > { %3554 = vxpose.xlu0.b32.cont [13/16] %v3538_v61, 128  ;;  %v2874_v36 = vpop.trf.xlu0  ;;  %v5471_v5 = vpack.c.bf16 %v6245_v57, %v6244_v37  ;;  %v10180_v61 = vld [vmem:[#allocation53_spill] sm:$0xff]  ;;  %v10182_v15 = vld [vmem:[#allocation79_spill] sm:$0xff] }
 0x362   : > { %v2998_v41 = vadd.f32 %v2997_v27, %v2983_v40  ;;  %v2985_v52 = vmul.f32 %v10180_v61, %v2873_v55  ;;  %v3523_v55 = vadd.f32 %v9052_v28, %v10182_v15  ;;  %v9123_v61 = vpop.permute.xlu1 %4308  ;;  %v6246_v15 = vld [vmem:[%s6822_s8 + $0x7c0] sm:$0xff] }
 0x363   : > { %6687 = vmatmul.mubr.msk.bf16.gmra.mrb[116].mxu1 %vm268_vm1, %v5471_v5  ;;  %10187 = vst [vmem:[#allocation37_spill] sm:$0xff] %v9123_v61 }
 0x364   : > { %5009 = vperm.xlu1 %6723, %v8690_v29   ;;  %v2999_v9 = vadd.f32 %v2998_v41, %v2984_v51  ;;  %v2986_v29 = vmul.f32 %v10181_v10, %v2874_v36  ;;  %v3812_v36 = vadd.f32 %v9104_v22, %v10185_v47  ;;  %v3541_v28 = vmax.f32 %v3523_v55, 0.0  ;;  %v6247_v55 = vld [vmem:[%s6822_s8 + $0x7c8] sm:$0xff]  ;;  %v6249_v47 = vld [vmem:[%s6822_s8 + $0x7d8] sm:$0xff] }
 0x365   : > { %3555 = vxpose.xlu0.b32.cont [14/16] %v3539_v20, 128  ;;  %v2875_v4 = vpop.trf.xlu0 }
 0x366   : > { %v3000_v40 = vadd.f32 %v2999_v9, %v2985_v52  ;;  %v2987_v23 = vmul.f32 %v10184_v62, %v2875_v4  ;;  %v9111_v27 = vpop.f32.mrb[96].mxu0  ;;  %v3874_v5 = vmax.f32 %v3812_v36, 0.0  ;;  %v10188_v4 = vld [vmem:[#allocation61_spill] sm:$0xff]  ;;  %v10189_v9 = vld [vmem:[#allocation40_spill] sm:$0xff]  ;;  %v5472_v62 = vpack.c.bf16 %v6247_v55, %v6246_v15 }
 0x367   : > { %v9117_v57 = vpop.f32.mrb[97].mxu0  ;;  %v3815_v10 = vadd.f32 %v9104_v22, %v10189_v9  ;;  %v10190_v36 = vld [vmem:[#allocation32_spill] sm:$0xff] }
 0x368   : > { %5014 = vperm.xlu1 %6723, %v8706_v19   ;;  %v3001_v51 = vadd.f32 %v3000_v40, %v2986_v29  ;;  %v9119_v13 = vpop.f32.mrb[98].mxu0  ;;  %6690 = vmatprep.mubr.msk.bf16.mxu1 %vm268_vm1, %v5472_v62 }
 0x369   : > { %3556 = vxpose.xlu0.b32.cont [15/16] %v3540_v60, 128  ;;  %v2876_v19 = vpop.trf.xlu0  ;;  %v9121_v20 = vpop.f32.mrb[99].mxu0 }
 0x36a   : > { %v2988_v37 = vmul.f32 %v10186_v44, %v2876_v19  ;;  %v3002_v12 = vadd.f32 %v3001_v51, %v2987_v23  ;;  %v6248_v23 = vld [vmem:[%s6822_s8 + $0x7d0] sm:$0xff]  ;;  %v3820_v19 = vadd.f32 %v10190_v36, %v9104_v22  ;;  %v3875_v51 = vmax.f32 %v3815_v10, 0.0  ;;  %v9138_v44 = vpop.permute.xlu1 %4313 }
 0x36b   : > { %10191 = vst [vmem:[#allocation42_spill] sm:$0xff] %v9138_v44 }
 0x36c   : > { %5019 = vperm.xlu1 %6723, %v8720_v2   ;;  %v3003_v52 = vadd.f32 %v3002_v12, %v2988_v37 }
 0x36d   : > { %3557 = vxpose.xlu0.b32.end [16/16] %v3541_v28, 128  ;;  %v2877_v41 = vpop.trf.xlu0 }
 0x36e   : > { %v2989_v2 = vmul.f32 %v10188_v4, %v2877_v41 }
 0x370   : > { %5024 = vperm.xlu1 %6723, %v8736_v6   ;;  %v3004_v29 = vadd.f32 %v3003_v52, %v2989_v2  ;;  %v5473_v6 = vpack.c.bf16 %v6249_v47, %v6248_v23  ;;  %v10193_v2 = vld [vmem:[#allocation14_spill] sm:$0xff] }
 0x371   : > { %3890 = vxpose.xlu0.b32.start [1/16] %v3874_v5, 128  ;;  %v9129_v60 = vpop.trf.xlu0  ;;  %v10192_v5 = vld [vmem:[#allocation38_spill] sm:$0xff]  ;;  %v3828_v9 = vadd.f32 %v9104_v22, %v10193_v2  ;;  %v10197_v2 = vld [vmem:[#allocation36_spill] sm:$0xff] }
 0x372   : > { %v3005_v40 = vrot.slane %v3004_v29, 4  ;;  %6691 = vmatmul.mubr.msk.bf16.gmra.mrb[120].mxu1 %vm268_vm1, %v5473_v6  ;;  %v3823_v41 = vadd.f32 %v10192_v5, %v9104_v22 }
 0x373   : > { %v3878_v47 = vmax.f32 %v3828_v9, 0.0  ;;  %v3836_v9 = vadd.f32 %v10197_v2, %v9104_v22 }
 0x374   : > { %5029 = vperm.xlu1 %6723, %v8751_v1   ;;  %v3006_v37 = vadd.f32 %v3005_v40, %v3004_v29  ;;  %v3876_v1 = vmax.f32 %v3820_v19, 0.0  ;;  %v9151_v29 = vpop.permute.xlu1 %4318  ;;  %v3877_v55 = vmax.f32 %v3823_v41, 0.0  ;;  %v6252_v41 = vld [vmem:[%s6822_s8 + $0x7f0] sm:$0xff] }
 0x375   : > { %3891 = vxpose.xlu0.b32.cont [2/16] %v3875_v51, 128  ;;  %v9141_v28 = vpop.trf.xlu0  ;;  %10194 = vst [vmem:[#allocation41_spill] sm:$0xff] %v9151_v29 }
 0x376   : > { %v3007_v12 = vrot.slane %v3006_v37, 2  ;;  %v9147_v4 = vpop.f32.mrb[100].mxu0 }
 0x378   : > { %5034 = vperm.xlu1 %6723, %v8767_v14   ;;  %v3008_v52 = vadd.f32 %v3007_v12, %v3006_v37  ;;  %v9154_v14 = vpop.f32.mrb[101].mxu0  ;;  %v9164_v6 = vpop.permute.xlu1 %4323  ;;  %v6250_v12 = vld [vmem:[%s6822_s8 + $0x7e0] sm:$0xff] }
 0x379   : > { %3892 = vxpose.xlu0.b32.cont [3/16] %v3876_v1, 128  ;;  %v3212_v10 = vpop.trf.xlu0  ;;  %v9156_v40 = vpop.f32.mrb[102].mxu0  ;;  %10196 = vst [vmem:[#allocation44_spill] sm:$0xff] %v9164_v6  ;;  %v6251_v1 = vld [vmem:[%s6822_s8 + $0x7e8] sm:$0xff] }
 0x37a   : > { %v3009_v15 = vrot.slane %v3008_v52, 1  ;;  %v9158_v23 = vpop.f32.mrb[103].mxu0  ;;  %v5474_v5 = vpack.c.bf16 %v6251_v1, %v6250_v12  ;;  %v10200_v12 = vld [vmem:[#allocation50_spill] sm:$0xff]  ;;  %v10206_v6 = vld [vmem:[#allocation68_spill] sm:$0xff] }
 0x37b   : > { %v3324_v29 = vmul.f32 %v10206_v6, %v3212_v10  ;;  %v10210_v6 = vld [vmem:[#allocation20_spill] sm:$0xff] }
 0x37c   : > { %5039 = vperm.xlu1 %6723, %v8781_v30   ;;  %v3010_v62 = vadd.f32 %v3009_v15, %v3008_v52  ;;  %v10195_v30 = vld [vmem:[#allocation15_spill] sm:$0xff]  ;;  %v6253_v52 = vld [vmem:[%s6822_s8 + $0x7f8] sm:$0xff]  ;;  %6694 = vmatprep.mubr.msk.bf16.mxu1 %vm268_vm1, %v5474_v5 }
 0x37d   : > { %3893 = vxpose.xlu0.b32.cont [4/16] %v3877_v55, 128  ;;  %v3213_v36 = vpop.trf.xlu0  ;;  %v3831_v51 = vadd.f32 %v9104_v22, %v10195_v30 }
 0x37e   : > { %v3013_v19 = vadd.f32 %v3010_v62, %v8988_v8  ;;  %v9176_v62 = vpop.permute.xlu1 %4328 }
 0x37f   : > { %v3879_v15 = vmax.f32 %v3831_v51, 0.0  ;;  %10198 = vst [vmem:[#allocation43_spill] sm:$0xff] %v9176_v62  ;;  %v3844_v51 = vadd.f32 %v9104_v22, %v10200_v12  ;;  %v10204_v62 = vld [vmem:[#allocation63_spill] sm:$0xff] }
 0x380   : > { %5044 = vperm.xlu1 %6723, %v8797_v38   ;;  %3014 = vst [vmem:[%s7778_s4 + $0x7] sm:$0x1] %v3013_v19  ;;  %v5475_v38 = vpack.c.bf16 %v6253_v52, %v6252_v41 }
 0x381   : > { %3894 = vxpose.xlu0.b32.cont [5/16] %v3878_v47, 128  ;;  %v3214_v37 = vpop.trf.xlu0  ;;  %v3880_v47 = vmax.f32 %v3836_v9, 0.0 }
 0x382   : > { %6695 = vmatmul.mubr.msk.bf16.gmra.mrb[124].mxu1 %vm268_vm1, %v5475_v38  ;;  %v9195_v2 = vpop.permute.xlu1 %4333 }
 0x383   : > { %v9181_v30 = vpop.f32.mrb[104].mxu0  ;;  %10201 = vst [vmem:[#allocation45_spill] sm:$0xff] %v9195_v2 }
 0x384   : > { %5049 = vperm.xlu1 %6723, %v8814_v63   ;;  %v10199_v63 = vld [vmem:[#allocation39_spill] sm:$0xff]  ;;  %v9186_v5 = vpop.f32.mrb[105].mxu0 }
 0x385   : > { %3895 = vxpose.xlu0.b32.cont [6/16] %v3879_v15, 128  ;;  %v3215_v55 = vpop.trf.xlu0  ;;  %v3839_v19 = vadd.f32 %v10199_v63, %v9104_v22  ;;  %v9193_v52 = vpop.f32.mrb[106].mxu0  ;;  %v3882_v15 = vmax.f32 %v3844_v51, 0.0  ;;  %v9205_v63 = vld [vmem:[%s9826_s3 + $0x8] sm:$0xff]  ;;  %v3322_v51 = vmul.f32 %v10204_v62, %v9129_v60 }
 0x386   : > { %v9197_v9 = vpop.f32.mrb[107].mxu0 }
 0x387   : > { %v3881_v41 = vmax.f32 %v3839_v19, 0.0  ;;  %v10203_v19 = vld [vmem:[#allocation67_spill] sm:$0xff] }
 0x388   : > { %5054 = vperm.xlu1 %6723, %v8836_v7   ;;  %v9191_v7 = vld [vmem:[%s9826_s3] sm:$0xff]  ;;  %v3323_v12 = vmul.f32 %v10203_v19, %v9141_v28 }
 0x389   : > { %3896 = vxpose.xlu0.b32.cont [7/16] %v3880_v47, 128  ;;  %v3216_v1 = vpop.trf.xlu0 }
 0x38a   : > { %v3338_v28 = vadd.f32 %v3323_v12, %v3322_v51 }
 0x38c   : > { %5059 = vperm.xlu1 %6723, %v8848_v53   ;;  %v10202_v53 = vld [vmem:[#allocation21_spill] sm:$0xff]  ;;  %v3339_v62 = vadd.f32 %v3338_v28, %v3324_v29  ;;  %v3860_v29 = vadd.f32 %v9104_v22, %v8903_v45 }
 0x38d   : > { %3897 = vxpose.xlu0.b32.cont [8/16] %v3881_v41, 128  ;;  %v3217_v38 = vpop.trf.xlu0  ;;  %v3847_v47 = vadd.f32 %v9104_v22, %v10202_v53  ;;  %v9211_v41 = vpop.permute.xlu1 %4338  ;;  %v10207_v53 = vld [vmem:[#allocation18_spill] sm:$0xff] }
 0x38e   : > { %10205 = vst [vmem:[#allocation47_spill] sm:$0xff] %v9211_v41  ;;  %v3852_v44 = vadd.f32 %v10207_v53, %v9104_v22  ;;  %v10209_v41 = vld [vmem:[#allocation71_spill] sm:$0xff]  ;;  %v3855_v53 = vadd.f32 %v10210_v6, %v9104_v22 }
 0x38f   : > { %v3883_v61 = vmax.f32 %v3847_v47, 0.0  ;;  %v3326_v33 = vmul.f32 %v10209_v41, %v3214_v37  ;;  %v9230_v47 = vld [vmem:[%s9826_s3 + $0x18] sm:$0xff]  ;;  %v10213_v41 = vld [vmem:[#allocation75_spill] sm:$0xff] }
 0x390   : > { %5332 = vperm.xlu1 %6723, %v9191_v7   ;;  %v3884_v10 = vmax.f32 %v3852_v44, 0.0  ;;  %v3328_v28 = vmul.f32 %v10213_v41, %v3216_v1  ;;  %v3885_v6 = vmax.f32 %v3855_v53, 0.0 }
 0x391   : > { %3898 = vxpose.xlu0.b32.cont [9/16] %v3882_v15, 128  ;;  %v3218_v2 = vpop.trf.xlu0  ;;  %v10208_v15 = vld [vmem:[#allocation69_spill] sm:$0xff]  ;;  %v9232_v17 = vpop.permute.xlu1 %4343 }
 0x392   : > { %v3325_v19 = vmul.f32 %v10208_v15, %v3213_v36  ;;  %10211 = vst [vmem:[#allocation74_spill] sm:$0xff] %v9232_v17  ;;  %v10212_v36 = vld [vmem:[#allocation76_spill] sm:$0xff] }
 0x393   : > { %v10217_v17 = vld [vmem:[#allocation4_spill] sm:$0xff] }
 0x394   : > { %5337 = vperm.xlu1 %6723, %v9205_v63   ;;  %v3340_v12 = vadd.f32 %v3339_v62, %v3325_v19  ;;  %v9246_v19 = vld [vmem:[%s9826_s3 + $0x20] sm:$0xff]  ;;  %v3330_v53 = vmul.f32 %v10217_v17, %v3218_v2  ;;  %v3868_v17 = vadd.f32 %v8895_v54, %v9104_v22  ;;  %v3887_v2 = vmax.f32 %v3863_v58, 0.0  ;;  %v9284_v58 = vld [vmem:[%s9826_s3 + $0x38] sm:$0xff] }
 0x395   : > { %3899 = vxpose.xlu0.b32.cont [10/16] %v3883_v61, 128  ;;  %v3219_v60 = vpop.trf.xlu0  ;;  %v3327_v61 = vmul.f32 %v10212_v36, %v3215_v55  ;;  %v10215_v36 = vld [vmem:[#allocation3_spill] sm:$0xff]  ;;  %v3871_v54 = vadd.f32 %v8905_v43, %v9104_v22 }
 0x396   : > { %v9235_v51 = vpop.f32.mrb[108].mxu0  ;;  %v3341_v37 = vadd.f32 %v3340_v12, %v3326_v33  ;;  %v3329_v45 = vmul.f32 %v10215_v36, %v3217_v38  ;;  %v3886_v33 = vmax.f32 %v3860_v29, 0.0  ;;  %v9253_v12 = vpop.permute.xlu1 %4348 }
 0x397   : > { %v9241_v15 = vpop.f32.mrb[109].mxu0  ;;  %10216 = vst [vmem:[#allocation52_spill] sm:$0xff] %v9253_v12  ;;  %v10219_v12 = vld [vmem:[#allocation6_spill] sm:$0xff] }
 0x398   : > { %5342 = vperm.xlu1 %6723, %v9220_v35   ;;  %v9248_v55 = vpop.f32.mrb[110].mxu0  ;;  %v3342_v62 = vadd.f32 %v3341_v37, %v3327_v61  ;;  %v9262_v61 = vld [vmem:[%s9826_s3 + $0x28] sm:$0xff]  ;;  %v10218_v37 = vld [vmem:[#allocation5_spill] sm:$0xff] }
 0x399   : > { %3900 = vxpose.xlu0.b32.cont [11/16] %v3884_v10, 128  ;;  %v3220_v44 = vpop.trf.xlu0  ;;  %10214 = vst [vmem:[#allocation51_spill] sm:$0xff] %v9248_v55  ;;  %v9251_v10 = vpop.f32.mrb[111].mxu0  ;;  %v3331_v29 = vmul.f32 %v10218_v37, %v3219_v60  ;;  %v10221_v60 = vld [vmem:[#allocation58_spill] sm:$0xff] }
 0x39a   : > { %v3343_v41 = vadd.f32 %v3342_v62, %v3328_v28  ;;  %v3332_v28 = vmul.f32 %v10219_v12, %v3220_v44  ;;  %v9274_v62 = vpop.permute.xlu1 %4353  ;;  %v10222_v44 = vld [vmem:[#allocation7_spill] sm:$0xff] }
 0x39b   : > { %10220 = vst [vmem:[#allocation65_spill] sm:$0xff] %v9274_v62 }
 0x39c   : > { %5347 = vperm.xlu1 %6723, %v9230_v47   ;;  %v3344_v38 = vadd.f32 %v3343_v41, %v3329_v45 }
 0x39d   : > { %3901 = vxpose.xlu0.b32.cont [12/16] %v3885_v6, 128  ;;  %v3221_v1 = vpop.trf.xlu0 }
 0x39e   : > { %v3345_v36 = vadd.f32 %v3344_v38, %v3330_v53  ;;  %v3888_v38 = vmax.f32 %v3868_v17, 0.0 }
 0x3a0   : > { %5352 = vperm.xlu1 %6723, %v9246_v19   ;;  %v3346_v45 = vadd.f32 %v3345_v36, %v3331_v29  ;;  %v10223_v29 = vld [vmem:[#allocation8_spill] sm:$0xff] }
 0x3a1   : > { %3902 = vxpose.xlu0.b32.cont [13/16] %v3886_v33, 128  ;;  %v3222_v6 = vpop.trf.xlu0  ;;  %v3333_v33 = vmul.f32 %v10221_v60, %v3221_v1 }
 0x3a2   : > { %v3347_v53 = vadd.f32 %v3346_v45, %v3332_v28  ;;  %v3334_v12 = vmul.f32 %v10222_v44, %v3222_v6  ;;  %v4160_v28 = vadd.f32 %v9104_v22, %v8945_v3  ;;  %v10226_v45 = vld [vmem:[#allocation56_spill] sm:$0xff]  ;;  %v3889_v44 = vmax.f32 %v3871_v54, 0.0 }
 0x3a3   : > { %v4163_v54 = vadd.f32 %v9104_v22, %v8949_v59  ;;  %v9325_v59 = vld [vmem:[%s9826_s3 + $0x50] sm:$0xff] }
 0x3a4   : > { %5357 = vperm.xlu1 %6723, %v9262_v61   ;;  %v3348_v37 = vadd.f32 %v3347_v53, %v3333_v33  ;;  %v9300_v33 = vld [vmem:[%s9826_s3 + $0x40] sm:$0xff] }
 0x3a5   : > { %3903 = vxpose.xlu0.b32.cont [14/16] %v3887_v2, 128  ;;  %v3223_v41 = vpop.trf.xlu0  ;;  %v9291_v2 = vpop.permute.xlu1 %4358 }
 0x3a6   : > { %v3335_v36 = vmul.f32 %v10223_v29, %v3223_v41  ;;  %10225 = vst [vmem:[#allocation55_spill] sm:$0xff] %v9291_v2  ;;  %v3349_v17 = vadd.f32 %v3348_v37, %v3334_v12  ;;  %v10230_v29 = vld [vmem:[#allocation9_spill] sm:$0xff] }
 0x3a8   : > { %5362 = vperm.xlu1 %6723, %v9272_v56   ;;  %v3350_v3 = vadd.f32 %v3349_v17, %v3335_v36 }
 0x3a9   : > { %v9287_v1 = vpop.f32.mrb[96].mxu1  ;;  %3904 = vxpose.xlu0.b32.cont [15/16] %v3888_v38, 128  ;;  %v3224_v6 = vpop.trf.xlu0  ;;  %v4222_v38 = vmax.f32 %v4160_v28, 0.0 }
 0x3aa   : > { %10224 = vst [vmem:[#allocation53_spill] sm:$0xff] %v9287_v1  ;;  %v3336_v43 = vmul.f32 %v10226_v45, %v3224_v6  ;;  %v9295_v60 = vpop.f32.mrb[97].mxu1  ;;  %v9313_v45 = vld [vmem:[%s9826_s3 + $0x48] sm:$0xff]  ;;  %v9315_v2 = vpop.permute.xlu1 %4363 }
 0x3ab   : > { %10227 = vst [vmem:[#allocation79_spill] sm:$0xff] %v9295_v60  ;;  %v9302_v41 = vpop.f32.mrb[98].mxu1  ;;  %10231 = vst [vmem:[#allocation60_spill] sm:$0xff] %v9315_v2 }
 0x3ac   : > { %5367 = vperm.xlu1 %6723, %v9284_v58   ;;  %10228 = vst [vmem:[#allocation59_spill] sm:$0xff] %v9302_v41  ;;  %v9304_v53 = vpop.f32.mrb[99].mxu1  ;;  %v3351_v37 = vadd.f32 %v3350_v3, %v3336_v43  ;;  %v4168_v43 = vadd.f32 %v8937_v46, %v9104_v22  ;;  %v9335_v46 = vld [vmem:[%s9826_s3 + $0x58] sm:$0xff] }
 0x3ad   : > { %10229 = vst [vmem:[#allocation73_spill] sm:$0xff] %v9304_v53  ;;  %3905 = vxpose.xlu0.b32.end [16/16] %v3889_v44, 128  ;;  %v3225_v12 = vpop.trf.xlu0  ;;  %v4223_v44 = vmax.f32 %v4163_v54, 0.0 }
 0x3ae   : > { %v3337_v6 = vmul.f32 %v10230_v29, %v3225_v12  ;;  %v9327_v29 = vpop.permute.xlu1 %4636 }
 0x3af   : > { %10232 = vst [vmem:[#allocation61_spill] sm:$0xff] %v9327_v29  ;;  %v9347_v29 = vld [vmem:[%s9826_s3 + $0x60] sm:$0xff] }
 0x3b0   : > { %5372 = vperm.xlu1 %6723, %v9300_v33   ;;  %v3352_v36 = vadd.f32 %v3351_v37, %v3337_v6  ;;  %v4224_v37 = vmax.f32 %v4168_v43, 0.0  ;;  %v4171_v6 = vadd.f32 %v8947_v48, %v9104_v22 }
 0x3b1   : > { %4238 = vxpose.xlu0.b32.start [1/16] %v4222_v38, 128  ;;  %v9317_v28 = vpop.trf.xlu0 }
 0x3b2   : > { %v3353_v17 = vrot.slane %v3352_v36, 4  ;;  %v4225_v48 = vmax.f32 %v4171_v6, 0.0  ;;  %v4179_v6 = vadd.f32 %v9104_v22, %v8992_v21  ;;  %v9373_v21 = vld [vmem:[%s9826_s3 + $0x70] sm:$0xff] }
 0x3b4   : > { %5377 = vperm.xlu1 %6723, %v9313_v45   ;;  %v3354_v3 = vadd.f32 %v3353_v17, %v3352_v36  ;;  %v4176_v36 = vadd.f32 %v9104_v22, %v8986_v31 }
 0x3b5   : > { %4239 = vxpose.xlu0.b32.cont [2/16] %v4223_v44, 128  ;;  %v3559_v12 = vpop.trf.xlu0 }
 0x3b6   : > { %v3355_v38 = vrot.slane %v3354_v3, 2  ;;  %v9337_v2 = vpop.f32.mrb[100].mxu1 }
 0x3b7   : > { %10233 = vst [vmem:[#allocation40_spill] sm:$0xff] %v9337_v2  ;;  %v9342_v43 = vpop.f32.mrb[101].mxu1 }
 0x3b8   : > { %5382 = vperm.xlu1 %6723, %v9325_v59   ;;  %v3356_v54 = vadd.f32 %v3355_v38, %v3354_v3  ;;  %10234 = vst [vmem:[#allocation32_spill] sm:$0xff] %v9342_v43  ;;  %v9349_v3 = vpop.f32.mrb[102].mxu1  ;;  %v9351_v38 = vpop.permute.xlu1 %4641  ;;  %v9362_v43 = vld [vmem:[%s9826_s3 + $0x68] sm:$0xff] }
 0x3b9   : > { %4240 = vxpose.xlu0.b32.cont [3/16] %v4224_v37, 128  ;;  %v3560_v17 = vpop.trf.xlu0  ;;  %10235 = vst [vmem:[#allocation38_spill] sm:$0xff] %v9349_v3  ;;  %10236 = vst [vmem:[#allocation14_spill] sm:$0xff] %v9351_v38  ;;  %v9353_v31 = vpop.f32.mrb[103].mxu1  ;;  %v4226_v37 = vmax.f32 %v4176_v36, 0.0 }
 0x3ba   : > { %v3357_v44 = vrot.slane %v3356_v54, 1  ;;  %10237 = vst [vmem:[#allocation15_spill] sm:$0xff] %v9353_v31 }
 0x3bc   : > { %5387 = vperm.xlu1 %6723, %v9335_v46   ;;  %v3358_v62 = vadd.f32 %v3357_v44, %v3356_v54  ;;  %v9365_v44 = vpop.permute.xlu1 %4646 }
 0x3bd   : > { %4241 = vxpose.xlu0.b32.cont [4/16] %v4225_v48, 128  ;;  %v3561_v2 = vpop.trf.xlu0  ;;  %10238 = vst [vmem:[#allocation36_spill] sm:$0xff] %v9365_v44  ;;  %v4187_v48 = vadd.f32 %v8990_v11, %v9104_v22  ;;  %v4192_v44 = vadd.f32 %v9104_v22, %v9027_v50  ;;  %v4195_v50 = vadd.f32 %v9104_v22, %v9031_v26 }
 0x3be   : > { %v3361_v41 = vadd.f32 %v3358_v62, %v8988_v8  ;;  %v4184_v8 = vadd.f32 %v8977_v0, %v9104_v22  ;;  %v4227_v62 = vmax.f32 %v4179_v6, 0.0 }
 0x3bf   : > { %v4229_v38 = vmax.f32 %v4187_v48, 0.0  ;;  %v4230_v31 = vmax.f32 %v4192_v44, 0.0  ;;  %v10246_v48 = vld [vmem:[#allocation10_spill] sm:$0xff]  ;;  %v4231_v44 = vmax.f32 %v4195_v50, 0.0 }
 0x3c0   : > { %5392 = vperm.xlu1 %6723, %v9347_v29   ;;  %3362 = vst [vmem:[%s7778_s4 + $0x8] sm:$0x1] %v3361_v41  ;;  %v4228_v41 = vmax.f32 %v4184_v8, 0.0  ;;  %v9383_v0 = vpop.permute.xlu1 %4651 }
 0x3c1   : > { %4242 = vxpose.xlu0.b32.cont [5/16] %v4226_v37, 128  ;;  %v3562_v54 = vpop.trf.xlu0  ;;  %v9381_v37 = vld [vmem:[%s9826_s3 + $0x78] sm:$0xff]  ;;  %10239 = vst [vmem:[#allocation39_spill] sm:$0xff] %v9383_v0 }
 0x3c4   : > { %5397 = vperm.xlu1 %6723, %v9362_v43   ;;  %v9396_v0 = vpop.permute.xlu1 %4656 }
 0x3c5   : > { %4243 = vxpose.xlu0.b32.cont [6/16] %v4227_v62, 128  ;;  %v3563_v36 = vpop.trf.xlu0  ;;  %v9385_v6 = vpop.f32.mrb[104].mxu1  ;;  %10244 = vst [vmem:[#allocation68_spill] sm:$0xff] %v9396_v0 }
 0x3c6   : > { %10240 = vst [vmem:[#allocation50_spill] sm:$0xff] %v9385_v6  ;;  %v9390_v8 = vpop.f32.mrb[105].mxu1 }
 0x3c7   : > { %10241 = vst [vmem:[#allocation21_spill] sm:$0xff] %v9390_v8  ;;  %v9392_v11 = vpop.f32.mrb[106].mxu1  ;;  %v3670_v8 = vmul.f32 %v10246_v48, %v9317_v28 }
 0x3c8   : > { %5402 = vperm.xlu1 %6723, %v9373_v21   ;;  %10242 = vst [vmem:[#allocation67_spill] sm:$0xff] %v9392_v11  ;;  %v9394_v3 = vpop.f32.mrb[107].mxu1  ;;  %v10247_v11 = vld [vmem:[#allocation77_spill] sm:$0xff]  ;;  %v9408_v0 = vpop.permute.xlu1 %4661 }
 0x3c9   : > { %4244 = vxpose.xlu0.b32.cont [7/16] %v4228_v41, 128  ;;  %v3564_v62 = vpop.trf.xlu0  ;;  %10243 = vst [vmem:[#allocation63_spill] sm:$0xff] %v9394_v3  ;;  %v10245_v41 = vld [vmem:[#allocation26_spill] sm:$0xff]  ;;  %v3672_v60 = vmul.f32 %v10247_v11, %v3560_v17  ;;  %v10250_v11 = vld [vmem:[#allocation72_spill] sm:$0xff] }
 0x3ca   : > { %v3671_v6 = vmul.f32 %v10245_v41, %v3559_v12  ;;  %v10248_v3 = vld [vmem:[#allocation78_spill] sm:$0xff] }
 0x3cb   : > { %v3673_v26 = vmul.f32 %v10248_v3, %v3561_v2  ;;  %v10249_v41 = vld [vmem:[#allocation66_spill] sm:$0xff] }
 0x3cc   : > { %5407 = vperm.xlu1 %6723, %v9381_v37   ;;  %v3674_v55 = vmul.f32 %v10249_v41, %v3562_v54  ;;  %v9420_v3 = vpop.permute.xlu1 %4666  ;;  %v10251_v54 = vld [vmem:[#allocation31_spill] sm:$0xff]  ;;  %v10253_v41 = vld [vmem:[#allocation12_spill] sm:$0xff] }
 0x3cd   : > { %4245 = vxpose.xlu0.b32.cont [8/16] %v4229_v38, 128  ;;  %v3565_v1 = vpop.trf.xlu0  ;;  %v4200_v38 = vadd.f32 %v9020_v42, %v9104_v22  ;;  %v3675_v42 = vmul.f32 %v10250_v11, %v3563_v36 }
 0x3cf   : > { %v4232_v28 = vmax.f32 %v4200_v38, 0.0  ;;  %v10252_v38 = vld [vmem:[#allocation70_spill] sm:$0xff] }
 0x3d0   : > { %5680 = vperm.xlu1 %6723, %v9191_v7   ;;  %v3686_v7 = vadd.f32 %v3671_v6, %v3670_v8  ;;  %v4208_v6 = vadd.f32 %v9104_v22, %v9072_v49  ;;  %v3676_v8 = vmul.f32 %v10251_v54, %v3564_v62  ;;  %v9435_v62 = vpop.permute.xlu1 %4671  ;;  %v10256_v54 = vld [vmem:[#allocation13_spill] sm:$0xff] }
 0x3d1   : > { %4246 = vxpose.xlu0.b32.cont [9/16] %v4230_v31, 128  ;;  %v3566_v53 = vpop.trf.xlu0 }
 0x3d2   : > { %v3687_v31 = vadd.f32 %v3686_v7, %v3672_v60  ;;  %v4234_v49 = vmax.f32 %v4208_v6, 0.0 }
 0x3d4   : > { %5685 = vperm.xlu1 %6723, %v9205_v63   ;;  %v4203_v63 = vadd.f32 %v9029_v18, %v9104_v22  ;;  %v3688_v17 = vadd.f32 %v3687_v31, %v3673_v26 }
 0x3d5   : > { %4247 = vxpose.xlu0.b32.cont [10/16] %v4231_v44, 128  ;;  %v3567_v12 = vpop.trf.xlu0  ;;  %v3677_v44 = vmul.f32 %v10252_v38, %v3565_v1 }
 0x3d6   : > { %v3689_v60 = vadd.f32 %v3688_v17, %v3674_v55  ;;  %v4233_v18 = vmax.f32 %v4203_v63, 0.0  ;;  %v3678_v55 = vmul.f32 %v10253_v41, %v3566_v53  ;;  %v10254_v63 = vld [vmem:[#allocation80_spill] sm:$0xff]  ;;  %v4216_v53 = vadd.f32 %v9066_v32, %v9104_v22 }
 0x3d7   : > { %v3679_v17 = vmul.f32 %v10254_v63, %v3567_v12  ;;  %v10257_v12 = vld [vmem:[#allocation16_spill] sm:$0xff] }
 0x3d8   : > { %5690 = vperm.xlu1 %6723, %v9220_v35   ;;  %v3690_v36 = vadd.f32 %v3689_v60, %v3675_v42  ;;  %v10255_v42 = vld [vmem:[#allocation11_spill] sm:$0xff] }
 0x3d9   : > { %v9416_v50 = vpop.f32.mrb[108].mxu1  ;;  %4248 = vxpose.xlu0.b32.cont [11/16] %v4232_v28, 128  ;;  %v3568_v2 = vpop.trf.xlu0 }
 0x3da   : > { %v9424_v35 = vpop.f32.mrb[109].mxu1  ;;  %v3691_v31 = vadd.f32 %v3690_v36, %v3676_v8  ;;  %v3680_v6 = vmul.f32 %v10255_v42, %v3568_v2 }
 0x3db   : > { %v9426_v48 = vpop.f32.mrb[110].mxu1 }
 0x3dc   : > { %5695 = vperm.xlu1 %6723, %v9230_v47   ;;  %v9429_v7 = vpop.f32.mrb[111].mxu1  ;;  %v4211_v47 = vadd.f32 %v9104_v22, %v9079_v25  ;;  %v3692_v28 = vadd.f32 %v3691_v31, %v3677_v44  ;;  %v4236_v44 = vmax.f32 %v4216_v53, 0.0  ;;  %v10260_v53 = vld [vmem:[#allocation19_spill] sm:$0xff] }
 0x3dd   : > { %4249 = vxpose.xlu0.b32.cont [12/16] %v4233_v18, 128  ;;  %v3569_v26 = vpop.trf.xlu0  ;;  %v9443_v18 = vpop.permute.xlu1 %4676 }
 0x3de   : > { %v3693_v11 = vadd.f32 %v3692_v28, %v3678_v55  ;;  %v4235_v60 = vmax.f32 %v4211_v47, 0.0  ;;  %v3681_v8 = vmul.f32 %v10256_v54, %v3569_v26  ;;  %v4508_v26 = vadd.f32 %v9104_v22, %v9117_v57  ;;  %v10259_v47 = vld [vmem:[#allocation17_spill] sm:$0xff] }
 0x3e0   : > { %5700 = vperm.xlu1 %6723, %v9246_v19   ;;  %v3694_v19 = vadd.f32 %v3693_v11, %v3679_v17  ;;  %v4570_v42 = vmax.f32 %v4508_v26, 0.0 }
 0x3e1   : > { %4250 = vxpose.xlu0.b32.cont [13/16] %v4234_v49, 128  ;;  %v3570_v1 = vpop.trf.xlu0  ;;  %v10258_v49 = vld [vmem:[#allocation48_spill] sm:$0xff] }
 0x3e2   : > { %v3695_v36 = vadd.f32 %v3694_v19, %v3680_v6  ;;  %v3682_v38 = vmul.f32 %v10257_v12, %v3570_v1 }
 0x3e4   : > { %5705 = vperm.xlu1 %6723, %v9262_v61   ;;  %v4219_v61 = vadd.f32 %v9074_v34, %v9104_v22  ;;  %v3696_v2 = vadd.f32 %v3695_v36, %v3681_v8  ;;  %v9460_v34 = vpop.permute.xlu1 %4681  ;;  %v4516_v36 = vadd.f32 %v9111_v27, %v9104_v22  ;;  %v4524_v27 = vadd.f32 %v9104_v22, %v9154_v14 }
 0x3e5   : > { %4251 = vxpose.xlu0.b32.cont [14/16] %v4235_v60, 128  ;;  %v3571_v25 = vpop.trf.xlu0 }
 0x3e6   : > { %v3683_v32 = vmul.f32 %v10258_v49, %v3571_v25  ;;  %v9450_v31 = vpop.f32.mrb[112].mxu0  ;;  %v3697_v55 = vadd.f32 %v3696_v2, %v3682_v38  ;;  %v4237_v63 = vmax.f32 %v4219_v61, 0.0  ;;  %v4519_v61 = vadd.f32 %v9119_v13, %v9104_v22 }
 0x3e8   : > { %5710 = vperm.xlu1 %6723, %v9272_v56   ;;  %v9456_v56 = vpop.f32.mrb[113].mxu0  ;;  %v3698_v1 = vadd.f32 %v3697_v55, %v3683_v32  ;;  %v9470_v8 = vpop.permute.xlu1 %4686  ;;  %v9487_v55 = vstv %s3707_s29 }
 0x3e9   : > { %4252 = vxpose.xlu0.b32.cont [15/16] %v4236_v44, 128  ;;  %v3572_v41 = vpop.trf.xlu0  ;;  %v9458_v17 = vpop.f32.mrb[114].mxu0 }
 0x3ea   : > { %v3684_v28 = vmul.f32 %v10259_v47, %v3572_v41  ;;  %v9462_v11 = vpop.f32.mrb[115].mxu0 }
 0x3ec   : > { %5715 = vperm.xlu1 %6723, %v9284_v58   ;;  %v3699_v6 = vadd.f32 %v3698_v1, %v3684_v28  ;;  %v4511_v58 = vadd.f32 %v9104_v22, %v9121_v20  ;;  %v4572_v20 = vmax.f32 %v4516_v36, 0.0  ;;  %v9478_v2 = vpop.permute.xlu1 %4691 }
 0x3ed   : > { %4253 = vxpose.xlu0.b32.end [16/16] %v4237_v63, 128  ;;  %v3573_v57 = vpop.trf.xlu0  ;;  %v4574_v63 = vmax.f32 %v4524_v27, 0.0  ;;  %v10262_v27 = vld [vmem:[#allocation46_spill] sm:$0xff] }
 0x3ee   : > { %v3685_v60 = vmul.f32 %v10260_v53, %v3573_v57  ;;  %v4571_v12 = vmax.f32 %v4511_v58, 0.0 }
 0x3f0   : > { %5720 = vperm.xlu1 %6723, %v9300_v33   ;;  %v3700_v19 = vadd.f32 %v3699_v6, %v3685_v60  ;;  %v9493_v14 = vpop.permute.xlu1 %4696  ;;  %v4532_v6 = vadd.f32 %v9147_v4, %v9104_v22 }
 0x3f1   : > { %4586 = vxpose.xlu0.b32.start [1/16] %v4570_v42, 128  ;;  %v9468_v54 = vpop.trf.xlu0 }
 0x3f2   : > { %v3701_v25 = vrot.slane %v3700_v19, 4 }
 0x3f4   : > { %5725 = vperm.xlu1 %6723, %v9313_v45   ;;  %v3702_v38 = vadd.f32 %v3701_v25, %v3700_v19  ;;  %v9480_v32 = vpop.f32.mrb[116].mxu0  ;;  %v9503_v60 = vpop.permute.xlu1 %4701  ;;  %v4576_v19 = vmax.f32 %v4532_v6, 0.0  ;;  %v4540_v25 = vadd.f32 %v9104_v22, %v9186_v5  ;;  %v10261_v5 = vld [vmem:[#allocation22_spill] sm:$0xff] }
 0x3f5   : > { %4587 = vxpose.xlu0.b32.cont [2/16] %v4571_v12, 128  ;;  %v3907_v33 = vpop.trf.xlu0  ;;  %v9485_v41 = vpop.f32.mrb[117].mxu0 }
 0x3f6   : > { %v3703_v44 = vrot.slane %v3702_v38, 2  ;;  %v9489_v13 = vpop.f32.mrb[118].mxu0 }
 0x3f7   : > { %v9491_v28 = vpop.f32.mrb[119].mxu0 }
 0x3f8   : > { %5730 = vperm.xlu1 %6723, %v9325_v59   ;;  %v3704_v49 = vadd.f32 %v3703_v44, %v3702_v38  ;;  %v4573_v59 = vmax.f32 %v4519_v61, 0.0  ;;  %v9512_v36 = vpop.permute.xlu1 %4706  ;;  %v4578_v44 = vmax.f32 %v4540_v25, 0.0  ;;  %v4019_v61 = vmul.f32 %v10261_v5, %v3907_v33 }
 0x3f9   : > { %4588 = vxpose.xlu0.b32.cont [3/16] %v4572_v20, 128  ;;  %v3908_v45 = vpop.trf.xlu0  ;;  %v4543_v20 = vadd.f32 %v9104_v22, %v9197_v9 }
 0x3fa   : > { %v3705_v26 = vrot.slane %v3704_v49, 1 }
 0x3fc   : > { %5735 = vperm.xlu1 %6723, %v9335_v46   ;;  %v3706_v47 = vadd.f32 %v3705_v26, %v3704_v49  ;;  %v4527_v46 = vadd.f32 %v9104_v22, %v9158_v23  ;;  %v4020_v26 = vmul.f32 %v8886_v16, %v3908_v45 }
 0x3fd   : > { %4589 = vxpose.xlu0.b32.cont [4/16] %v4573_v59, 128  ;;  %v3909_v1 = vpop.trf.xlu0  ;;  %v4548_v59 = vadd.f32 %v9181_v30, %v9104_v22  ;;  %v4556_v30 = vadd.f32 %v9104_v22, %v9241_v15  ;;  %v10266_v15 = vld [vmem:[#allocation25_spill] sm:$0xff] }
 0x3fe   : > { %v3709_v42 = vadd.f32 %v9487_v55, %v3706_v47  ;;  %v4575_v53 = vmax.f32 %v4527_v46, 0.0  ;;  %v4579_v47 = vmax.f32 %v4543_v20, 0.0 }
 0x3ff   : > { %v4580_v33 = vmax.f32 %v4548_v59, 0.0  ;;  %v10267_v59 = vld [vmem:[#allocation54_spill] sm:$0xff] }
 0x400   : > { %5740 = vperm.xlu1 %6723, %v9347_v29   ;;  %3710 = vst [vmem:[%s7778_s4 + $0x9] sm:$0x1] %v3709_v42  ;;  %v4535_v29 = vadd.f32 %v9156_v40, %v9104_v22  ;;  %v4021_v42 = vmul.f32 %v8899_v39, %v3909_v1  ;;  %v10264_v1 = vld [vmem:[#allocation23_spill] sm:$0xff] }
 0x401   : > { %4590 = vxpose.xlu0.b32.cont [5/16] %v4574_v63, 128  ;;  %v3910_v57 = vpop.trf.xlu0 }
 0x402   : > { %v9508_v23 = vpop.f32.mrb[120].mxu0  ;;  %v4577_v12 = vmax.f32 %v4535_v29, 0.0  ;;  %v4022_v9 = vmul.f32 %v8910_v24, %v3910_v57 }
 0x403   : > { %v9515_v4 = vpop.f32.mrb[121].mxu0 }
 0x404   : > { %5745 = vperm.xlu1 %6723, %v9362_v43   ;;  %v9517_v38 = vpop.f32.mrb[122].mxu0 }
 0x405   : > { %4591 = vxpose.xlu0.b32.cont [6/16] %v4575_v53, 128  ;;  %v3911_v58 = vpop.trf.xlu0  ;;  %v4551_v53 = vadd.f32 %v9193_v52, %v9104_v22  ;;  %v10265_v52 = vld [vmem:[#allocation24_spill] sm:$0xff] }
 0x407   : > { %v4581_v24 = vmax.f32 %v4551_v53, 0.0 }
 0x408   : > { %5750 = vperm.xlu1 %6723, %v9373_v21   ;;  %v9519_v21 = vpop.f32.mrb[123].mxu0 }
 0x409   : > { %4592 = vxpose.xlu0.b32.cont [7/16] %v4576_v19, 128  ;;  %v3912_v43 = vpop.trf.xlu0 }
 0x40a   : > { %v4024_v25 = vmul.f32 %v10264_v1, %v3912_v43 }
 0x40c   : > { %5755 = vperm.xlu1 %6723, %v9381_v37   ;;  %v4018_v37 = vmul.f32 %v10262_v27, %v9468_v54  ;;  %v10263_v54 = vld [vmem:[#allocation49_spill] sm:$0xff] }
 0x40d   : > { %4593 = vxpose.xlu0.b32.cont [8/16] %v4577_v12, 128  ;;  %v3913_v40 = vpop.trf.xlu0  ;;  %v4023_v29 = vmul.f32 %v10263_v54, %v3911_v58  ;;  %v4582_v58 = vmax.f32 %v4556_v30, 0.0  ;;  %v10270_v30 = vld [vmem:[#allocation62_spill] sm:$0xff] }
 0x40e   : > { %v4034_v63 = vadd.f32 %v4019_v61, %v4018_v37  ;;  %v4025_v20 = vmul.f32 %v10265_v52, %v3913_v40  ;;  %v4564_v40 = vadd.f32 %v9235_v51, %v9104_v22  ;;  %v10272_v51 = vld [vmem:[#allocation28_spill] sm:$0xff]  ;;  %v10273_v52 = vld [vmem:[#allocation79_spill] sm:$0xff] }
 0x410   : > { %v4035_v6 = vadd.f32 %v4034_v63, %v4020_v26  ;;  %v4559_v26 = vadd.f32 %v9104_v22, %v9251_v10 }
 0x411   : > { %4594 = vxpose.xlu0.b32.cont [9/16] %v4578_v44, 128  ;;  %v3914_v49 = vpop.trf.xlu0 }
 0x412   : > { %v4036_v19 = vadd.f32 %v4035_v6, %v4021_v42  ;;  %v4026_v37 = vmul.f32 %v10266_v15, %v3914_v49  ;;  %v10268_v6 = vld [vmem:[#allocation57_spill] sm:$0xff] }
 0x414   : > { %v4037_v39 = vadd.f32 %v4036_v19, %v4022_v9  ;;  %v10269_v19 = vld [vmem:[#allocation64_spill] sm:$0xff] }
 0x415   : > { %4595 = vxpose.xlu0.b32.cont [10/16] %v4579_v47, 128  ;;  %v3915_v46 = vpop.trf.xlu0 }
 0x416   : > { %v9534_v16 = vpop.f32.mrb[124].mxu0  ;;  %v4038_v44 = vadd.f32 %v4037_v39, %v4023_v29  ;;  %v4027_v47 = vmul.f32 %v10267_v59, %v3915_v46  ;;  %v9558_v46 = vld [vmem:[%s9825_s2] ss:$0 sm:$0xff]  ;;  %v4584_v39 = vmax.f32 %v4564_v40, 0.0  ;;  %v10277_v40 = vld [vmem:[#allocation73_spill] sm:$0xff] }
 0x417   : > { %v9539_v12 = vpop.f32.mrb[125].mxu0 }
 0x418   : > { %v9541_v57 = vpop.f32.mrb[126].mxu0  ;;  %v4039_v27 = vadd.f32 %v4038_v44, %v4024_v25 }
 0x419   : > { %4596 = vxpose.xlu0.b32.cont [11/16] %v4580_v33, 128  ;;  %v3916_v45 = vpop.trf.xlu0  ;;  %v9544_v5 = vpop.f32.mrb[127].mxu0  ;;  %v4583_v33 = vmax.f32 %v4559_v26, 0.0 }
 0x41a   : > { %v4040_v43 = vadd.f32 %v4039_v27, %v4025_v20  ;;  %v4028_v9 = vmul.f32 %v10268_v6, %v3916_v45  ;;  %v10271_v45 = vld [vmem:[#allocation51_spill] sm:$0xff]  ;;  %v4856_v20 = vadd.f32 %v9558_v46, %v10273_v52  ;;  %v10276_v6 = vld [vmem:[#allocation29_spill] sm:$0xff] }
 0x41b   : > { %v4567_v1 = vadd.f32 %v10271_v45, %v9104_v22  ;;  %v10274_v27 = vld [vmem:[#allocation27_spill] sm:$0xff] }
 0x41c   : > { %v4041_v42 = vadd.f32 %v4040_v43, %v4026_v37 }
 0x41d   : > { %4597 = vxpose.xlu0.b32.cont [12/16] %v4581_v24, 128  ;;  %v3917_v61 = vpop.trf.xlu0  ;;  %v4585_v26 = vmax.f32 %v4567_v1, 0.0 }
 0x41e   : > { %v4042_v53 = vadd.f32 %v4041_v42, %v4027_v47  ;;  %v4029_v54 = vmul.f32 %v10269_v19, %v3917_v61  ;;  %v4918_v47 = vmax.f32 %v4856_v20, 0.0  ;;  %v10281_v20 = vld [vmem:[#allocation32_spill] sm:$0xff] }
 0x420   : > { %v4043_v29 = vadd.f32 %v4042_v53, %v4028_v9 }
 0x421   : > { %4598 = vxpose.xlu0.b32.cont [13/16] %v4582_v58, 128  ;;  %v3918_v63 = vpop.trf.xlu0 }
 0x422   : > { %v4030_v10 = vmul.f32 %v10270_v30, %v3918_v63  ;;  %v4044_v25 = vadd.f32 %v4043_v29, %v4029_v54 }
 0x424   : > { %v4045_v61 = vadd.f32 %v4044_v25, %v4030_v10  ;;  %v10279_v25 = vld [vmem:[#allocation59_spill] sm:$0xff] }
 0x425   : > { %4599 = vxpose.xlu0.b32.cont [14/16] %v4583_v33, 128  ;;  %v3919_v49 = vpop.trf.xlu0  ;;  %v4859_v33 = vadd.f32 %v9558_v46, %v10277_v40  ;;  %v10285_v40 = vld [vmem:[#allocation15_spill] sm:$0xff] }
 0x426   : > { %v4031_v24 = vmul.f32 %v10272_v51, %v3919_v49  ;;  %v9563_v44 = vpop.f32.mrb[112].mxu1  ;;  %v10278_v49 = vld [vmem:[#allocation53_spill] sm:$0xff]  ;;  %v4867_v51 = vadd.f32 %v10279_v25, %v9558_v46 }
 0x427   : > { %v9568_v37 = vpop.f32.mrb[113].mxu1  ;;  %v4864_v29 = vadd.f32 %v10278_v49, %v9558_v46  ;;  %v4919_v30 = vmax.f32 %v4859_v33, 0.0  ;;  %v4875_v33 = vadd.f32 %v9558_v46, %v10285_v40 }
 0x428   : > { %v9570_v43 = vpop.f32.mrb[114].mxu1  ;;  %v4046_v59 = vadd.f32 %v4045_v61, %v4031_v24 }
 0x429   : > { %4600 = vxpose.xlu0.b32.cont [15/16] %v4584_v39, 128  ;;  %v3920_v58 = vpop.trf.xlu0  ;;  %10275 = vst [vmem:[#allocation18_spill] sm:$0xff] %v9570_v43  ;;  %v9572_v22 = vpop.f32.mrb[115].mxu1  ;;  %v4920_v1 = vmax.f32 %v4864_v29, 0.0  ;;  %v4923_v29 = vmax.f32 %v4875_v33, 0.0  ;;  %v10293_v33 = vld [vmem:[#allocation63_spill] sm:$0xff] }
 0x42a   : > { %v4032_v15 = vmul.f32 %v10274_v27, %v3920_v58  ;;  %v4872_v58 = vadd.f32 %v9558_v46, %v10281_v20 }
 0x42c   : > { %v4047_v42 = vadd.f32 %v4046_v59, %v4032_v15 }
 0x42d   : > { %4601 = vxpose.xlu0.b32.end [16/16] %v4585_v26, 128  ;;  %v3921_v63 = vpop.trf.xlu0  ;;  %v4921_v26 = vmax.f32 %v4867_v51, 0.0  ;;  %v10289_v51 = vld [vmem:[#allocation21_spill] sm:$0xff] }
 0x42e   : > { %v4033_v9 = vmul.f32 %v10276_v6, %v3921_v63 }
 0x430   : > { %v4048_v53 = vadd.f32 %v4047_v42, %v4033_v9  ;;  %v4922_v42 = vmax.f32 %v4872_v58, 0.0 }
 0x431   : > { %4934 = vxpose.xlu0.b32.start [1/16] %v4918_v47, 128  ;;  %v4254_v19 = vpop.trf.xlu0 }
 0x432   : > { %v4049_v54 = vrot.slane %v4048_v53, 4 }
 0x434   : > { %v4050_v10 = vadd.f32 %v4049_v54, %v4048_v53  ;;  %v10286_v54 = vld [vmem:[#allocation40_spill] sm:$0xff] }
 0x435   : > { %4935 = vxpose.xlu0.b32.cont [2/16] %v4919_v30, 128  ;;  %v4255_v39 = vpop.trf.xlu0  ;;  %v4880_v49 = vadd.f32 %v10286_v54, %v9558_v46  ;;  %v4891_v54 = vadd.f32 %v9558_v46, %v10293_v33 }
 0x436   : > { %v4051_v45 = vrot.slane %v4050_v10, 2  ;;  %v9581_v52 = vpop.f32.mrb[116].mxu1 }
 0x437   : > { %10280 = vst [vmem:[#allocation69_spill] sm:$0xff] %v9581_v52  ;;  %v9585_v15 = vpop.f32.mrb[117].mxu1 }
 0x438   : > { %v4052_v24 = vadd.f32 %v4051_v45, %v4050_v10  ;;  %10282 = vst [vmem:[#allocation71_spill] sm:$0xff] %v9585_v15  ;;  %v9587_v59 = vpop.f32.mrb[118].mxu1  ;;  %v4924_v10 = vmax.f32 %v4880_v49, 0.0  ;;  %v10287_v45 = vld [vmem:[#allocation38_spill] sm:$0xff]  ;;  %v10294_v49 = vld [vmem:[#allocation33_spill] sm:$0xff] }
 0x439   : > { %4936 = vxpose.xlu0.b32.cont [3/16] %v4920_v1, 128  ;;  %v4256_v61 = vpop.trf.xlu0  ;;  %10283 = vst [vmem:[#allocation20_spill] sm:$0xff] %v9587_v59  ;;  %v9589_v63 = vpop.f32.mrb[119].mxu1  ;;  %v4883_v1 = vadd.f32 %v10287_v45, %v9558_v46  ;;  %v10295_v45 = vld [vmem:[#allocation30_spill] sm:$0xff]  ;;  %v4927_v59 = vmax.f32 %v4891_v54, 0.0  ;;  %v10300_v15 = vld [vmem:[#allocation37_spill] sm:$0xff] }
 0x43a   : > { %v4053_v27 = vrot.slane %v4052_v24, 1  ;;  %10284 = vst [vmem:[#allocation76_spill] sm:$0xff] %v9589_v63  ;;  %v10303_v54 = vld [vmem:[#allocation41_spill] sm:$0xff] }
 0x43c   : > { %v4054_v47 = vadd.f32 %v4053_v27, %v4052_v24  ;;  %v4888_v24 = vadd.f32 %v9558_v46, %v10289_v51  ;;  %v4925_v27 = vmax.f32 %v4883_v1, 0.0  ;;  %v4366_v51 = vmul.f32 %v10295_v45, %v4254_v19 }
 0x43d   : > { %4937 = vxpose.xlu0.b32.cont [4/16] %v4921_v26, 128  ;;  %v4257_v6 = vpop.trf.xlu0 }
 0x43e   : > { %v4057_v9 = vadd.f32 %v4054_v47, %v9487_v55 }
 0x440   : > { %4058 = vst [vmem:[%s7778_s4 + $0xa] sm:$0x1] %v4057_v9  ;;  %v4926_v9 = vmax.f32 %v4888_v24, 0.0 }
 0x441   : > { %4938 = vxpose.xlu0.b32.cont [5/16] %v4922_v42, 128  ;;  %v4258_v53 = vpop.trf.xlu0  ;;  %v9609_v42 = vpop.permute.xlu1 %4711 }
 0x445   : > { %4939 = vxpose.xlu0.b32.cont [6/16] %v4923_v29, 128  ;;  %v4259_v30 = vpop.trf.xlu0  ;;  %v9599_v25 = vpop.f32.mrb[120].mxu1  ;;  %v4367_v29 = vmul.f32 %v10294_v49, %v4255_v39  ;;  %v4370_v39 = vmul.f32 %v10300_v15, %v4258_v53  ;;  %v10301_v49 = vld [vmem:[#allocation67_spill] sm:$0xff] }
 0x446   : > { %10288 = vst [vmem:[#allocation75_spill] sm:$0xff] %v9599_v25  ;;  %v9603_v58 = vpop.f32.mrb[121].mxu1  ;;  %v10296_v25 = vld [vmem:[#allocation34_spill] sm:$0xff]  ;;  %v4899_v19 = vadd.f32 %v10301_v49, %v9558_v46 }
 0x447   : > { %10290 = vst [vmem:[#allocation3_spill] sm:$0xff] %v9603_v58  ;;  %v9605_v26 = vpop.f32.mrb[122].mxu1  ;;  %v4368_v1 = vmul.f32 %v10296_v25, %v4256_v61  ;;  %v9616_v58 = vpop.permute.xlu1 %4984  ;;  %v4382_v24 = vadd.f32 %v4367_v29, %v4366_v51  ;;  %v10302_v61 = vld [vmem:[#allocation42_spill] sm:$0xff]  ;;  %v10304_v51 = vld [vmem:[#allocation44_spill] sm:$0xff] }
 0x448   : > { %10291 = vst [vmem:[#allocation4_spill] sm:$0xff] %v9605_v26  ;;  %v9607_v47 = vpop.f32.mrb[123].mxu1  ;;  %10297 = vst [vmem:[#allocation6_spill] sm:$0xff] %v9616_v58  ;;  %v10298_v26 = vld [vmem:[#allocation50_spill] sm:$0xff]  ;;  %v4371_v25 = vmul.f32 %v10302_v61, %v4259_v30  ;;  %v4929_v53 = vmax.f32 %v4899_v19, 0.0  ;;  %v10306_v19 = vld [vmem:[#allocation45_spill] sm:$0xff] }
 0x449   : > { %4940 = vxpose.xlu0.b32.cont [7/16] %v4924_v10, 128  ;;  %v4260_v20 = vpop.trf.xlu0  ;;  %10292 = vst [vmem:[#allocation5_spill] sm:$0xff] %v9607_v47  ;;  %v4896_v47 = vadd.f32 %v10298_v26, %v9558_v46  ;;  %v4383_v33 = vadd.f32 %v4382_v24, %v4368_v1  ;;  %v4904_v26 = vadd.f32 %v9558_v46, %v9424_v35  ;;  %v10305_v35 = vld [vmem:[#allocation43_spill] sm:$0xff] }
 0x44a   : > { %v4372_v29 = vmul.f32 %v10303_v54, %v4260_v20  ;;  %v4907_v20 = vadd.f32 %v9558_v46, %v9429_v7 }
 0x44b   : > { %v9627_v43 = vpop.permute.xlu1 %4989  ;;  %v4930_v24 = vmax.f32 %v4904_v26, 0.0  ;;  %v4912_v26 = vadd.f32 %v9416_v50, %v9558_v46  ;;  %v5204_v50 = vadd.f32 %v9558_v46, %v9456_v56 }
 0x44c   : > { %v4931_v54 = vmax.f32 %v4907_v20, 0.0 }
 0x44d   : > { %4941 = vxpose.xlu0.b32.cont [8/16] %v4925_v27, 128  ;;  %v4261_v40 = vpop.trf.xlu0  ;;  %v10299_v27 = vld [vmem:[#allocation35_spill] sm:$0xff] }
 0x44e   : > { %v4369_v52 = vmul.f32 %v10299_v27, %v4257_v6  ;;  %v4373_v30 = vmul.f32 %v10304_v51, %v4261_v40  ;;  %v10307_v40 = vld [vmem:[#allocation47_spill] sm:$0xff] }
 0x44f   : > { %v9640_v49 = vpop.permute.xlu1 %4994 }
 0x450   : > { %v4384_v45 = vadd.f32 %v4383_v33, %v4369_v52 }
 0x451   : > { %4942 = vxpose.xlu0.b32.cont [9/16] %v4926_v9, 128  ;;  %v4262_v10 = vpop.trf.xlu0  ;;  %v4928_v9 = vmax.f32 %v4896_v47, 0.0 }
 0x452   : > { %v4385_v6 = vadd.f32 %v4384_v45, %v4370_v39 }
 0x454   : > { %v4386_v52 = vadd.f32 %v4385_v6, %v4371_v25 }
 0x455   : > { %4943 = vxpose.xlu0.b32.cont [10/16] %v4927_v59, 128  ;;  %v4263_v63 = vpop.trf.xlu0  ;;  %v9625_v58 = vpop.f32.mrb[124].mxu1 }
 0x456   : > { %v9632_v15 = vpop.f32.mrb[125].mxu1  ;;  %v4387_v33 = vadd.f32 %v4386_v52, %v4372_v29  ;;  %v4375_v45 = vmul.f32 %v10306_v19, %v4263_v63  ;;  %v9649_v52 = vpop.permute.xlu1 %4999  ;;  %v4932_v63 = vmax.f32 %v4912_v26, 0.0 }
 0x457   : > { %v9634_v47 = vpop.f32.mrb[126].mxu1 }
 0x458   : > { %v9637_v1 = vpop.f32.mrb[127].mxu1  ;;  %v4388_v39 = vadd.f32 %v4387_v33, %v4373_v30  ;;  %v10309_v30 = vld [vmem:[#allocation52_spill] sm:$0xff] }
 0x459   : > { %4944 = vxpose.xlu0.b32.cont [11/16] %v4928_v9, 128  ;;  %v4264_v59 = vpop.trf.xlu0  ;;  %v4374_v9 = vmul.f32 %v10305_v35, %v4262_v10 }
 0x45a   : > { %v4376_v6 = vmul.f32 %v10307_v40, %v4264_v59  ;;  %v10310_v59 = vld [vmem:[#allocation65_spill] sm:$0xff] }
 0x45b   : > { %v4389_v25 = vadd.f32 %v4388_v39, %v4374_v9  ;;  %v10311_v39 = vld [vmem:[#allocation55_spill] sm:$0xff] }
 0x45d   : > { %4945 = vxpose.xlu0.b32.cont [12/16] %v4929_v53, 128  ;;  %v4265_v27 = vpop.trf.xlu0  ;;  %v4390_v29 = vadd.f32 %v4389_v25, %v4375_v45  ;;  %v10308_v53 = vld [vmem:[#allocation74_spill] sm:$0xff]  ;;  %v9658_v45 = vpop.permute.xlu1 %5004 }
 0x45e   : > { %v4377_v10 = vmul.f32 %v10308_v53, %v4265_v27 }
 0x45f   : > { %v4391_v7 = vadd.f32 %v4390_v29, %v4376_v6  ;;  %v5207_v29 = vadd.f32 %v9558_v46, %v9462_v11  ;;  %v5215_v11 = vadd.f32 %v9458_v17, %v9558_v46 }
 0x461   : > { %4946 = vxpose.xlu0.b32.cont [13/16] %v4930_v24, 128  ;;  %v4266_v61 = vpop.trf.xlu0  ;;  %v4915_v24 = vadd.f32 %v9426_v48, %v9558_v46  ;;  %v4392_v35 = vadd.f32 %v4391_v7, %v4377_v10  ;;  %v10312_v48 = vld [vmem:[#allocation60_spill] sm:$0xff]  ;;  %v9663_v56 = vpop.permute.xlu1 %5009  ;;  %v5212_v7 = vadd.f32 %v9450_v31, %v9558_v46  ;;  %v5269_v31 = vmax.f32 %v5215_v11, 0.0  ;;  %v10313_v11 = vld [vmem:[#allocation14_spill] sm:$0xff] }
 0x462   : > { %v4378_v33 = vmul.f32 %v10309_v30, %v4266_v61  ;;  %v5266_v61 = vmax.f32 %v5204_v50, 0.0  ;;  %v5267_v30 = vmax.f32 %v5207_v29, 0.0  ;;  %v5220_v50 = vadd.f32 %v9558_v46, %v9485_v41 }
 0x463   : > { %v4933_v25 = vmax.f32 %v4915_v24, 0.0  ;;  %v5228_v41 = vadd.f32 %v9480_v32, %v9558_v46  ;;  %v5239_v32 = vadd.f32 %v9558_v46, %v9519_v21 }
 0x464   : > { %v4393_v27 = vadd.f32 %v4392_v35, %v4378_v33 }
 0x465   : > { %4947 = vxpose.xlu0.b32.cont [14/16] %v4931_v54, 128  ;;  %v4267_v51 = vpop.trf.xlu0  ;;  %v9667_v35 = vpop.permute.xlu1 %5014  ;;  %v5272_v29 = vmax.f32 %v5228_v41, 0.0 }
 0x466   : > { %v4379_v9 = vmul.f32 %v10310_v59, %v4267_v51  ;;  %v5268_v59 = vmax.f32 %v5212_v7, 0.0 }
 0x468   : > { %v4394_v40 = vadd.f32 %v4393_v27, %v4379_v9 }
 0x469   : > { %4948 = vxpose.xlu0.b32.cont [15/16] %v4932_v63, 128  ;;  %v4268_v20 = vpop.trf.xlu0 }
 0x46a   : > { %v4380_v19 = vmul.f32 %v10311_v39, %v4268_v20 }
 0x46c   : > { %v4395_v26 = vadd.f32 %v4394_v40, %v4380_v19  ;;  %v9673_v19 = vpop.permute.xlu1 %5019 }
 0x46d   : > { %4949 = vxpose.xlu0.b32.end [16/16] %v4933_v25, 128  ;;  %v4269_v6 = vpop.trf.xlu0  ;;  %v5270_v25 = vmax.f32 %v5220_v50, 0.0  ;;  %v10314_v50 = vld [vmem:[#allocation61_spill] sm:$0xff] }
 0x46e   : > { %v4381_v54 = vmul.f32 %v10312_v48, %v4269_v6  ;;  %v5223_v6 = vadd.f32 %v9558_v46, %v9491_v28  ;;  %v5236_v28 = vadd.f32 %v9558_v46, %v9515_v4  ;;  %v5244_v4 = vadd.f32 %v9508_v23, %v9558_v46 }
 0x46f   : > { %v5252_v23 = vadd.f32 %v9558_v46, %v9539_v12  ;;  %v5255_v12 = vadd.f32 %v9558_v46, %v9544_v5 }
 0x470   : > { %v4396_v53 = vadd.f32 %v4395_v26, %v4381_v54  ;;  %v9679_v26 = vpop.permute.xlu1 %5024  ;;  %v5271_v48 = vmax.f32 %v5223_v6, 0.0  ;;  %v10316_v6 = vld [vmem:[#allocation39_spill] sm:$0xff] }
 0x471   : > { %5282 = vxpose.xlu0.b32.start [1/16] %v5266_v61, 128  ;;  %v4602_v10 = vpop.trf.xlu0 }
 0x472   : > { %v4397_v51 = vrot.slane %v4396_v53, 4 }
 0x474   : > { %v4398_v33 = vadd.f32 %v4397_v51, %v4396_v53  ;;  %v5231_v53 = vadd.f32 %v9489_v13, %v9558_v46  ;;  %v9685_v51 = vpop.permute.xlu1 %5029 }
 0x475   : > { %5283 = vxpose.xlu0.b32.cont [2/16] %v5267_v30, 128  ;;  %v4603_v63 = vpop.trf.xlu0 }
 0x476   : > { %v4399_v24 = vrot.slane %v4398_v33, 2  ;;  %v5273_v30 = vmax.f32 %v5231_v53, 0.0  ;;  %v10317_v53 = vld [vmem:[#allocation68_spill] sm:$0xff] }
 0x478   : > { %v4400_v9 = vadd.f32 %v4399_v24, %v4398_v33  ;;  %v5274_v33 = vmax.f32 %v5236_v28, 0.0  ;;  %v5276_v28 = vmax.f32 %v5244_v4, 0.0 }
 0x479   : > { %5284 = vxpose.xlu0.b32.cont [3/16] %v5268_v59, 128  ;;  %v4604_v20 = vpop.trf.xlu0  ;;  %v9689_v59 = vpop.permute.xlu1 %5034 }
 0x47a   : > { %v4401_v27 = vrot.slane %v4400_v9, 1 }
 0x47c   : > { %v4402_v39 = vadd.f32 %v4401_v27, %v4400_v9  ;;  %v4715_v9 = vmul.f32 %v10313_v11, %v4603_v63  ;;  %v4714_v27 = vmul.f32 %v10314_v50, %v4602_v10  ;;  %v5247_v10 = vadd.f32 %v9517_v38, %v9558_v46 }
 0x47d   : > { %5285 = vxpose.xlu0.b32.cont [4/16] %v5269_v31, 128  ;;  %v4605_v40 = vpop.trf.xlu0  ;;  %v10315_v31 = vld [vmem:[#allocation36_spill] sm:$0xff] }
 0x47e   : > { %v4405_v61 = vadd.f32 %v4402_v39, %v9487_v55  ;;  %v4716_v39 = vmul.f32 %v10315_v31, %v4604_v20  ;;  %v4717_v41 = vmul.f32 %v10316_v6, %v4605_v40 }
 0x480   : > { %4406 = vst [vmem:[%s7778_s4 + $0xb] sm:$0x1] %v4405_v61  ;;  %v4730_v61 = vadd.f32 %v4715_v9, %v4714_v27  ;;  %v5277_v9 = vmax.f32 %v5247_v10, 0.0  ;;  %v5278_v27 = vmax.f32 %v5252_v23, 0.0 }
 0x481   : > { %5286 = vxpose.xlu0.b32.cont [5/16] %v5270_v25, 128  ;;  %v4606_v17 = vpop.trf.xlu0  ;;  %v5275_v25 = vmax.f32 %v5239_v32, 0.0 }
 0x482   : > { %v4731_v21 = vadd.f32 %v4730_v61, %v4716_v39  ;;  %v4718_v63 = vmul.f32 %v10317_v53, %v4606_v17 }
 0x485   : > { %5287 = vxpose.xlu0.b32.cont [6/16] %v5271_v48, 128  ;;  %v4607_v54 = vpop.trf.xlu0  ;;  %v9699_v48 = vpop.permute.xlu1 %5039 }
 0x486   : > { %v4719_v20 = vmul.f32 %v9408_v0, %v4607_v54 }
 0x489   : > { %5288 = vxpose.xlu0.b32.cont [7/16] %v5272_v29, 128  ;;  %v4608_v7 = vpop.trf.xlu0  ;;  %v9708_v11 = vpop.permute.xlu1 %5044 }
 0x48a   : > { %v4720_v32 = vmul.f32 %v9420_v3, %v4608_v7 }
 0x48d   : > { %5289 = vxpose.xlu0.b32.cont [8/16] %v5273_v30, 128  ;;  %v4609_v24 = vpop.trf.xlu0  ;;  %v4732_v30 = vadd.f32 %v4731_v21, %v4717_v41  ;;  %v9715_v4 = vpop.permute.xlu1 %5049 }
 0x48e   : > { %v4721_v17 = vmul.f32 %v9435_v62, %v4609_v24  ;;  %v5260_v62 = vadd.f32 %v9534_v16, %v9558_v46  ;;  %v5279_v24 = vmax.f32 %v5255_v12, 0.0  ;;  %v5552_v16 = vadd.f32 %v9558_v46, %v9568_v37  ;;  %v10319_v12 = vld [vmem:[#allocation71_spill] sm:$0xff] }
 0x48f   : > { %v4733_v40 = vadd.f32 %v4732_v30, %v4718_v63 }
 0x490   : > { %v5280_v41 = vmax.f32 %v5260_v62, 0.0  ;;  %v5614_v30 = vmax.f32 %v5552_v16, 0.0 }
 0x491   : > { %5290 = vxpose.xlu0.b32.cont [9/16] %v5274_v33, 128  ;;  %v4610_v13 = vpop.trf.xlu0  ;;  %v4734_v50 = vadd.f32 %v4733_v40, %v4719_v20 }
 0x492   : > { %v4722_v0 = vmul.f32 %v9443_v18, %v4610_v13 }
 0x493   : > { %v4735_v31 = vadd.f32 %v4734_v50, %v4720_v32 }
 0x495   : > { %5291 = vxpose.xlu0.b32.cont [10/16] %v5275_v25, 128  ;;  %v4611_v29 = vpop.trf.xlu0  ;;  %v4736_v54 = vadd.f32 %v4735_v31, %v4721_v17 }
 0x496   : > { %v4723_v39 = vmul.f32 %v9460_v34, %v4611_v29  ;;  %v9722_v34 = vpop.permute.xlu1 %5054  ;;  %v5263_v29 = vadd.f32 %v9541_v57, %v9558_v46 }
 0x497   : > { %v4737_v7 = vadd.f32 %v4736_v54, %v4722_v0  ;;  %v5568_v54 = vadd.f32 %v9558_v46, %v10319_v12 }
 0x499   : > { %5292 = vxpose.xlu0.b32.cont [11/16] %v5276_v28, 128  ;;  %v4612_v33 = vpop.trf.xlu0  ;;  %v4738_v61 = vadd.f32 %v4737_v7, %v4723_v39  ;;  %v5281_v28 = vmax.f32 %v5263_v29, 0.0 }
 0x49a   : > { %v4724_v25 = vmul.f32 %v9470_v8, %v4612_v33 }
 0x49c   : > { %v4739_v5 = vadd.f32 %v4738_v61, %v4724_v25  ;;  %v5618_v25 = vmax.f32 %v5568_v54, 0.0 }
 0x49d   : > { %5293 = vxpose.xlu0.b32.cont [12/16] %v5277_v9, 128  ;;  %v4613_v38 = vpop.trf.xlu0 }
 0x49e   : > { %v4725_v18 = vmul.f32 %v9478_v2, %v4613_v38 }
 0x4a0   : > { %v4740_v21 = vadd.f32 %v4739_v5, %v4725_v18  ;;  %v10320_v18 = vld [vmem:[#allocation76_spill] sm:$0xff] }
 0x4a1   : > { %5294 = vxpose.xlu0.b32.cont [13/16] %v5278_v27, 128  ;;  %v4614_v3 = vpop.trf.xlu0 }
 0x4a2   : > { %v4726_v6 = vmul.f32 %v9493_v14, %v4614_v3  ;;  %v9730_v14 = vpop.permute.xlu1 %5059 }
 0x4a4   : > { %v4741_v2 = vadd.f32 %v4740_v21, %v4726_v6  ;;  %v10321_v6 = vld [vmem:[#allocation69_spill] sm:$0xff] }
 0x4a5   : > { %5295 = vxpose.xlu0.b32.cont [14/16] %v5279_v24, 128  ;;  %v4615_v13 = vpop.trf.xlu0 }
 0x4a6   : > { %v4727_v8 = vmul.f32 %v9503_v60, %v4615_v13  ;;  %v5555_v60 = vadd.f32 %v9558_v46, %v9572_v22  ;;  %v9735_v32 = vpop.permute.xlu1 %5332  ;;  %v5571_v13 = vadd.f32 %v9558_v46, %v10320_v18 }
 0x4a8   : > { %v4742_v10 = vadd.f32 %v4741_v2, %v4727_v8  ;;  %v5615_v9 = vmax.f32 %v5555_v60, 0.0  ;;  %v5619_v29 = vmax.f32 %v5571_v13, 0.0  ;;  %v10323_v2 = vld [vmem:[#allocation3_spill] sm:$0xff] }
 0x4a9   : > { %5296 = vxpose.xlu0.b32.cont [15/16] %v5280_v41, 128  ;;  %v4616_v53 = vpop.trf.xlu0  ;;  %v5576_v41 = vadd.f32 %v10321_v6, %v9558_v46 }
 0x4aa   : > { %v4728_v63 = vmul.f32 %v9512_v36, %v4616_v53  ;;  %v5560_v36 = vadd.f32 %v9563_v44, %v9558_v46  ;;  %v9741_v0 = vpop.permute.xlu1 %5337  ;;  %v10322_v53 = vld [vmem:[#allocation20_spill] sm:$0xff] }
 0x4ab   : > { %v5620_v16 = vmax.f32 %v5576_v41, 0.0 }
 0x4ac   : > { %v4743_v23 = vadd.f32 %v4742_v10, %v4728_v63  ;;  %v5616_v38 = vmax.f32 %v5560_v36, 0.0  ;;  %v5584_v63 = vadd.f32 %v9558_v46, %v10323_v2  ;;  %v5608_v2 = vadd.f32 %v9625_v58, %v9558_v46 }
 0x4ad   : > { %5297 = vxpose.xlu0.b32.end [16/16] %v5281_v28, 128  ;;  %v4617_v20 = vpop.trf.xlu0 }
 0x4ae   : > { %v4729_v57 = vmul.f32 %v9609_v42, %v4617_v20  ;;  %v10318_v42 = vld [vmem:[#allocation18_spill] sm:$0xff]  ;;  %v9746_v61 = vpop.permute.xlu1 %5342  ;;  %v5622_v20 = vmax.f32 %v5584_v63, 0.0 }
 0x4af   : > { %v5563_v31 = vadd.f32 %v10318_v42, %v9558_v46 }
 0x4b0   : > { %v4744_v33 = vadd.f32 %v4743_v23, %v4729_v57  ;;  %v10324_v57 = vld [vmem:[#allocation5_spill] sm:$0xff] }
 0x4b1   : > { %5630 = vxpose.xlu0.b32.start [1/16] %v5614_v30, 128  ;;  %v4950_v37 = vpop.trf.xlu0  ;;  %v5617_v44 = vmax.f32 %v5563_v31, 0.0  ;;  %v5587_v60 = vadd.f32 %v9558_v46, %v10324_v57 }
 0x4b2   : > { %v4745_v40 = vrot.slane %v4744_v33, 4  ;;  %v9753_v21 = vpop.permute.xlu1 %5347 }
 0x4b3   : > { %v5623_v31 = vmax.f32 %v5587_v60, 0.0 }
 0x4b4   : > { %v4746_v50 = vadd.f32 %v4745_v40, %v4744_v33 }
 0x4b5   : > { %5631 = vxpose.xlu0.b32.cont [2/16] %v5615_v9, 128  ;;  %v4951_v17 = vpop.trf.xlu0  ;;  %v10325_v9 = vld [vmem:[#allocation6_spill] sm:$0xff] }
 0x4b6   : > { %v4747_v27 = vrot.slane %v4746_v50, 2  ;;  %v9759_v10 = vpop.permute.xlu1 %5352  ;;  %v5063_v33 = vmul.f32 %v9627_v43, %v4951_v17 }
 0x4b8   : > { %v4748_v22 = vadd.f32 %v4747_v27, %v4746_v50  ;;  %v5062_v50 = vmul.f32 %v10325_v9, %v4950_v37 }
 0x4b9   : > { %5632 = vxpose.xlu0.b32.cont [3/16] %v5616_v38, 128  ;;  %v4952_v39 = vpop.trf.xlu0  ;;  %v10326_v38 = vld [vmem:[#allocation75_spill] sm:$0xff] }
 0x4ba   : > { %v4749_v3 = vrot.slane %v4748_v22, 1  ;;  %v9764_v40 = vpop.permute.xlu1 %5357  ;;  %v5064_v27 = vmul.f32 %v9640_v49, %v4952_v39  ;;  %v5592_v42 = vadd.f32 %v10326_v38, %v9558_v46  ;;  %v5600_v39 = vadd.f32 %v9558_v46, %v9632_v15 }
 0x4bb   : > { %v5603_v15 = vadd.f32 %v9558_v46, %v9637_v1 }
 0x4bc   : > { %v4750_v7 = vadd.f32 %v4749_v3, %v4748_v22  ;;  %v5078_v22 = vadd.f32 %v5063_v33, %v5062_v50  ;;  %v5626_v6 = vmax.f32 %v5600_v39, 0.0 }
 0x4bd   : > { %5633 = vxpose.xlu0.b32.cont [4/16] %v5617_v44, 128  ;;  %v4953_v62 = vpop.trf.xlu0  ;;  %v5624_v44 = vmax.f32 %v5592_v42, 0.0  ;;  %v5627_v63 = vmax.f32 %v5603_v15, 0.0 }
 0x4be   : > { %v4753_v24 = vadd.f32 %v4750_v7, %v9487_v55  ;;  %v5579_v55 = vadd.f32 %v10322_v53, %v9558_v46  ;;  %v5065_v12 = vmul.f32 %v9649_v52, %v4953_v62  ;;  %v5079_v3 = vadd.f32 %v5078_v22, %v5064_v27  ;;  %v9772_v17 = vpop.permute.xlu1 %5362  ;;  %v10327_v7 = vld [vmem:[#allocation4_spill] sm:$0xff] }
 0x4bf   : > { %v5595_v37 = vadd.f32 %v10327_v7, %v9558_v46 }
 0x4c0   : > { %4754 = vst [vmem:[%s7778_s4 + $0xc] sm:$0x1] %v4753_v24  ;;  %v5621_v30 = vmax.f32 %v5579_v55, 0.0 }
 0x4c1   : > { %5634 = vxpose.xlu0.b32.cont [5/16] %v5618_v25, 128  ;;  %v4954_v5 = vpop.trf.xlu0  ;;  %v5080_v25 = vadd.f32 %v5079_v3, %v5065_v12  ;;  %v5625_v18 = vmax.f32 %v5595_v37, 0.0 }
 0x4c2   : > { %v5066_v43 = vmul.f32 %v9658_v45, %v4954_v5  ;;  %v9781_v5 = vpop.permute.xlu1 %5367 }
 0x4c4   : > { %v5081_v52 = vadd.f32 %v5080_v25, %v5066_v43 }
 0x4c5   : > { %5635 = vxpose.xlu0.b32.cont [6/16] %v5619_v29, 128  ;;  %v4955_v8 = vpop.trf.xlu0 }
 0x4c6   : > { %v5067_v49 = vmul.f32 %v9663_v56, %v4955_v8 }
 0x4c8   : > { %v5082_v13 = vadd.f32 %v5081_v52, %v5067_v49 }
 0x4c9   : > { %5636 = vxpose.xlu0.b32.cont [7/16] %v5620_v16, 128  ;;  %v4956_v28 = vpop.trf.xlu0 }
 0x4ca   : > { %v5068_v62 = vmul.f32 %v9667_v35, %v4956_v28 }
 0x4cc   : > { %v5083_v29 = vadd.f32 %v5082_v13, %v5068_v62 }
 0x4cd   : > { %5637 = vxpose.xlu0.b32.cont [8/16] %v5621_v30, 128  ;;  %v4957_v23 = vpop.trf.xlu0 }
 0x4ce   : > { %v5069_v45 = vmul.f32 %v9673_v19, %v4957_v23  ;;  %v9788_v19 = vpop.permute.xlu1 %5372  ;;  %v5611_v23 = vadd.f32 %v9634_v47, %v9558_v46 }
 0x4d0   : > { %v5084_v8 = vadd.f32 %v5083_v29, %v5069_v45  ;;  %v5629_v9 = vmax.f32 %v5611_v23, 0.0 }
 0x4d1   : > { %5638 = vxpose.xlu0.b32.cont [9/16] %v5622_v20, 128  ;;  %v4958_v36 = vpop.trf.xlu0 }
 0x4d2   : > { %v5070_v56 = vmul.f32 %v9679_v26, %v4958_v36  ;;  %v5378_v60 = vpop.permute.xlu1 %5377 }
 0x4d4   : > { %v5085_v53 = vadd.f32 %v5084_v8, %v5070_v56 }
 0x4d5   : > { %5639 = vxpose.xlu0.b32.cont [10/16] %v5623_v31, 128  ;;  %v4959_v54 = vpop.trf.xlu0 }
 0x4d6   : > { %v5071_v16 = vmul.f32 %v9685_v51, %v4959_v54  ;;  %v5628_v51 = vmax.f32 %v5608_v2, 0.0  ;;  %v5383_v38 = vpop.permute.xlu1 %5382 }
 0x4d8   : > { %v5086_v28 = vadd.f32 %v5085_v53, %v5071_v16  ;;  %v10328_v53 = vmov 0  }
 0x4d9   : > { %5640 = vxpose.xlu0.b32.cont [11/16] %v5624_v44, 128  ;;  %v4960_v24 = vpop.trf.xlu0  ;;  %v9799_v44 = vstv %s5099_s7 }
 0x4da   : > { %v5072_v55 = vmul.f32 %v9689_v59, %v4960_v24  ;;  %v5388_v31 = vpop.permute.xlu1 %5387 }
 0x4dc   : > { %v5087_v1 = vadd.f32 %v5086_v28, %v5072_v55 }
 0x4dd   : > { %5641 = vxpose.xlu0.b32.cont [12/16] %v5625_v18, 128  ;;  %v4961_v41 = vpop.trf.xlu0 }
 0x4de   : > { %v5073_v26 = vmul.f32 %v9699_v48, %v4961_v41  ;;  %v5393_v43 = vpop.permute.xlu1 %5392 }
 0x4e0   : > { %v5088_v57 = vadd.f32 %v5087_v1, %v5073_v26 }
 0x4e1   : > { %5642 = vxpose.xlu0.b32.cont [13/16] %v5626_v6, 128  ;;  %v4962_v35 = vpop.trf.xlu0 }
 0x4e2   : > { %v5074_v20 = vmul.f32 %v9708_v11, %v4962_v35  ;;  %v5398_v25 = vpop.permute.xlu1 %5397 }
 0x4e4   : > { %v5089_v58 = vadd.f32 %v5088_v57, %v5074_v20 }
 0x4e5   : > { %5643 = vxpose.xlu0.b32.cont [14/16] %v5627_v63, 128  ;;  %v4963_v30 = vpop.trf.xlu0 }
 0x4e6   : > { %v5075_v59 = vmul.f32 %v9715_v4, %v4963_v30  ;;  %v5403_v24 = vpop.permute.xlu1 %5402 }
 0x4e8   : > { %v5090_v48 = vadd.f32 %v5089_v58, %v5075_v59 }
 0x4e9   : > { %5644 = vxpose.xlu0.b32.cont [15/16] %v5628_v51, 128  ;;  %v4964_v33 = vpop.trf.xlu0 }
 0x4ea   : > { %v5076_v36 = vmul.f32 %v9722_v34, %v4964_v33  ;;  %v5408_v62 = vpop.permute.xlu1 %5407 }
 0x4ec   : > { %v5091_v27 = vadd.f32 %v5090_v48, %v5076_v36 }
 0x4ed   : > { %5645 = vxpose.xlu0.b32.end [16/16] %v5629_v9, 128  ;;  %v4965_v50 = vpop.trf.xlu0 }
 0x4ee   : > { %v5077_v11 = vmul.f32 %v9730_v14, %v4965_v50  ;;  %v9806_v29 = vpop.permute.xlu1 %5680 }
 0x4f0   : > { %v5092_v42 = vadd.f32 %v5091_v27, %v5077_v11 }
 0x4f1   : > { %v5298_v46 = vpop.trf.xlu0 }
 0x4f2   : > { %v5093_v47 = vrot.slane %v5092_v42, 4  ;;  %v5410_v6 = vmul.f32 %v9735_v32, %v5298_v46 }
 0x4f4   : > { %v5094_v4 = vadd.f32 %v5093_v47, %v5092_v42 }
 0x4f5   : > { %v5299_v22 = vpop.trf.xlu0 }
 0x4f6   : > { %v5095_v12 = vrot.slane %v5094_v4, 2  ;;  %v5411_v13 = vmul.f32 %v9741_v0, %v5299_v22  ;;  %v5686_v0 = vpop.permute.xlu1 %5685 }
 0x4f8   : > { %v5096_v54 = vadd.f32 %v5095_v12, %v5094_v4  ;;  %v5426_v56 = vadd.f32 %v5411_v13, %v5410_v6 }
 0x4f9   : > { %v5300_v3 = vpop.trf.xlu0 }
 0x4fa   : > { %v5097_v34 = vrot.slane %v5096_v54, 1  ;;  %v5412_v41 = vmul.f32 %v9746_v61, %v5300_v3  ;;  %v5691_v20 = vpop.permute.xlu1 %5690 }
 0x4fc   : > { %v5098_v7 = vadd.f32 %v5097_v34, %v5096_v54  ;;  %v5427_v16 = vadd.f32 %v5426_v56, %v5412_v41 }
 0x4fd   : > { %v5301_v37 = vpop.trf.xlu0 }
 0x4fe   : > { %v5101_v14 = vadd.f32 %v9799_v44, %v5098_v7  ;;  %v5413_v15 = vmul.f32 %v9753_v21, %v5301_v37  ;;  %v5696_v58 = vpop.permute.xlu1 %5695 }
 0x500   : > { %5102 = vst [vmem:[%s7778_s4 + $0xd] sm:$0x1] %v5101_v14  ;;  %v5428_v55 = vadd.f32 %v5427_v16, %v5413_v15 }
 0x501   : > { %v5302_v49 = vpop.trf.xlu0 }
 0x502   : > { %v5414_v35 = vmul.f32 %v9759_v10, %v5302_v49  ;;  %v5701_v42 = vpop.permute.xlu1 %5700 }
 0x504   : > { %v5429_v28 = vadd.f32 %v5428_v55, %v5414_v35 }
 0x505   : > { %v5303_v39 = vpop.trf.xlu0 }
 0x506   : > { %v5415_v2 = vmul.f32 %v9764_v40, %v5303_v39  ;;  %v5706_v22 = vpop.permute.xlu1 %5705 }
 0x508   : > { %v5430_v61 = vadd.f32 %v5429_v28, %v5415_v2 }
 0x509   : > { %v5304_v52 = vpop.trf.xlu0 }
 0x50a   : > { %v5416_v32 = vmul.f32 %v9772_v17, %v5304_v52  ;;  %v5711_v34 = vpop.permute.xlu1 %5710 }
 0x50c   : > { %v5431_v1 = vadd.f32 %v5430_v61, %v5416_v32 }
 0x50d   : > { %v5305_v18 = vpop.trf.xlu0 }
 0x50e   : > { %v5417_v26 = vmul.f32 %v9781_v5, %v5305_v18 }
 0x510   : > { %v5432_v51 = vadd.f32 %v5431_v1, %v5417_v26 }
 0x511   : > { %v5306_v45 = vpop.trf.xlu0 }
 0x512   : > { %v5418_v21 = vmul.f32 %v9788_v19, %v5306_v45 }
 0x514   : > { %v5433_v57 = vadd.f32 %v5432_v51, %v5418_v21 }
 0x515   : > { %v5307_v8 = vpop.trf.xlu0 }
 0x516   : > { %6724 = vset.pattern.permute.xlu0 %v10328_v53  ;;  %v5419_v10 = vmul.f32 %v5378_v60, %v5307_v8 }
 0x518   : > { %v5434_v33 = vadd.f32 %v5433_v57, %v5419_v10 }
 0x519   : > { %v5308_v63 = vpop.trf.xlu0 }
 0x51a   : > { %v5420_v59 = vmul.f32 %v5383_v38, %v5308_v63 }
 0x51c   : > { %v5435_v9 = vadd.f32 %v5434_v33, %v5420_v59 }
 0x51d   : > { %v5309_v30 = vpop.trf.xlu0 }
 0x51e   : > { %v5421_v40 = vmul.f32 %v5388_v31, %v5309_v30 }
 0x520   : > { %v5436_v17 = vadd.f32 %v5435_v9, %v5421_v40 }
 0x521   : > { %v5310_v23 = vpop.trf.xlu0 }
 0x522   : > { %v5422_v48 = vmul.f32 %v5393_v43, %v5310_v23 }
 0x524   : > { %v5437_v5 = vadd.f32 %v5436_v17, %v5422_v48 }
 0x525   : > { %v5311_v36 = vpop.trf.xlu0 }
 0x526   : > { %v5423_v50 = vmul.f32 %v5398_v25, %v5311_v36  ;;  %v5716_v25 = vpop.permute.xlu1 %5715 }
 0x528   : > { %v5438_v46 = vadd.f32 %v5437_v5, %v5423_v50 }
 0x529   : > { %v5312_v27 = vpop.trf.xlu0 }
 0x52a   : > { %v5424_v11 = vmul.f32 %v5403_v24, %v5312_v27  ;;  %v5721_v52 = vpop.permute.xlu1 %5720 }
 0x52c   : > { %v5439_v47 = vadd.f32 %v5438_v46, %v5424_v11 }
 0x52d   : > { %v5313_v19 = vpop.trf.xlu0 }
 0x52e   : > { %v5425_v4 = vmul.f32 %v5408_v62, %v5313_v19  ;;  %v5726_v18 = vpop.permute.xlu1 %5725 }
 0x530   : > { %v5440_v60 = vadd.f32 %v5439_v47, %v5425_v4 }
 0x531   : > { %v5646_v38 = vpop.trf.xlu0 }
 0x532   : > { %v5441_v12 = vrot.slane %v5440_v60, 4  ;;  %v5731_v6 = vpop.permute.xlu1 %5730  ;;  %v5758_v15 = vmul.f32 %v9806_v29, %v5646_v38 }
 0x534   : > { %v5442_v31 = vadd.f32 %v5441_v12, %v5440_v60 }
 0x535   : > { %v5647_v54 = vpop.trf.xlu0 }
 0x536   : > { %v5443_v3 = vrot.slane %v5442_v31, 2  ;;  %v5759_v41 = vmul.f32 %v5686_v0, %v5647_v54  ;;  %v5736_v53 = vpop.permute.xlu1 %5735 }
 0x538   : > { %v5444_v43 = vadd.f32 %v5443_v3, %v5442_v31  ;;  %v5774_v16 = vadd.f32 %v5759_v41, %v5758_v15 }
 0x539   : > { %v5648_v7 = vpop.trf.xlu0 }
 0x53a   : > { %v5445_v37 = vrot.slane %v5444_v43, 1  ;;  %v5760_v8 = vmul.f32 %v5691_v20, %v5648_v7  ;;  %v5741_v1 = vpop.permute.xlu1 %5740 }
 0x53c   : > { %v5446_v14 = vadd.f32 %v5445_v37, %v5444_v43  ;;  %v5775_v2 = vadd.f32 %v5774_v16, %v5760_v8 }
 0x53d   : > { %v5649_v49 = vpop.trf.xlu0 }
 0x53e   : > { %v5449_v39 = vadd.f32 %v5446_v14, %v9799_v44  ;;  %v5761_v35 = vmul.f32 %v5696_v58, %v5649_v49  ;;  %v5746_v20 = vpop.permute.xlu1 %5745 }
 0x540   : > { %5450 = vst [vmem:[%s7778_s4 + $0xe] sm:$0x1] %v5449_v39  ;;  %v5776_v28 = vadd.f32 %v5775_v2, %v5761_v35 }
 0x541   : > { %v5650_v24 = vpop.trf.xlu0 }
 0x542   : > { %v5762_v63 = vmul.f32 %v5701_v42, %v5650_v24  ;;  %v5751_v50 = vpop.permute.xlu1 %5750 }
 0x544   : > { %v5777_v26 = vadd.f32 %v5776_v28, %v5762_v63 }
 0x545   : > { %v5651_v62 = vpop.trf.xlu0 }
 0x546   : > { %v5763_v32 = vmul.f32 %v5706_v22, %v5651_v62  ;;  %v5756_v47 = vpop.permute.xlu1 %5755 }
 0x548   : > { %v5778_v21 = vadd.f32 %v5777_v26, %v5763_v32 }
 0x549   : > { %v5652_v13 = vpop.trf.xlu0 }
 0x54a   : > { %v5764_v30 = vmul.f32 %v5711_v34, %v5652_v13 }
 0x54c   : > { %v5779_v0 = vadd.f32 %v5778_v21, %v5764_v30 }
 0x54d   : > { %v5653_v45 = vpop.trf.xlu0 }
 0x54e   : > { %v5765_v51 = vmul.f32 %v5716_v25, %v5653_v45 }
 0x550   : > { %v5780_v57 = vadd.f32 %v5779_v0, %v5765_v51 }
 0x551   : > { %v5654_v56 = vpop.trf.xlu0 }
 0x552   : > { %v5766_v23 = vmul.f32 %v5721_v52, %v5654_v56 }
 0x554   : > { %v5781_v33 = vadd.f32 %v5780_v57, %v5766_v23 }
 0x555   : > { %v5655_v55 = vpop.trf.xlu0 }
 0x556   : > { %v5767_v29 = vmul.f32 %v5726_v18, %v5655_v55 }
 0x558   : > { %v5782_v58 = vadd.f32 %v5781_v33, %v5767_v29 }
 0x559   : > { %v5656_v61 = vpop.trf.xlu0 }
 0x55a   : > { %v5768_v40 = vmul.f32 %v5731_v6, %v5656_v61 }
 0x55c   : > { %v5783_v48 = vadd.f32 %v5782_v58, %v5768_v40 }
 0x55d   : > { %v5657_v10 = vpop.trf.xlu0 }
 0x55e   : > { %v5769_v36 = vmul.f32 %v5736_v53, %v5657_v10 }
 0x560   : > { %v5784_v27 = vadd.f32 %v5783_v48, %v5769_v36 }
 0x561   : > { %v5658_v59 = vpop.trf.xlu0 }
 0x562   : > { %v5770_v17 = vmul.f32 %v5741_v1, %v5658_v59 }
 0x564   : > { %v5785_v42 = vadd.f32 %v5784_v27, %v5770_v17 }
 0x565   : > { %v5659_v9 = vpop.trf.xlu0 }
 0x566   : > { %v5771_v5 = vmul.f32 %v5746_v20, %v5659_v9 }
 0x568   : > { %v5786_v19 = vadd.f32 %v5785_v42, %v5771_v5 }
 0x569   : > { %v5660_v11 = vpop.trf.xlu0 }
 0x56a   : > { %v5772_v46 = vmul.f32 %v5751_v50, %v5660_v11 }
 0x56c   : > { %v5787_v60 = vadd.f32 %v5786_v19, %v5772_v46 }
 0x56d   : > { %v5661_v4 = vpop.trf.xlu0 }
 0x56e   : > { %v5773_v22 = vmul.f32 %v5756_v47, %v5661_v4 }
 0x570   : > { %v5788_v38 = vadd.f32 %v5787_v60, %v5773_v22 }
 0x572   : > { %v5789_v12 = vrot.slane %v5788_v38, 4 }
 0x574   : > { %v5790_v31 = vadd.f32 %v5789_v12, %v5788_v38 }
 0x576   : > { %v5791_v54 = vrot.slane %v5790_v31, 2 }
 0x578   : > { %v5792_v3 = vadd.f32 %v5791_v54, %v5790_v31 }
 0x57a   : > { %v5793_v34 = vrot.slane %v5792_v3, 1 }
 0x57c   : > { %v5794_v43 = vadd.f32 %v5793_v34, %v5792_v3 }
 0x57e   : > { %v5797_v7 = vadd.f32 %v5794_v43, %v9799_v44 }
 0x580   : > { %5798 = vst [vmem:[%s7778_s4 + $0xf] sm:$0x1] %v5797_v7 }
 0x581 PF: > { %s16_s20 = sadd.s32 1, %s6750_s20  }
 0x582   : > { %p13_p5 = scmp.ge.s32.totalorder %s16_s20, 4  }
 0x584   :  { %15 = sbr.rel (!%p13_p5) target bundleno = 2 (0x2), region = 85 }

</bundles_post_ra>
